<compile_context>
chip_gen: v7x
topology: tpu7x:2x2x1
jax: 0.10.0
libtpu: 0.0.40
codegen_flags: <defaults>
</compile_context>

<pallas_src>
import functools

import jax
import jax.numpy as jnp
from jax.experimental import pallas as pl
from jax.experimental.pallas import tpu as pltpu

# ---- sizes fixed by the module (Conv2d(3, 3, kernel_size=3, stride=1)) ----
C_IN = 3
C_OUT = 3
K = 3


def _round_up(x, m):
    return ((x + m - 1) // m) * m


def _make_conv_relu6_kernel(c_in, c_out, k, h_out, w_out_pad, w_in_pad):
    """Builds the kernel for fixed (static) tile sizes."""

    def kernel(w_ref, b_ref, x_ref, o_ref):
        # w_ref : SMEM (c_out*c_in*k*k,) f32 -- flattened OIHW conv weights
        # b_ref : SMEM (c_out,)          f32 -- conv bias
        # x_ref : VMEM (1, c_in, h, w_in_pad) f32 -- one NCHW image (W zero-padded)
        # o_ref : VMEM (1, c_out, h_out, w_out_pad) f32
        #
        # One live accumulator per output channel, initialized with the bias.
        accs = [
            jnp.full((h_out, w_out_pad), b_ref[co], dtype=jnp.float32)
            for co in range(c_out)
        ]
        for ci in range(c_in):
            for kh in range(k):
                # One lane-aligned row-block load per (ci, kh); reused for all kw, co.
                row = x_ref[0, ci, kh:kh + h_out, :]          # (h_out, w_in_pad)
                for kw in range(k):
                    # Lane shift on the XLU instead of a misaligned per-tap slice.
                    # roll(row, w_in_pad - kw) == roll(row, -kw): column j becomes
                    # original column j + kw (no wraparound inside the used region).
                    shifted = row if kw == 0 else pltpu.roll(
                        row, shift=w_in_pad - kw, axis=1)
                    tap = shifted[:, :w_out_pad]               # lane-aligned crop
                    for co in range(c_out):
                        wv = w_ref[((co * c_in + ci) * k + kh) * k + kw]
                        accs[co] = accs[co] + wv * tap
        # ReLU6 == clamp(0, 6); single lane-dense store of all output channels.
        o_ref[0] = jnp.stack([jnp.clip(a, 0.0, 6.0) for a in accs], axis=0)

    return kernel


@jax.jit
def combo_conv_relu6(x, weight, bias):
    """x: (N, 3, H, W) f32; weight: (3, 3, 3, 3) f32 (OIHW); bias: (3,) f32."""
    n, c_in, h, w = x.shape
    c_out, _, k, _ = weight.shape
    assert (c_in, c_out, k) == (C_IN, C_OUT, K)
    assert weight.shape == (c_out, c_in, k, k) and bias.shape == (c_out,)

    h_out = h - k + 1
    w_out = w - k + 1
    # Lane-dense output width; lane-aligned (multiple of 128) in-kernel input width.
    w_out_pad = _round_up(w_out, 128)
    w_in_pad = _round_up(max(w, w_out_pad + k - 1), 128)

    x_pad = jnp.pad(
        x.astype(jnp.float32), ((0, 0), (0, 0), (0, 0), (0, w_in_pad - w)))
    w_flat = weight.reshape(-1).astype(jnp.float32)   # OIHW order
    b_f32 = bias.astype(jnp.float32)

    kernel = _make_conv_relu6_kernel(c_in, c_out, k, h_out, w_out_pad, w_in_pad)

    out_pad = pl.pallas_call(
        kernel,
        out_shape=jax.ShapeDtypeStruct((n, c_out, h_out, w_out_pad), jnp.float32),
        grid=(n,),
        in_specs=[
            pl.BlockSpec(memory_space=pltpu.MemorySpace.SMEM),   # conv weights
            pl.BlockSpec(memory_space=pltpu.MemorySpace.SMEM),   # bias
            pl.BlockSpec((1, c_in, h, w_in_pad), lambda i: (i, 0, 0, 0)),
        ],
        out_specs=pl.BlockSpec((1, c_out, h_out, w_out_pad), lambda i: (i, 0, 0, 0)),
        compiler_params=pltpu.CompilerParams(dimension_semantics=("parallel",)),
    )(w_flat, b_f32, x_pad)

    # Crop the lane padding back to the true output width (no-op if already 128*m).
    return out_pad[:, :, :, :w_out]


def _reference(x, weight, bias):
    """Pure-JAX reference (lax conv, NCHW/OIHW) + ReLU6."""
    y = jax.lax.conv_general_dilated(
        x.astype(jnp.float32), weight.astype(jnp.float32),
        window_strides=(1, 1), padding="VALID",
        dimension_numbers=("NCHW", "OIHW", "NCHW"),
        precision=jax.lax.Precision.HIGHEST)
    y = y + bias.reshape(1, -1, 1, 1)
    return jnp.clip(y, 0.0, 6.0)


if __name__ == "__main__":
    key = jax.random.PRNGKey(0)
    k_x, k_w, k_b = jax.random.split(key, 3)

    # Small shapes consistent with the module: channels/kernel fixed at 3/3x3,
    # spatial chosen so W_OUT = 128 (exactly lane-dense), batch of 2 to exercise
    # the parallel grid axis.
    N, H, W = 2, 34, 130

    # Deterministic synthetic Conv2d(3, 3, kernel_size=3) parameters.
    fan_in = C_IN * K * K
    bound = 1.0 / (fan_in ** 0.5)
    weight = jax.random.uniform(k_w, (C_OUT, C_IN, K, K), jnp.float32, -bound, bound)
    bias = jax.random.uniform(k_b, (C_OUT,), jnp.float32, -bound, bound)

    # Input mimics test_data[0]: 2 * randn(...)
    x = 2.0 * jax.random.normal(k_x, (N, C_IN, H, W), jnp.float32)

    out = combo_conv_relu6(x, weight, bias)
    out = jax.block_until_ready(out)

    ref = _reference(x, weight, bias)
    assert out.shape == (N, C_OUT, H - K + 1, W - K + 1)
    assert jnp.allclose(out, ref, atol=1e-4, rtol=1e-5)

    print("KERNEL_OK")
</pallas_src>

<mosaic_0001>
module attributes {stable_mosaic.version = 11 : i64} {
  func.func @kernel(%arg0: i32, %arg1: memref<81xf32, #tpu.memory_space<smem>>, %arg2: memref<3xf32, #tpu.memory_space<smem>>, %arg3: memref<1x3x34x256xf32, #tpu.memory_space<vmem>>, %arg4: memref<1x3x32x128xf32, #tpu.memory_space<vmem>>) attributes {dimension_semantics = [#tpu.dimension_semantics<parallel>], iteration_bounds = array<i64: 2>, scalar_prefetch = 0 : i64, scratch_operands = 0 : i64, tpu.core_type = #tpu.core_type<tc>, window_params = [{transform_indices = @transform_0, window_bounds = array<i64: 81>}, {transform_indices = @transform_1, window_bounds = array<i64: 3>}, {transform_indices = @transform_2, window_bounds = array<i64: 1, 3, 34, 256>}, {transform_indices = @transform_3, window_bounds = array<i64: 1, 3, 32, 128>}]} {
    %c0 = arith.constant 0 : index
    %0 = memref.load %arg2[%c0] : memref<3xf32, #tpu.memory_space<smem>>
    %1 = vector.broadcast %0 : f32 to vector<32x128xf32>
    %c1 = arith.constant 1 : index
    %2 = memref.load %arg2[%c1] : memref<3xf32, #tpu.memory_space<smem>>
    %3 = vector.broadcast %2 : f32 to vector<32x128xf32>
    %c2 = arith.constant 2 : index
    %4 = memref.load %arg2[%c2] : memref<3xf32, #tpu.memory_space<smem>>
    %5 = vector.broadcast %4 : f32 to vector<32x128xf32>
    %c0_0 = arith.constant 0 : index
    %c0_1 = arith.constant 0 : index
    %c0_2 = arith.constant 0 : index
    %c0_3 = arith.constant 0 : index
    %6 = vector.load %arg3[%c0_0, %c0_1, %c0_2, %c0_3] : memref<1x3x34x256xf32, #tpu.memory_space<vmem>>, vector<1x1x32x256xf32>
    %7 = vector.shape_cast %6 : vector<1x1x32x256xf32> to vector<32x256xf32>
    %8 = vector.extract_strided_slice %7 {offsets = [0, 0], sizes = [32, 128], strides = [1, 1]} : vector<32x256xf32> to vector<32x128xf32>
    %c0_4 = arith.constant 0 : index
    %9 = memref.load %arg1[%c0_4] : memref<81xf32, #tpu.memory_space<smem>>
    %10 = vector.broadcast %9 : f32 to vector<32x128xf32>
    %11 = arith.mulf %10, %8 : vector<32x128xf32>
    %12 = arith.addf %1, %11 : vector<32x128xf32>
    %c27 = arith.constant 27 : index
    %13 = memref.load %arg1[%c27] : memref<81xf32, #tpu.memory_space<smem>>
    %14 = vector.broadcast %13 : f32 to vector<32x128xf32>
    %15 = arith.mulf %14, %8 : vector<32x128xf32>
    %16 = arith.addf %3, %15 : vector<32x128xf32>
    %c54 = arith.constant 54 : index
    %17 = memref.load %arg1[%c54] : memref<81xf32, #tpu.memory_space<smem>>
    %18 = vector.broadcast %17 : f32 to vector<32x128xf32>
    %19 = arith.mulf %18, %8 : vector<32x128xf32>
    %20 = arith.addf %5, %19 : vector<32x128xf32>
    %c255_i32 = arith.constant 255 : i32
    %21 = tpu.dynamic_rotate %7 by %c255_i32 dim 1 : vector<32x256xf32>, i32 -> vector<32x256xf32>
    %22 = vector.extract_strided_slice %21 {offsets = [0, 0], sizes = [32, 128], strides = [1, 1]} : vector<32x256xf32> to vector<32x128xf32>
    %c1_5 = arith.constant 1 : index
    %23 = memref.load %arg1[%c1_5] : memref<81xf32, #tpu.memory_space<smem>>
    %24 = vector.broadcast %23 : f32 to vector<32x128xf32>
    %25 = arith.mulf %24, %22 : vector<32x128xf32>
    %26 = arith.addf %12, %25 : vector<32x128xf32>
    %c28 = arith.constant 28 : index
    %27 = memref.load %arg1[%c28] : memref<81xf32, #tpu.memory_space<smem>>
    %28 = vector.broadcast %27 : f32 to vector<32x128xf32>
    %29 = arith.mulf %28, %22 : vector<32x128xf32>
    %30 = arith.addf %16, %29 : vector<32x128xf32>
    %c55 = arith.constant 55 : index
    %31 = memref.load %arg1[%c55] : memref<81xf32, #tpu.memory_space<smem>>
    %32 = vector.broadcast %31 : f32 to vector<32x128xf32>
    %33 = arith.mulf %32, %22 : vector<32x128xf32>
    %34 = arith.addf %20, %33 : vector<32x128xf32>
    %c254_i32 = arith.constant 254 : i32
    %35 = tpu.dynamic_rotate %7 by %c254_i32 dim 1 : vector<32x256xf32>, i32 -> vector<32x256xf32>
    %36 = vector.extract_strided_slice %35 {offsets = [0, 0], sizes = [32, 128], strides = [1, 1]} : vector<32x256xf32> to vector<32x128xf32>
    %c2_6 = arith.constant 2 : index
    %37 = memref.load %arg1[%c2_6] : memref<81xf32, #tpu.memory_space<smem>>
    %38 = vector.broadcast %37 : f32 to vector<32x128xf32>
    %39 = arith.mulf %38, %36 : vector<32x128xf32>
    %40 = arith.addf %26, %39 : vector<32x128xf32>
    %c29 = arith.constant 29 : index
    %41 = memref.load %arg1[%c29] : memref<81xf32, #tpu.memory_space<smem>>
    %42 = vector.broadcast %41 : f32 to vector<32x128xf32>
    %43 = arith.mulf %42, %36 : vector<32x128xf32>
    %44 = arith.addf %30, %43 : vector<32x128xf32>
    %c56 = arith.constant 56 : index
    %45 = memref.load %arg1[%c56] : memref<81xf32, #tpu.memory_space<smem>>
    %46 = vector.broadcast %45 : f32 to vector<32x128xf32>
    %47 = arith.mulf %46, %36 : vector<32x128xf32>
    %48 = arith.addf %34, %47 : vector<32x128xf32>
    %c0_7 = arith.constant 0 : index
    %c0_8 = arith.constant 0 : index
    %c1_9 = arith.constant 1 : index
    %c0_10 = arith.constant 0 : index
    %49 = vector.load %arg3[%c0_7, %c0_8, %c1_9, %c0_10] : memref<1x3x34x256xf32, #tpu.memory_space<vmem>>, vector<1x1x32x256xf32>
    %50 = vector.shape_cast %49 : vector<1x1x32x256xf32> to vector<32x256xf32>
    %51 = vector.extract_strided_slice %50 {offsets = [0, 0], sizes = [32, 128], strides = [1, 1]} : vector<32x256xf32> to vector<32x128xf32>
    %c3 = arith.constant 3 : index
    %52 = memref.load %arg1[%c3] : memref<81xf32, #tpu.memory_space<smem>>
    %53 = vector.broadcast %52 : f32 to vector<32x128xf32>
    %54 = arith.mulf %53, %51 : vector<32x128xf32>
    %55 = arith.addf %40, %54 : vector<32x128xf32>
    %c30 = arith.constant 30 : index
    %56 = memref.load %arg1[%c30] : memref<81xf32, #tpu.memory_space<smem>>
    %57 = vector.broadcast %56 : f32 to vector<32x128xf32>
    %58 = arith.mulf %57, %51 : vector<32x128xf32>
    %59 = arith.addf %44, %58 : vector<32x128xf32>
    %c57 = arith.constant 57 : index
    %60 = memref.load %arg1[%c57] : memref<81xf32, #tpu.memory_space<smem>>
    %61 = vector.broadcast %60 : f32 to vector<32x128xf32>
    %62 = arith.mulf %61, %51 : vector<32x128xf32>
    %63 = arith.addf %48, %62 : vector<32x128xf32>
    %c255_i32_11 = arith.constant 255 : i32
    %64 = tpu.dynamic_rotate %50 by %c255_i32_11 dim 1 : vector<32x256xf32>, i32 -> vector<32x256xf32>
    %65 = vector.extract_strided_slice %64 {offsets = [0, 0], sizes = [32, 128], strides = [1, 1]} : vector<32x256xf32> to vector<32x128xf32>
    %c4 = arith.constant 4 : index
    %66 = memref.load %arg1[%c4] : memref<81xf32, #tpu.memory_space<smem>>
    %67 = vector.broadcast %66 : f32 to vector<32x128xf32>
    %68 = arith.mulf %67, %65 : vector<32x128xf32>
    %69 = arith.addf %55, %68 : vector<32x128xf32>
    %c31 = arith.constant 31 : index
    %70 = memref.load %arg1[%c31] : memref<81xf32, #tpu.memory_space<smem>>
    %71 = vector.broadcast %70 : f32 to vector<32x128xf32>
    %72 = arith.mulf %71, %65 : vector<32x128xf32>
    %73 = arith.addf %59, %72 : vector<32x128xf32>
    %c58 = arith.constant 58 : index
    %74 = memref.load %arg1[%c58] : memref<81xf32, #tpu.memory_space<smem>>
    %75 = vector.broadcast %74 : f32 to vector<32x128xf32>
    %76 = arith.mulf %75, %65 : vector<32x128xf32>
    %77 = arith.addf %63, %76 : vector<32x128xf32>
    %c254_i32_12 = arith.constant 254 : i32
    %78 = tpu.dynamic_rotate %50 by %c254_i32_12 dim 1 : vector<32x256xf32>, i32 -> vector<32x256xf32>
    %79 = vector.extract_strided_slice %78 {offsets = [0, 0], sizes = [32, 128], strides = [1, 1]} : vector<32x256xf32> to vector<32x128xf32>
    %c5 = arith.constant 5 : index
    %80 = memref.load %arg1[%c5] : memref<81xf32, #tpu.memory_space<smem>>
    %81 = vector.broadcast %80 : f32 to vector<32x128xf32>
    %82 = arith.mulf %81, %79 : vector<32x128xf32>
    %83 = arith.addf %69, %82 : vector<32x128xf32>
    %c32 = arith.constant 32 : index
    %84 = memref.load %arg1[%c32] : memref<81xf32, #tpu.memory_space<smem>>
    %85 = vector.broadcast %84 : f32 to vector<32x128xf32>
    %86 = arith.mulf %85, %79 : vector<32x128xf32>
    %87 = arith.addf %73, %86 : vector<32x128xf32>
    %c59 = arith.constant 59 : index
    %88 = memref.load %arg1[%c59] : memref<81xf32, #tpu.memory_space<smem>>
    %89 = vector.broadcast %88 : f32 to vector<32x128xf32>
    %90 = arith.mulf %89, %79 : vector<32x128xf32>
    %91 = arith.addf %77, %90 : vector<32x128xf32>
    %c0_13 = arith.constant 0 : index
    %c0_14 = arith.constant 0 : index
    %c2_15 = arith.constant 2 : index
    %c0_16 = arith.constant 0 : index
    %92 = vector.load %arg3[%c0_13, %c0_14, %c2_15, %c0_16] : memref<1x3x34x256xf32, #tpu.memory_space<vmem>>, vector<1x1x32x256xf32>
    %93 = vector.shape_cast %92 : vector<1x1x32x256xf32> to vector<32x256xf32>
    %94 = vector.extract_strided_slice %93 {offsets = [0, 0], sizes = [32, 128], strides = [1, 1]} : vector<32x256xf32> to vector<32x128xf32>
    %c6 = arith.constant 6 : index
    %95 = memref.load %arg1[%c6] : memref<81xf32, #tpu.memory_space<smem>>
    %96 = vector.broadcast %95 : f32 to vector<32x128xf32>
    %97 = arith.mulf %96, %94 : vector<32x128xf32>
    %98 = arith.addf %83, %97 : vector<32x128xf32>
    %c33 = arith.constant 33 : index
    %99 = memref.load %arg1[%c33] : memref<81xf32, #tpu.memory_space<smem>>
    %100 = vector.broadcast %99 : f32 to vector<32x128xf32>
    %101 = arith.mulf %100, %94 : vector<32x128xf32>
    %102 = arith.addf %87, %101 : vector<32x128xf32>
    %c60 = arith.constant 60 : index
    %103 = memref.load %arg1[%c60] : memref<81xf32, #tpu.memory_space<smem>>
    %104 = vector.broadcast %103 : f32 to vector<32x128xf32>
    %105 = arith.mulf %104, %94 : vector<32x128xf32>
    %106 = arith.addf %91, %105 : vector<32x128xf32>
    %c255_i32_17 = arith.constant 255 : i32
    %107 = tpu.dynamic_rotate %93 by %c255_i32_17 dim 1 : vector<32x256xf32>, i32 -> vector<32x256xf32>
    %108 = vector.extract_strided_slice %107 {offsets = [0, 0], sizes = [32, 128], strides = [1, 1]} : vector<32x256xf32> to vector<32x128xf32>
    %c7 = arith.constant 7 : index
    %109 = memref.load %arg1[%c7] : memref<81xf32, #tpu.memory_space<smem>>
    %110 = vector.broadcast %109 : f32 to vector<32x128xf32>
    %111 = arith.mulf %110, %108 : vector<32x128xf32>
    %112 = arith.addf %98, %111 : vector<32x128xf32>
    %c34 = arith.constant 34 : index
    %113 = memref.load %arg1[%c34] : memref<81xf32, #tpu.memory_space<smem>>
    %114 = vector.broadcast %113 : f32 to vector<32x128xf32>
    %115 = arith.mulf %114, %108 : vector<32x128xf32>
    %116 = arith.addf %102, %115 : vector<32x128xf32>
    %c61 = arith.constant 61 : index
    %117 = memref.load %arg1[%c61] : memref<81xf32, #tpu.memory_space<smem>>
    %118 = vector.broadcast %117 : f32 to vector<32x128xf32>
    %119 = arith.mulf %118, %108 : vector<32x128xf32>
    %120 = arith.addf %106, %119 : vector<32x128xf32>
    %c254_i32_18 = arith.constant 254 : i32
    %121 = tpu.dynamic_rotate %93 by %c254_i32_18 dim 1 : vector<32x256xf32>, i32 -> vector<32x256xf32>
    %122 = vector.extract_strided_slice %121 {offsets = [0, 0], sizes = [32, 128], strides = [1, 1]} : vector<32x256xf32> to vector<32x128xf32>
    %c8 = arith.constant 8 : index
    %123 = memref.load %arg1[%c8] : memref<81xf32, #tpu.memory_space<smem>>
    %124 = vector.broadcast %123 : f32 to vector<32x128xf32>
    %125 = arith.mulf %124, %122 : vector<32x128xf32>
    %126 = arith.addf %112, %125 : vector<32x128xf32>
    %c35 = arith.constant 35 : index
    %127 = memref.load %arg1[%c35] : memref<81xf32, #tpu.memory_space<smem>>
    %128 = vector.broadcast %127 : f32 to vector<32x128xf32>
    %129 = arith.mulf %128, %122 : vector<32x128xf32>
    %130 = arith.addf %116, %129 : vector<32x128xf32>
    %c62 = arith.constant 62 : index
    %131 = memref.load %arg1[%c62] : memref<81xf32, #tpu.memory_space<smem>>
    %132 = vector.broadcast %131 : f32 to vector<32x128xf32>
    %133 = arith.mulf %132, %122 : vector<32x128xf32>
    %134 = arith.addf %120, %133 : vector<32x128xf32>
    %c0_19 = arith.constant 0 : index
    %c1_20 = arith.constant 1 : index
    %c0_21 = arith.constant 0 : index
    %c0_22 = arith.constant 0 : index
    %135 = vector.load %arg3[%c0_19, %c1_20, %c0_21, %c0_22] : memref<1x3x34x256xf32, #tpu.memory_space<vmem>>, vector<1x1x32x256xf32>
    %136 = vector.shape_cast %135 : vector<1x1x32x256xf32> to vector<32x256xf32>
    %137 = vector.extract_strided_slice %136 {offsets = [0, 0], sizes = [32, 128], strides = [1, 1]} : vector<32x256xf32> to vector<32x128xf32>
    %c9 = arith.constant 9 : index
    %138 = memref.load %arg1[%c9] : memref<81xf32, #tpu.memory_space<smem>>
    %139 = vector.broadcast %138 : f32 to vector<32x128xf32>
    %140 = arith.mulf %139, %137 : vector<32x128xf32>
    %141 = arith.addf %126, %140 : vector<32x128xf32>
    %c36 = arith.constant 36 : index
    %142 = memref.load %arg1[%c36] : memref<81xf32, #tpu.memory_space<smem>>
    %143 = vector.broadcast %142 : f32 to vector<32x128xf32>
    %144 = arith.mulf %143, %137 : vector<32x128xf32>
    %145 = arith.addf %130, %144 : vector<32x128xf32>
    %c63 = arith.constant 63 : index
    %146 = memref.load %arg1[%c63] : memref<81xf32, #tpu.memory_space<smem>>
    %147 = vector.broadcast %146 : f32 to vector<32x128xf32>
    %148 = arith.mulf %147, %137 : vector<32x128xf32>
    %149 = arith.addf %134, %148 : vector<32x128xf32>
    %c255_i32_23 = arith.constant 255 : i32
    %150 = tpu.dynamic_rotate %136 by %c255_i32_23 dim 1 : vector<32x256xf32>, i32 -> vector<32x256xf32>
    %151 = vector.extract_strided_slice %150 {offsets = [0, 0], sizes = [32, 128], strides = [1, 1]} : vector<32x256xf32> to vector<32x128xf32>
    %c10 = arith.constant 10 : index
    %152 = memref.load %arg1[%c10] : memref<81xf32, #tpu.memory_space<smem>>
    %153 = vector.broadcast %152 : f32 to vector<32x128xf32>
    %154 = arith.mulf %153, %151 : vector<32x128xf32>
    %155 = arith.addf %141, %154 : vector<32x128xf32>
    %c37 = arith.constant 37 : index
    %156 = memref.load %arg1[%c37] : memref<81xf32, #tpu.memory_space<smem>>
    %157 = vector.broadcast %156 : f32 to vector<32x128xf32>
    %158 = arith.mulf %157, %151 : vector<32x128xf32>
    %159 = arith.addf %145, %158 : vector<32x128xf32>
    %c64 = arith.constant 64 : index
    %160 = memref.load %arg1[%c64] : memref<81xf32, #tpu.memory_space<smem>>
    %161 = vector.broadcast %160 : f32 to vector<32x128xf32>
    %162 = arith.mulf %161, %151 : vector<32x128xf32>
    %163 = arith.addf %149, %162 : vector<32x128xf32>
    %c254_i32_24 = arith.constant 254 : i32
    %164 = tpu.dynamic_rotate %136 by %c254_i32_24 dim 1 : vector<32x256xf32>, i32 -> vector<32x256xf32>
    %165 = vector.extract_strided_slice %164 {offsets = [0, 0], sizes = [32, 128], strides = [1, 1]} : vector<32x256xf32> to vector<32x128xf32>
    %c11 = arith.constant 11 : index
    %166 = memref.load %arg1[%c11] : memref<81xf32, #tpu.memory_space<smem>>
    %167 = vector.broadcast %166 : f32 to vector<32x128xf32>
    %168 = arith.mulf %167, %165 : vector<32x128xf32>
    %169 = arith.addf %155, %168 : vector<32x128xf32>
    %c38 = arith.constant 38 : index
    %170 = memref.load %arg1[%c38] : memref<81xf32, #tpu.memory_space<smem>>
    %171 = vector.broadcast %170 : f32 to vector<32x128xf32>
    %172 = arith.mulf %171, %165 : vector<32x128xf32>
    %173 = arith.addf %159, %172 : vector<32x128xf32>
    %c65 = arith.constant 65 : index
    %174 = memref.load %arg1[%c65] : memref<81xf32, #tpu.memory_space<smem>>
    %175 = vector.broadcast %174 : f32 to vector<32x128xf32>
    %176 = arith.mulf %175, %165 : vector<32x128xf32>
    %177 = arith.addf %163, %176 : vector<32x128xf32>
    %c0_25 = arith.constant 0 : index
    %c1_26 = arith.constant 1 : index
    %c1_27 = arith.constant 1 : index
    %c0_28 = arith.constant 0 : index
    %178 = vector.load %arg3[%c0_25, %c1_26, %c1_27, %c0_28] : memref<1x3x34x256xf32, #tpu.memory_space<vmem>>, vector<1x1x32x256xf32>
    %179 = vector.shape_cast %178 : vector<1x1x32x256xf32> to vector<32x256xf32>
    %180 = vector.extract_strided_slice %179 {offsets = [0, 0], sizes = [32, 128], strides = [1, 1]} : vector<32x256xf32> to vector<32x128xf32>
    %c12 = arith.constant 12 : index
    %181 = memref.load %arg1[%c12] : memref<81xf32, #tpu.memory_space<smem>>
    %182 = vector.broadcast %181 : f32 to vector<32x128xf32>
    %183 = arith.mulf %182, %180 : vector<32x128xf32>
    %184 = arith.addf %169, %183 : vector<32x128xf32>
    %c39 = arith.constant 39 : index
    %185 = memref.load %arg1[%c39] : memref<81xf32, #tpu.memory_space<smem>>
    %186 = vector.broadcast %185 : f32 to vector<32x128xf32>
    %187 = arith.mulf %186, %180 : vector<32x128xf32>
    %188 = arith.addf %173, %187 : vector<32x128xf32>
    %c66 = arith.constant 66 : index
    %189 = memref.load %arg1[%c66] : memref<81xf32, #tpu.memory_space<smem>>
    %190 = vector.broadcast %189 : f32 to vector<32x128xf32>
    %191 = arith.mulf %190, %180 : vector<32x128xf32>
    %192 = arith.addf %177, %191 : vector<32x128xf32>
    %c255_i32_29 = arith.constant 255 : i32
    %193 = tpu.dynamic_rotate %179 by %c255_i32_29 dim 1 : vector<32x256xf32>, i32 -> vector<32x256xf32>
    %194 = vector.extract_strided_slice %193 {offsets = [0, 0], sizes = [32, 128], strides = [1, 1]} : vector<32x256xf32> to vector<32x128xf32>
    %c13 = arith.constant 13 : index
    %195 = memref.load %arg1[%c13] : memref<81xf32, #tpu.memory_space<smem>>
    %196 = vector.broadcast %195 : f32 to vector<32x128xf32>
    %197 = arith.mulf %196, %194 : vector<32x128xf32>
    %198 = arith.addf %184, %197 : vector<32x128xf32>
    %c40 = arith.constant 40 : index
    %199 = memref.load %arg1[%c40] : memref<81xf32, #tpu.memory_space<smem>>
    %200 = vector.broadcast %199 : f32 to vector<32x128xf32>
    %201 = arith.mulf %200, %194 : vector<32x128xf32>
    %202 = arith.addf %188, %201 : vector<32x128xf32>
    %c67 = arith.constant 67 : index
    %203 = memref.load %arg1[%c67] : memref<81xf32, #tpu.memory_space<smem>>
    %204 = vector.broadcast %203 : f32 to vector<32x128xf32>
    %205 = arith.mulf %204, %194 : vector<32x128xf32>
    %206 = arith.addf %192, %205 : vector<32x128xf32>
    %c254_i32_30 = arith.constant 254 : i32
    %207 = tpu.dynamic_rotate %179 by %c254_i32_30 dim 1 : vector<32x256xf32>, i32 -> vector<32x256xf32>
    %208 = vector.extract_strided_slice %207 {offsets = [0, 0], sizes = [32, 128], strides = [1, 1]} : vector<32x256xf32> to vector<32x128xf32>
    %c14 = arith.constant 14 : index
    %209 = memref.load %arg1[%c14] : memref<81xf32, #tpu.memory_space<smem>>
    %210 = vector.broadcast %209 : f32 to vector<32x128xf32>
    %211 = arith.mulf %210, %208 : vector<32x128xf32>
    %212 = arith.addf %198, %211 : vector<32x128xf32>
    %c41 = arith.constant 41 : index
    %213 = memref.load %arg1[%c41] : memref<81xf32, #tpu.memory_space<smem>>
    %214 = vector.broadcast %213 : f32 to vector<32x128xf32>
    %215 = arith.mulf %214, %208 : vector<32x128xf32>
    %216 = arith.addf %202, %215 : vector<32x128xf32>
    %c68 = arith.constant 68 : index
    %217 = memref.load %arg1[%c68] : memref<81xf32, #tpu.memory_space<smem>>
    %218 = vector.broadcast %217 : f32 to vector<32x128xf32>
    %219 = arith.mulf %218, %208 : vector<32x128xf32>
    %220 = arith.addf %206, %219 : vector<32x128xf32>
    %c0_31 = arith.constant 0 : index
    %c1_32 = arith.constant 1 : index
    %c2_33 = arith.constant 2 : index
    %c0_34 = arith.constant 0 : index
    %221 = vector.load %arg3[%c0_31, %c1_32, %c2_33, %c0_34] : memref<1x3x34x256xf32, #tpu.memory_space<vmem>>, vector<1x1x32x256xf32>
    %222 = vector.shape_cast %221 : vector<1x1x32x256xf32> to vector<32x256xf32>
    %223 = vector.extract_strided_slice %222 {offsets = [0, 0], sizes = [32, 128], strides = [1, 1]} : vector<32x256xf32> to vector<32x128xf32>
    %c15 = arith.constant 15 : index
    %224 = memref.load %arg1[%c15] : memref<81xf32, #tpu.memory_space<smem>>
    %225 = vector.broadcast %224 : f32 to vector<32x128xf32>
    %226 = arith.mulf %225, %223 : vector<32x128xf32>
    %227 = arith.addf %212, %226 : vector<32x128xf32>
    %c42 = arith.constant 42 : index
    %228 = memref.load %arg1[%c42] : memref<81xf32, #tpu.memory_space<smem>>
    %229 = vector.broadcast %228 : f32 to vector<32x128xf32>
    %230 = arith.mulf %229, %223 : vector<32x128xf32>
    %231 = arith.addf %216, %230 : vector<32x128xf32>
    %c69 = arith.constant 69 : index
    %232 = memref.load %arg1[%c69] : memref<81xf32, #tpu.memory_space<smem>>
    %233 = vector.broadcast %232 : f32 to vector<32x128xf32>
    %234 = arith.mulf %233, %223 : vector<32x128xf32>
    %235 = arith.addf %220, %234 : vector<32x128xf32>
    %c255_i32_35 = arith.constant 255 : i32
    %236 = tpu.dynamic_rotate %222 by %c255_i32_35 dim 1 : vector<32x256xf32>, i32 -> vector<32x256xf32>
    %237 = vector.extract_strided_slice %236 {offsets = [0, 0], sizes = [32, 128], strides = [1, 1]} : vector<32x256xf32> to vector<32x128xf32>
    %c16 = arith.constant 16 : index
    %238 = memref.load %arg1[%c16] : memref<81xf32, #tpu.memory_space<smem>>
    %239 = vector.broadcast %238 : f32 to vector<32x128xf32>
    %240 = arith.mulf %239, %237 : vector<32x128xf32>
    %241 = arith.addf %227, %240 : vector<32x128xf32>
    %c43 = arith.constant 43 : index
    %242 = memref.load %arg1[%c43] : memref<81xf32, #tpu.memory_space<smem>>
    %243 = vector.broadcast %242 : f32 to vector<32x128xf32>
    %244 = arith.mulf %243, %237 : vector<32x128xf32>
    %245 = arith.addf %231, %244 : vector<32x128xf32>
    %c70 = arith.constant 70 : index
    %246 = memref.load %arg1[%c70] : memref<81xf32, #tpu.memory_space<smem>>
    %247 = vector.broadcast %246 : f32 to vector<32x128xf32>
    %248 = arith.mulf %247, %237 : vector<32x128xf32>
    %249 = arith.addf %235, %248 : vector<32x128xf32>
    %c254_i32_36 = arith.constant 254 : i32
    %250 = tpu.dynamic_rotate %222 by %c254_i32_36 dim 1 : vector<32x256xf32>, i32 -> vector<32x256xf32>
    %251 = vector.extract_strided_slice %250 {offsets = [0, 0], sizes = [32, 128], strides = [1, 1]} : vector<32x256xf32> to vector<32x128xf32>
    %c17 = arith.constant 17 : index
    %252 = memref.load %arg1[%c17] : memref<81xf32, #tpu.memory_space<smem>>
    %253 = vector.broadcast %252 : f32 to vector<32x128xf32>
    %254 = arith.mulf %253, %251 : vector<32x128xf32>
    %255 = arith.addf %241, %254 : vector<32x128xf32>
    %c44 = arith.constant 44 : index
    %256 = memref.load %arg1[%c44] : memref<81xf32, #tpu.memory_space<smem>>
    %257 = vector.broadcast %256 : f32 to vector<32x128xf32>
    %258 = arith.mulf %257, %251 : vector<32x128xf32>
    %259 = arith.addf %245, %258 : vector<32x128xf32>
    %c71 = arith.constant 71 : index
    %260 = memref.load %arg1[%c71] : memref<81xf32, #tpu.memory_space<smem>>
    %261 = vector.broadcast %260 : f32 to vector<32x128xf32>
    %262 = arith.mulf %261, %251 : vector<32x128xf32>
    %263 = arith.addf %249, %262 : vector<32x128xf32>
    %c0_37 = arith.constant 0 : index
    %c2_38 = arith.constant 2 : index
    %c0_39 = arith.constant 0 : index
    %c0_40 = arith.constant 0 : index
    %264 = vector.load %arg3[%c0_37, %c2_38, %c0_39, %c0_40] : memref<1x3x34x256xf32, #tpu.memory_space<vmem>>, vector<1x1x32x256xf32>
    %265 = vector.shape_cast %264 : vector<1x1x32x256xf32> to vector<32x256xf32>
    %266 = vector.extract_strided_slice %265 {offsets = [0, 0], sizes = [32, 128], strides = [1, 1]} : vector<32x256xf32> to vector<32x128xf32>
    %c18 = arith.constant 18 : index
    %267 = memref.load %arg1[%c18] : memref<81xf32, #tpu.memory_space<smem>>
    %268 = vector.broadcast %267 : f32 to vector<32x128xf32>
    %269 = arith.mulf %268, %266 : vector<32x128xf32>
    %270 = arith.addf %255, %269 : vector<32x128xf32>
    %c45 = arith.constant 45 : index
    %271 = memref.load %arg1[%c45] : memref<81xf32, #tpu.memory_space<smem>>
    %272 = vector.broadcast %271 : f32 to vector<32x128xf32>
    %273 = arith.mulf %272, %266 : vector<32x128xf32>
    %274 = arith.addf %259, %273 : vector<32x128xf32>
    %c72 = arith.constant 72 : index
    %275 = memref.load %arg1[%c72] : memref<81xf32, #tpu.memory_space<smem>>
    %276 = vector.broadcast %275 : f32 to vector<32x128xf32>
    %277 = arith.mulf %276, %266 : vector<32x128xf32>
    %278 = arith.addf %263, %277 : vector<32x128xf32>
    %c255_i32_41 = arith.constant 255 : i32
    %279 = tpu.dynamic_rotate %265 by %c255_i32_41 dim 1 : vector<32x256xf32>, i32 -> vector<32x256xf32>
    %280 = vector.extract_strided_slice %279 {offsets = [0, 0], sizes = [32, 128], strides = [1, 1]} : vector<32x256xf32> to vector<32x128xf32>
    %c19 = arith.constant 19 : index
    %281 = memref.load %arg1[%c19] : memref<81xf32, #tpu.memory_space<smem>>
    %282 = vector.broadcast %281 : f32 to vector<32x128xf32>
    %283 = arith.mulf %282, %280 : vector<32x128xf32>
    %284 = arith.addf %270, %283 : vector<32x128xf32>
    %c46 = arith.constant 46 : index
    %285 = memref.load %arg1[%c46] : memref<81xf32, #tpu.memory_space<smem>>
    %286 = vector.broadcast %285 : f32 to vector<32x128xf32>
    %287 = arith.mulf %286, %280 : vector<32x128xf32>
    %288 = arith.addf %274, %287 : vector<32x128xf32>
    %c73 = arith.constant 73 : index
    %289 = memref.load %arg1[%c73] : memref<81xf32, #tpu.memory_space<smem>>
    %290 = vector.broadcast %289 : f32 to vector<32x128xf32>
    %291 = arith.mulf %290, %280 : vector<32x128xf32>
    %292 = arith.addf %278, %291 : vector<32x128xf32>
    %c254_i32_42 = arith.constant 254 : i32
    %293 = tpu.dynamic_rotate %265 by %c254_i32_42 dim 1 : vector<32x256xf32>, i32 -> vector<32x256xf32>
    %294 = vector.extract_strided_slice %293 {offsets = [0, 0], sizes = [32, 128], strides = [1, 1]} : vector<32x256xf32> to vector<32x128xf32>
    %c20 = arith.constant 20 : index
    %295 = memref.load %arg1[%c20] : memref<81xf32, #tpu.memory_space<smem>>
    %296 = vector.broadcast %295 : f32 to vector<32x128xf32>
    %297 = arith.mulf %296, %294 : vector<32x128xf32>
    %298 = arith.addf %284, %297 : vector<32x128xf32>
    %c47 = arith.constant 47 : index
    %299 = memref.load %arg1[%c47] : memref<81xf32, #tpu.memory_space<smem>>
    %300 = vector.broadcast %299 : f32 to vector<32x128xf32>
    %301 = arith.mulf %300, %294 : vector<32x128xf32>
    %302 = arith.addf %288, %301 : vector<32x128xf32>
    %c74 = arith.constant 74 : index
    %303 = memref.load %arg1[%c74] : memref<81xf32, #tpu.memory_space<smem>>
    %304 = vector.broadcast %303 : f32 to vector<32x128xf32>
    %305 = arith.mulf %304, %294 : vector<32x128xf32>
    %306 = arith.addf %292, %305 : vector<32x128xf32>
    %c0_43 = arith.constant 0 : index
    %c2_44 = arith.constant 2 : index
    %c1_45 = arith.constant 1 : index
    %c0_46 = arith.constant 0 : index
    %307 = vector.load %arg3[%c0_43, %c2_44, %c1_45, %c0_46] : memref<1x3x34x256xf32, #tpu.memory_space<vmem>>, vector<1x1x32x256xf32>
    %308 = vector.shape_cast %307 : vector<1x1x32x256xf32> to vector<32x256xf32>
    %309 = vector.extract_strided_slice %308 {offsets = [0, 0], sizes = [32, 128], strides = [1, 1]} : vector<32x256xf32> to vector<32x128xf32>
    %c21 = arith.constant 21 : index
    %310 = memref.load %arg1[%c21] : memref<81xf32, #tpu.memory_space<smem>>
    %311 = vector.broadcast %310 : f32 to vector<32x128xf32>
    %312 = arith.mulf %311, %309 : vector<32x128xf32>
    %313 = arith.addf %298, %312 : vector<32x128xf32>
    %c48 = arith.constant 48 : index
    %314 = memref.load %arg1[%c48] : memref<81xf32, #tpu.memory_space<smem>>
    %315 = vector.broadcast %314 : f32 to vector<32x128xf32>
    %316 = arith.mulf %315, %309 : vector<32x128xf32>
    %317 = arith.addf %302, %316 : vector<32x128xf32>
    %c75 = arith.constant 75 : index
    %318 = memref.load %arg1[%c75] : memref<81xf32, #tpu.memory_space<smem>>
    %319 = vector.broadcast %318 : f32 to vector<32x128xf32>
    %320 = arith.mulf %319, %309 : vector<32x128xf32>
    %321 = arith.addf %306, %320 : vector<32x128xf32>
    %c255_i32_47 = arith.constant 255 : i32
    %322 = tpu.dynamic_rotate %308 by %c255_i32_47 dim 1 : vector<32x256xf32>, i32 -> vector<32x256xf32>
    %323 = vector.extract_strided_slice %322 {offsets = [0, 0], sizes = [32, 128], strides = [1, 1]} : vector<32x256xf32> to vector<32x128xf32>
    %c22 = arith.constant 22 : index
    %324 = memref.load %arg1[%c22] : memref<81xf32, #tpu.memory_space<smem>>
    %325 = vector.broadcast %324 : f32 to vector<32x128xf32>
    %326 = arith.mulf %325, %323 : vector<32x128xf32>
    %327 = arith.addf %313, %326 : vector<32x128xf32>
    %c49 = arith.constant 49 : index
    %328 = memref.load %arg1[%c49] : memref<81xf32, #tpu.memory_space<smem>>
    %329 = vector.broadcast %328 : f32 to vector<32x128xf32>
    %330 = arith.mulf %329, %323 : vector<32x128xf32>
    %331 = arith.addf %317, %330 : vector<32x128xf32>
    %c76 = arith.constant 76 : index
    %332 = memref.load %arg1[%c76] : memref<81xf32, #tpu.memory_space<smem>>
    %333 = vector.broadcast %332 : f32 to vector<32x128xf32>
    %334 = arith.mulf %333, %323 : vector<32x128xf32>
    %335 = arith.addf %321, %334 : vector<32x128xf32>
    %c254_i32_48 = arith.constant 254 : i32
    %336 = tpu.dynamic_rotate %308 by %c254_i32_48 dim 1 : vector<32x256xf32>, i32 -> vector<32x256xf32>
    %337 = vector.extract_strided_slice %336 {offsets = [0, 0], sizes = [32, 128], strides = [1, 1]} : vector<32x256xf32> to vector<32x128xf32>
    %c23 = arith.constant 23 : index
    %338 = memref.load %arg1[%c23] : memref<81xf32, #tpu.memory_space<smem>>
    %339 = vector.broadcast %338 : f32 to vector<32x128xf32>
    %340 = arith.mulf %339, %337 : vector<32x128xf32>
    %341 = arith.addf %327, %340 : vector<32x128xf32>
    %c50 = arith.constant 50 : index
    %342 = memref.load %arg1[%c50] : memref<81xf32, #tpu.memory_space<smem>>
    %343 = vector.broadcast %342 : f32 to vector<32x128xf32>
    %344 = arith.mulf %343, %337 : vector<32x128xf32>
    %345 = arith.addf %331, %344 : vector<32x128xf32>
    %c77 = arith.constant 77 : index
    %346 = memref.load %arg1[%c77] : memref<81xf32, #tpu.memory_space<smem>>
    %347 = vector.broadcast %346 : f32 to vector<32x128xf32>
    %348 = arith.mulf %347, %337 : vector<32x128xf32>
    %349 = arith.addf %335, %348 : vector<32x128xf32>
    %c0_49 = arith.constant 0 : index
    %c2_50 = arith.constant 2 : index
    %c2_51 = arith.constant 2 : index
    %c0_52 = arith.constant 0 : index
    %350 = vector.load %arg3[%c0_49, %c2_50, %c2_51, %c0_52] : memref<1x3x34x256xf32, #tpu.memory_space<vmem>>, vector<1x1x32x256xf32>
    %351 = vector.shape_cast %350 : vector<1x1x32x256xf32> to vector<32x256xf32>
    %352 = vector.extract_strided_slice %351 {offsets = [0, 0], sizes = [32, 128], strides = [1, 1]} : vector<32x256xf32> to vector<32x128xf32>
    %c24 = arith.constant 24 : index
    %353 = memref.load %arg1[%c24] : memref<81xf32, #tpu.memory_space<smem>>
    %354 = vector.broadcast %353 : f32 to vector<32x128xf32>
    %355 = arith.mulf %354, %352 : vector<32x128xf32>
    %356 = arith.addf %341, %355 : vector<32x128xf32>
    %c51 = arith.constant 51 : index
    %357 = memref.load %arg1[%c51] : memref<81xf32, #tpu.memory_space<smem>>
    %358 = vector.broadcast %357 : f32 to vector<32x128xf32>
    %359 = arith.mulf %358, %352 : vector<32x128xf32>
    %360 = arith.addf %345, %359 : vector<32x128xf32>
    %c78 = arith.constant 78 : index
    %361 = memref.load %arg1[%c78] : memref<81xf32, #tpu.memory_space<smem>>
    %362 = vector.broadcast %361 : f32 to vector<32x128xf32>
    %363 = arith.mulf %362, %352 : vector<32x128xf32>
    %364 = arith.addf %349, %363 : vector<32x128xf32>
    %c255_i32_53 = arith.constant 255 : i32
    %365 = tpu.dynamic_rotate %351 by %c255_i32_53 dim 1 : vector<32x256xf32>, i32 -> vector<32x256xf32>
    %366 = vector.extract_strided_slice %365 {offsets = [0, 0], sizes = [32, 128], strides = [1, 1]} : vector<32x256xf32> to vector<32x128xf32>
    %c25 = arith.constant 25 : index
    %367 = memref.load %arg1[%c25] : memref<81xf32, #tpu.memory_space<smem>>
    %368 = vector.broadcast %367 : f32 to vector<32x128xf32>
    %369 = arith.mulf %368, %366 : vector<32x128xf32>
    %370 = arith.addf %356, %369 : vector<32x128xf32>
    %c52 = arith.constant 52 : index
    %371 = memref.load %arg1[%c52] : memref<81xf32, #tpu.memory_space<smem>>
    %372 = vector.broadcast %371 : f32 to vector<32x128xf32>
    %373 = arith.mulf %372, %366 : vector<32x128xf32>
    %374 = arith.addf %360, %373 : vector<32x128xf32>
    %c79 = arith.constant 79 : index
    %375 = memref.load %arg1[%c79] : memref<81xf32, #tpu.memory_space<smem>>
    %376 = vector.broadcast %375 : f32 to vector<32x128xf32>
    %377 = arith.mulf %376, %366 : vector<32x128xf32>
    %378 = arith.addf %364, %377 : vector<32x128xf32>
    %c254_i32_54 = arith.constant 254 : i32
    %379 = tpu.dynamic_rotate %351 by %c254_i32_54 dim 1 : vector<32x256xf32>, i32 -> vector<32x256xf32>
    %380 = vector.extract_strided_slice %379 {offsets = [0, 0], sizes = [32, 128], strides = [1, 1]} : vector<32x256xf32> to vector<32x128xf32>
    %c26 = arith.constant 26 : index
    %381 = memref.load %arg1[%c26] : memref<81xf32, #tpu.memory_space<smem>>
    %382 = vector.broadcast %381 : f32 to vector<32x128xf32>
    %383 = arith.mulf %382, %380 : vector<32x128xf32>
    %384 = arith.addf %370, %383 : vector<32x128xf32>
    %c53 = arith.constant 53 : index
    %385 = memref.load %arg1[%c53] : memref<81xf32, #tpu.memory_space<smem>>
    %386 = vector.broadcast %385 : f32 to vector<32x128xf32>
    %387 = arith.mulf %386, %380 : vector<32x128xf32>
    %388 = arith.addf %374, %387 : vector<32x128xf32>
    %c80 = arith.constant 80 : index
    %389 = memref.load %arg1[%c80] : memref<81xf32, #tpu.memory_space<smem>>
    %390 = vector.broadcast %389 : f32 to vector<32x128xf32>
    %391 = arith.mulf %390, %380 : vector<32x128xf32>
    %392 = arith.addf %378, %391 : vector<32x128xf32>
    %cst = arith.constant 0.000000e+00 : f32
    %cst_55 = arith.constant 6.000000e+00 : f32
    %393 = vector.broadcast %cst : f32 to vector<32x128xf32>
    %394 = arith.maximumf %393, %384 : vector<32x128xf32>
    %395 = vector.broadcast %cst_55 : f32 to vector<32x128xf32>
    %396 = arith.minimumf %395, %394 : vector<32x128xf32>
    %cst_56 = arith.constant 0.000000e+00 : f32
    %cst_57 = arith.constant 6.000000e+00 : f32
    %397 = vector.broadcast %cst_56 : f32 to vector<32x128xf32>
    %398 = arith.maximumf %397, %388 : vector<32x128xf32>
    %399 = vector.broadcast %cst_57 : f32 to vector<32x128xf32>
    %400 = arith.minimumf %399, %398 : vector<32x128xf32>
    %cst_58 = arith.constant 0.000000e+00 : f32
    %cst_59 = arith.constant 6.000000e+00 : f32
    %401 = vector.broadcast %cst_58 : f32 to vector<32x128xf32>
    %402 = arith.maximumf %401, %392 : vector<32x128xf32>
    %403 = vector.broadcast %cst_59 : f32 to vector<32x128xf32>
    %404 = arith.minimumf %403, %402 : vector<32x128xf32>
    %405 = vector.shape_cast %396 : vector<32x128xf32> to vector<1x32x128xf32>
    %406 = vector.shape_cast %400 : vector<32x128xf32> to vector<1x32x128xf32>
    %407 = vector.shape_cast %404 : vector<32x128xf32> to vector<1x32x128xf32>
    %408 = tpu.concatenate %405, %406, %407 in 0 : vector<1x32x128xf32>, vector<1x32x128xf32>, vector<1x32x128xf32> -> vector<3x32x128xf32>
    %c0_60 = arith.constant 0 : index
    %c0_61 = arith.constant 0 : index
    %c0_62 = arith.constant 0 : index
    %c0_63 = arith.constant 0 : index
    %409 = vector.load %arg4[%c0_60, %c0_61, %c0_62, %c0_63] : memref<1x3x32x128xf32, #tpu.memory_space<vmem>>, vector<1x3x32x128xf32>
    %410 = vector.shape_cast %409 : vector<1x3x32x128xf32> to vector<3x32x128xf32>
    %411 = vector.shape_cast %408 : vector<3x32x128xf32> to vector<1x3x32x128xf32>
    tpu.vector_store %arg4[%c0_60, %c0_61, %c0_62, %c0_63], %411 {strides = array<i32>} : memref<1x3x32x128xf32, #tpu.memory_space<vmem>>, vector<1x3x32x128xf32>,
    return
  }
  func.func @transform_0(%arg0: i32) -> i32 {
    %c0_i32 = arith.constant 0 : i32
    %c0_i32_0 = arith.constant 0 : i32
    return %c0_i32 : i32
  }
  func.func @transform_1(%arg0: i32) -> i32 {
    %c0_i32 = arith.constant 0 : i32
    %c0_i32_0 = arith.constant 0 : i32
    return %c0_i32 : i32
  }
  func.func @transform_2(%arg0: i32) -> (i32, i32, i32, i32) {
    %c0_i32 = arith.constant 0 : i32
    %c0_i32_0 = arith.constant 0 : i32
    %c0_i32_1 = arith.constant 0 : i32
    %c0_i32_2 = arith.constant 0 : i32
    return %arg0, %c0_i32, %c0_i32_0, %c0_i32_1 : i32, i32, i32, i32
  }
  func.func @transform_3(%arg0: i32) -> (i32, i32, i32, i32) {
    %c0_i32 = arith.constant 0 : i32
    %c0_i32_0 = arith.constant 0 : i32
    %c0_i32_1 = arith.constant 0 : i32
    %c0_i32_2 = arith.constant 0 : i32
    return %arg0, %c0_i32, %c0_i32_0, %c0_i32_1 : i32, i32, i32, i32
  }
}

</mosaic_0001>

<bundles_post_ra>
// kernel: combo_conv_relu6.1
= control target key start
LH: loop header
LB: loop body
LE: loop exit
PB: predicated region body
PF: predicated region fallthrough
CT: control target
= control target key end

     0   :  { %8 = vsyncpa [#allocation4], 0  ;;  %s4536_s0 = inlined_call_operand.vmem [shape: f32[81], index: 0, kind: input, shape index: {}]   ;;  %s4537_s1 = inlined_call_operand.vmem [shape: f32[3], index: 1, kind: input, shape index: {}]   ;;  %s4538_s2 = inlined_call_operand.vmem [shape: f32[2,3,34,256], index: 2, kind: input, shape index: {}]   ;;  %s4539_s3 = inlined_call_operand.hbm [shape: f32[2,3,32,128], index: 3, kind: output, shape index: {}]  }
   0x1   :  { %9 = vsyncpa [#allocation6], 0 }
   0x2   :  { %10 = vsyncpa [#allocation3], 0 }
   0x3   :  { %12 = vsyncpa [#allocation3 + $0x1], 0  ;;  %s2467_s12 = smov 0   ;;  %s2469_s13 = smov 0  }
   0x4   :  { %s2471_s14 = smov 0   ;;  %s2473_s15 = smov 0  }
   0x5 LB: > { %s2488_s16 = sadd.s32 4294967295, %s2438_s15   ;;  %s2120_s17 = sadd.s32 4294967294, %s2438_s15   ;;  %s2438_s15 = sphi %s2473_s15, %s4717_s15   ;;  %s2434_s14 = sphi %s2471_s14, %s4716_s14   ;;  %s2430_s13 = sphi %s2469_s13, %s4715_s13   ;;  %s2426_s12 = sphi %s2467_s12, %s4714_s12  }
   0x6   : > { %s2492_s18 = sadd.s32 1, %s2438_s15   ;;  %s93_s19 = sadd.s32 1, %s2434_s14 }
   0x7   : > { %s90_s20 = ssub.s32 %s2438_s15, %s2492_s18  ;;  %p103_p0 = scmp.ne.s32.totalorder %s2434_s14, %s2430_s13 }
   0x8   : > { %p91_p1 = scmp.eq.s32.totalorder %s90_s20, 0  ;;  %p104_p2 = scmp.eq.s32.totalorder %s2488_s16, 1 }
   0x9   : > { %p109_p3 = scmp.ne.s32.totalorder %s2430_s13, %s2426_s12  ;;  %p110_p4 = scmp.eq.s32.totalorder %s2120_s17, 1 }
   0xa   : > { %s2503_s21 = scalar_select %p91_p1, %s2434_s14, %s93_s19  }
   0xb   : > { %p2505_p5 = por %p104_p2, %p103_p0  ;;  %p2509_p6 = por %p110_p4, %p109_p3 }
   0xc   : > { %p2121_p7 = scmp.ge.s32.totalorder %s2438_s15, 1  ;;  %p117_p8 = scmp.lt.s32.totalorder %s2438_s15, 3 }
   0xd   : > { %s4573_s22 = scalar_select %p2505_p5, 1, 0 }
   0xe   : > { %s4574_s23 = scalar_select %p2509_p6, 1, 0 }
   0xf   : > { %p4540_p9 = scmp.eq.s32.totalorder %s2488_s16, 0  ;;  %p2516_p10 = pnand %p2121_p7, %p117_p8 }
  0x10   : > { %s130_s27 = sshll.u32 %s4536_s0, 4  ;;  %s141_s30 = sshll.u32 %s4537_s1, 4  ;;  %s131_s27 = int_to_ptr.vmem [resolvable:$true] %s130_s27  ;;  %s142_s30 = int_to_ptr.vmem [resolvable:$true] %s141_s30 }
  0x11   : > { %s4575_s24 = scalar_select %p2516_p10, 1, 0 }
  0x12   : > { %p2271_p11 = pneg %p2516_p10  ;;  %s2338_s5 = scalar_lea.vmem %s131_s27, 16 }
  0x13   : > { %p2339_p13 = scmp.ne.s32.totalorder %s131_s27, %s2338_s5  ;;  %p2346_p3 = scmp.lt.s32.totalorder %s131_s27, %s131_s27 }
  0x14   : > { %p2530_p12 = pnand %p4540_p9, %p2271_p11  ;;  %p2347_p4 = scmp.lt.s32.totalorder %s2338_s5, %s2338_s5 }
  0x16   : > { %p2340_p0 = pneg %p2530_p12  ;;  %p2348_p7 = por %p2347_p4, %p2346_p3 }
  0x18   : > { %p2341_p1 = pnand %p2340_p0, %p2339_p13 }
  0x1a   : > { %p2342_p2 = pneg %p2341_p1 }
  0x1c   : > { %p2349_p8 = pnand %p2348_p7, %p2342_p2 }
  0x1e   : > { %2352 = shalt.err (!%p2349_p8)
}
  0x1f   : > { %s2440_s6 = smov [#allocation2]   ;;  %s2353_s7 = scalar_lea.vmem %s142_s30, 16 }
  0x20   : > { %2274 = dma.vmem_to_smem (!%p2530_p12), %s131_s27, 16, %s2440_s6, [#allocation4]  }
  0x21   : > { %p2354_p11 = scmp.ne.s32.totalorder %s142_s30, %s2353_s7  ;;  %p2361_p5 = scmp.lt.s32.totalorder %s142_s30, %s142_s30 }
  0x22   : > { %p2362_p10 = scmp.lt.s32.totalorder %s2353_s7, %s2353_s7 }
  0x23   : > { %p2356_p9 = pnand %p2354_p11, %p2340_p0 }
  0x24   : > { %p2363_p13 = por %p2362_p10, %p2361_p5 }
  0x25   : > { %p2357_p6 = pneg %p2356_p9 }
  0x27   : > { %p2364_p1 = pnand %p2363_p13, %p2357_p6 }
  0x29   : > { %2367 = shalt.err (!%p2364_p1)
}
  0x2a   : > { %s2441_s8 = smov [#allocation5]   ;;  %p4577_p2 = scmp.ne.s32.totalorder %s4575_s24, 0 }
  0x2b   : > { %2277 = dma.vmem_to_smem (!%p2530_p12), %s142_s30, 16, %s2441_s8, [#allocation6]  }
  0x2c   : > { %162 = sbr.rel (%p4577_p2) target bundleno = 500 (0x1f4), region = 32 }
  0x33   : > { %p4578_p3 = scmp.eq.s32.totalorder %s2488_s16, 0 }
  0x35   : > { %2413 = dma.done.wait (%p4578_p3), [#allocation4], 16   ;;  %p4579_p4 = pmov %p4578_p3 }
  0x36   : > { %p4580_p9 = pmov %p4578_p3 }
  0x37   : > { %2415 = vsyncadd (%p4579_p4), [#allocation4], 4294967280 }
  0x38   : > { %2417 = dma.done.wait (%p4580_p9), [#allocation6], 16   ;;  %p4581_p5 = pmov %p4578_p3 }
  0x3a   : > { %2419 = vsyncadd (%p4581_p5), [#allocation6], 4294967280 }
  0x3b   : > { %172 = sfence }
  0x3c   : > { %p191_p6 = scmp.lt.s32.totalorder %s2488_s16, 1  ;;  %s2442_s20 = smov 127   ;;  %vm366_vm0 = vcmask 1046528   ;;  %vm594_vm1 = vcmask 1045504  }
  0x3d   : > { %s2139_s24 = sld [smem:[#allocation2 + $0x3]]  ;;  %s2140_s25 = sld [smem:[#allocation2 + $0x1e]] }
  0x3e   : > { %s192_s9 = scalar_select %p191_p6, %s2488_s16, 1 }
  0x3f   : > { %s2141_s26 = sld [smem:[#allocation2 + $0x39]]  ;;  %s2443_s27 = smov 126  }
  0x40   : > { %s2259_s10 = smul.u32 240, %s192_s9  ;;  %s2148_s28 = sld [smem:[#allocation2 + $0x6]] }
  0x41   : > { %s2149_s29 = sld [smem:[#allocation2 + $0x21]]  ;;  %s2150_s30 = sld [smem:[#allocation2 + $0x3c]] }
  0x42   : > { %s2555_s19 = scalar_lea.vmem %s4538_s2, %s2259_s10  ;;  %s210_s4 = sld [smem:[#allocation2]] }
  0x43   : > { %v2558_v0 = vld [vmem:[%s2555_s19 + $0x20] sm:$0xff]  ;;  %v2568_v2 = vld [vmem:[%s2555_s19 + $0x30] sm:$0xff]  ;;  %v2578_v4 = vld [vmem:[%s2555_s19 + $0x18] sm:$0xff]  ;;  %v355_v13 = vstv %s2139_s24  ;;  %s2131_s5 = sld [smem:[#allocation2 + $0x1b]]  ;;  %s2132_s6 = sld [smem:[#allocation2 + $0x36]] }
  0x44   : > { %v2561_v1 = vld [vmem:[%s2555_s19] sm:$0xff]  ;;  %244 = vrot.lane.b32.xlu1 %v2558_v0, %s2442_s20  ;;  %v2571_v3 = vld [vmem:[%s2555_s19 + $0x10] sm:$0xff]  ;;  %v203_v5 = vld [vmem:[%s2555_s19 + $0x8] sm:$0xff]  ;;  %v462_v8 = vrot.slane %v2568_v2, 1  ;;  %v458_v10 = vrot.slane %v2558_v0, 1  ;;  %v456_v12 = vrot.slane %v2578_v4, 1  ;;  %v358_v18 = vmul.f32 %v355_v13, %v2558_v0 }
  0x45   : > { %240 = vrot.lane.b32.xlu0 %v2561_v1, %s2442_s20  ;;  %v2585_v6 = vld [vmem:[%s2555_s19 + $0x38] sm:$0xff]  ;;  %v2588_v7 = vld [vmem:[%s2555_s19 + $0x28] sm:$0xff]  ;;  %v453_v9 = vrot.slane %v2571_v3, 1  ;;  %v344_v11 = vld [vmem:[%s2555_s19] sm:$0xfe]  ;;  %v357_v17 = vmul.f32 %v355_v13, %v2571_v3  ;;  %v359_v36 = vmul.f32 %v355_v13, %v2568_v2  ;;  %s196_s7 = sld [smem:[#allocation5]] }
  0x46   : > { %v385_v14 = vstv %s2140_s25  ;;  %v414_v15 = vstv %s2141_s26  ;;  %v2608_v16 = vsel %vm366_vm0, %v458_v10, %v462_v8  ;;  %v452_v20 = vrot.slane %v344_v11, 1  ;;  %v352_v24 = vld [vmem:[%s2555_s19 + $0x40] sm:$0x1]  ;;  %v345_v45 = vld [vmem:[%s2555_s19 + $0x8] sm:$0xfe]  ;;  %s2129_s8 = sld [smem:[#allocation5 + $0x1]] }
  0x47   : > { %v387_v19 = vmul.f32 %v385_v14, %v2571_v3  ;;  %v460_v21 = vrot.slane %v2588_v7, 1  ;;  %v388_v22 = vmul.f32 %v385_v14, %v2558_v0  ;;  %v416_v23 = vmul.f32 %v414_v15, %v2571_v3  ;;  %v353_v62 = vld [vmem:[%s2555_s19 + $0x48] sm:$0x1]  ;;  %s2130_s9 = sld [smem:[#allocation5 + $0x2]]  ;;  %s2133_s10 = sld [smem:[#allocation2 + $0x1]] }
  0x48   : > { %246 = vrot.lane.b32.xlu1 %v2568_v2, %s2442_s20  ;;  %v368_v25 = vrot.slane %v357_v17, 1  ;;  %v370_v26 = vrot.slane %v358_v18, 1  ;;  %v417_v28 = vmul.f32 %v414_v15, %v2558_v0  ;;  %v356_v31 = vmul.f32 %v355_v13, %v344_v11  ;;  %s2134_s11 = sld [smem:[#allocation2 + $0x1c]]  ;;  %s2832_s17 = sld [smem:[#allocation2 + $0x37]] }
  0x49   : > { %242 = vrot.lane.b32.xlu0 %v2571_v3, %s2442_s20  ;;  %v397_v27 = vrot.slane %v387_v19, 1  ;;  %v399_v29 = vrot.slane %v388_v22, 1  ;;  %v426_v30 = vrot.slane %v416_v23, 1  ;;  %v386_v32 = vmul.f32 %v385_v14, %v344_v11  ;;  %v578_v23 = vld [vmem:[%s2555_s19] sm:$0xfc]  ;;  %s2857_s24 = sld [smem:[#allocation2 + $0x2]] }
  0x4a   : > { %v2622_v33 = vsel %vm366_vm0, %v368_v25, %v370_v26  ;;  %v428_v34 = vrot.slane %v417_v28, 1  ;;  %v415_v35 = vmul.f32 %v414_v15, %v344_v11  ;;  %v459_v37 = vsel %vm366_vm0, %v453_v9, %v458_v10  ;;  %s2882_s25 = sld [smem:[#allocation2 + $0x1d]]  ;;  %s2884_s26 = sld [smem:[#allocation2 + $0x38]] }
  0x4b   : > { %v466_v38 = vrot.slane %v352_v24, 1  ;;  %v2631_v39 = vsel %vm366_vm0, %v397_v27, %v399_v29  ;;  %v367_v40 = vrot.slane %v356_v31, 1  ;;  %v454_v41 = vsel %vm366_vm0, %v452_v20, %v453_v9  ;;  %p4712_p12 = scmp.ne.s32.totalorder %s4573_s22, 0 }
  0x4c   : > { %250 = vrot.lane.b32.xlu1 %v2578_v4, %s2442_s20  ;;  %v2635_v42 = vsel %vm366_vm0, %v426_v30, %v428_v34  ;;  %v396_v43 = vrot.slane %v386_v32, 1  ;;  %v425_v44 = vrot.slane %v415_v35, 1  ;;  %v360_v47 = vmul.f32 %v355_v13, %v352_v24 }
  0x4d   : > { %248 = vrot.lane.b32.xlu0 %v203_v5, %s2442_s20  ;;  %v2639_v46 = vsel %vm366_vm0, %v367_v40, %v368_v25  ;;  %v372_v48 = vrot.slane %v359_v36, 1  ;;  %v389_v49 = vmul.f32 %v385_v14, %v2568_v2  ;;  %v390_v52 = vmul.f32 %v385_v14, %v352_v24 }
  0x4e   : > { %v2643_v50 = vsel %vm366_vm0, %v396_v43, %v397_v27  ;;  %v2646_v51 = vsel %vm366_vm0, %v425_v44, %v426_v30  ;;  %v418_v53 = vmul.f32 %v414_v15, %v2568_v2  ;;  %v374_v54 = vrot.slane %v360_v47, 1 }
  0x4f   : > { %v401_v55 = vrot.slane %v389_v49, 1  ;;  %v419_v56 = vmul.f32 %v414_v15, %v352_v24  ;;  %v2652_v57 = vsel %vm366_vm0, %v370_v26, %v372_v48  ;;  %v467_v58 = vsel %vm366_vm0, %v462_v8, %v466_v38 }
  0x50   : > { %254 = vrot.lane.b32.xlu1 %v2585_v6, %s2442_s20  ;;  %v455_v59 = vrot.slane %v345_v45, 1  ;;  %v403_v60 = vrot.slane %v390_v52, 1  ;;  %v430_v61 = vrot.slane %v418_v53, 1  ;;  %v2657_v63 = vsel %vm366_vm0, %v372_v48, %v374_v54  ;;  %v580_v45 = vld [vmem:[%s2555_s19 + $0x40] sm:$0x3] }
  0x51   : > { %252 = vrot.lane.b32.xlu0 %v2588_v7, %s2442_s20  ;;  %v2660_v9 = vsel %vm366_vm0, %v399_v29, %v401_v55  ;;  %v461_v13 = vsel %vm366_vm0, %v456_v12, %v460_v21  ;;  %v464_v15 = vrot.slane %v2585_v6, 1  ;;  %v468_v17 = vrot.slane %v353_v62, 1 }
  0x52   : > { %v2663_v10 = vsel %vm366_vm0, %v401_v55, %v403_v60  ;;  %v2666_v11 = vsel %vm366_vm0, %v428_v34, %v430_v61  ;;  %v457_v14 = vsel %vm366_vm0, %v455_v59, %v456_v12  ;;  %v583_v12 = vstv %s2148_s28  ;;  %s2142_s28 = sld [smem:[#allocation2 + $0x4]] }
  0x53   : > { %v469_v18 = vsel %vm366_vm0, %v464_v15, %v468_v17  ;;  %v465_v19 = vsel %vm366_vm0, %v460_v21, %v464_v15  ;;  %v613_v20 = vstv %s2149_s29  ;;  %v680_v22 = vrot.slane %v2558_v0, 2  ;;  %s2143_s29 = sld [smem:[#allocation2 + $0x1f]] }
  0x54   : > { %295 = vrot.lane.b32.xlu1 %v2571_v3, %s2443_s27  ;;  %v585_v24 = vmul.f32 %v583_v12, %v2571_v3  ;;  %v586_v25 = vmul.f32 %v583_v12, %v2558_v0  ;;  %v615_v21 = vmul.f32 %v613_v20, %v2571_v3  ;;  %v616_v26 = vmul.f32 %v613_v20, %v2558_v0 }
  0x55   : > { %293 = vrot.lane.b32.xlu0 %v2561_v1, %s2443_s27  ;;  %v642_v27 = vstv %s2150_s30  ;;  %v584_v28 = vmul.f32 %v583_v12, %v578_v23  ;;  %v614_v29 = vmul.f32 %v613_v20, %v578_v23  ;;  %v587_v44 = vmul.f32 %v583_v12, %v2568_v2  ;;  %s2144_s30 = sld [smem:[#allocation2 + $0x3a]] }
  0x56   : > { %v596_v30 = vrot.slane %v585_v24, 2  ;;  %v598_v31 = vrot.slane %v586_v25, 2  ;;  %v625_v32 = vrot.slane %v615_v21, 2  ;;  %v644_v34 = vmul.f32 %v642_v27, %v2571_v3 }
  0x57   : > { %v627_v35 = vrot.slane %v616_v26, 2  ;;  %v645_v36 = vmul.f32 %v642_v27, %v2558_v0  ;;  %v624_v38 = vrot.slane %v614_v29, 2  ;;  %v643_v43 = vmul.f32 %v642_v27, %v578_v23 }
  0x58   : > { %299 = vrot.lane.b32.xlu1 %v2568_v2, %s2443_s27  ;;  %v2705_v40 = vsel %vm594_vm1, %v596_v30, %v598_v31  ;;  %v600_v54 = vrot.slane %v587_v44, 2  ;;  %v617_v55 = vmul.f32 %v613_v20, %v2568_v2  ;;  %v646_v59 = vmul.f32 %v642_v27, %v2568_v2  ;;  %v2790_v44 = vld [vmem:[%s2555_s19 + $0x80] sm:$0xff] }
  0x59   : > { %297 = vrot.lane.b32.xlu0 %v2558_v0, %s2443_s27  ;;  %4582 = vst [vmem:[#allocation11_spill] sm:$0xff] %v2705_v40  ;;  %v2710_v47 = vsel %vm594_vm1, %v625_v32, %v627_v35  ;;  %v656_v48 = vrot.slane %v645_v36, 2  ;;  %v2716_v52 = vsel %vm594_vm1, %v624_v38, %v625_v32  ;;  %v653_v53 = vrot.slane %v643_v43, 2  ;;  %v581_v36 = vld [vmem:[%s2555_s19 + $0x48] sm:$0x3]  ;;  %v2783_v43 = vld [vmem:[%s2555_s19 + $0x50] sm:$0xff] }
  0x5a   : > { %4583 = vst [vmem:[#allocation12_spill] sm:$0xff] %v2710_v47  ;;  %4585 = vst [vmem:[#allocation14_spill] sm:$0xff] %v2716_v52  ;;  %v647_v60 = vmul.f32 %v642_v27, %v580_v45  ;;  %v2729_v15 = vsel %vm594_vm1, %v598_v31, %v600_v54  ;;  %v675_v17 = vrot.slane %v2571_v3, 2  ;;  %v658_v24 = vrot.slane %v646_v59, 2  ;;  %v579_v31 = vld [vmem:[%s2555_s19 + $0x8] sm:$0xfc] }
  0x5b   : > { %4588 = vst [vmem:[#allocation17_spill] sm:$0xff] %v2729_v15  ;;  %4595 = vst [vmem:[#allocation24_spill] sm:$0xff] %v2783_v43  ;;  %v325_v40 = vstv %s2882_s25  ;;  %s2155_s25 = sld [smem:[#allocation2 + $0x23]] }
  0x5c   : > { %303 = vrot.lane.b32.xlu1 %v2578_v4, %s2443_s27  ;;  %v2742_v26 = vsel %vm594_vm1, %v656_v48, %v658_v24  ;;  %4596 = vst [vmem:[#allocation25_spill] sm:$0xff] %v2790_v44 }
  0x5d   : > { %301 = vrot.lane.b32.xlu0 %v203_v5, %s2443_s27  ;;  %v432_v5 = vrot.slane %v419_v56, 1  ;;  %4592 = vst [vmem:[#allocation21_spill] sm:$0xff] %v2742_v26 }
  0x5f   : > { %v2672_v8 = vsel %vm366_vm0, %v430_v61, %v432_v5  ;;  %v629_v5 = vrot.slane %v617_v55, 2  ;;  %v256_v55 = vlaneseq }
  0x60   : > { %307 = vrot.lane.b32.xlu1 %v2585_v6, %s2443_s27 }
  0x61   : > { %305 = vrot.lane.b32.xlu0 %v2588_v7, %s2443_s27 }
  0x64   : > { %480 = vrot.lane.b32.xlu1 %v459_v37, %s2442_s20 }
  0x65   : > { %478 = vrot.lane.b32.xlu0 %v454_v41, %s2442_s20 }
  0x68   : > { %484 = vrot.lane.b32.xlu1 %v467_v58, %s2442_s20 }
  0x69   : > { %482 = vrot.lane.b32.xlu0 %v2608_v16, %s2442_s20 }
  0x6c   : > { %488 = vrot.lane.b32.xlu1 %v461_v13, %s2442_s20 }
  0x6d   : > { %486 = vrot.lane.b32.xlu0 %v457_v14, %s2442_s20 }
  0x70   : > { %492 = vrot.lane.b32.xlu1 %v469_v18, %s2442_s20 }
  0x71   : > { %490 = vrot.lane.b32.xlu0 %v465_v19, %s2442_s20 }
  0x74   : > { %530 = vrot.lane.b32.xlu1 %v459_v37, %s2443_s27  ;;  %v595_v37 = vrot.slane %v584_v28, 2  ;;  %v681_v28 = vsel %vm594_vm1, %v675_v17, %v680_v22 }
  0x75   : > { %528 = vrot.lane.b32.xlu0 %v454_v41, %s2443_s27  ;;  %v654_v41 = vrot.slane %v644_v34, 2  ;;  %v682_v34 = vrot.slane %v2588_v7, 2 }
  0x76   : > { %v2713_v49 = vsel %vm594_vm1, %v595_v37, %v596_v30  ;;  %v688_v30 = vrot.slane %v580_v45, 2 }
  0x77   : > { %4584 = vst [vmem:[#allocation13_spill] sm:$0xff] %v2713_v49  ;;  %v2720_v56 = vsel %vm594_vm1, %v654_v41, %v656_v48  ;;  %v2726_v61 = vsel %vm594_vm1, %v653_v53, %v654_v41  ;;  %v686_v41 = vrot.slane %v2585_v6, 2  ;;  %v2780_v6 = vld [vmem:[%s2555_s19 + $0x60] sm:$0xff]  ;;  %v2800_v48 = vld [vmem:[%s2555_s19 + $0x68] sm:$0xff]  ;;  %v2158_v53 = vld [vmem:[%s2555_s19 + $0x58] sm:$0xff] }
  0x78   : > { %534 = vrot.lane.b32.xlu1 %v467_v58, %s2443_s27  ;;  %4586 = vst [vmem:[#allocation15_spill] sm:$0xff] %v2720_v56  ;;  %v618_v58 = vmul.f32 %v613_v20, %v580_v45  ;;  %4587 = vst [vmem:[#allocation16_spill] sm:$0xff] %v2726_v61 }
  0x79   : > { %532 = vrot.lane.b32.xlu0 %v2608_v16, %s2443_s27  ;;  %v588_v16 = vmul.f32 %v583_v12, %v580_v45  ;;  %v674_v12 = vrot.slane %v578_v23, 2  ;;  %v684_v23 = vrot.slane %v2568_v2, 2  ;;  %v687_v7 = vsel %vm594_vm1, %v682_v34, %v686_v41  ;;  %4594 = vst [vmem:[#allocation23_spill] sm:$0xff] %v2780_v6  ;;  %v2793_v45 = vld [vmem:[%s2555_s19 + $0x70] sm:$0xff]  ;;  %4598 = vst [vmem:[#allocation27_spill] sm:$0xff] %v2800_v48 }
  0x7a   : > { %v631_v20 = vrot.slane %v618_v58, 2  ;;  %4597 = vst [vmem:[#allocation26_spill] sm:$0xff] %v2793_v45 }
  0x7b   : > { %v602_v62 = vrot.slane %v588_v16, 2  ;;  %v676_v29 = vsel %vm594_vm1, %v674_v12, %v675_v17  ;;  %v685_v32 = vsel %vm594_vm1, %v680_v22, %v684_v23  ;;  %v690_v22 = vrot.slane %v581_v36, 2  ;;  %v2807_v16 = vld [vmem:[%s2555_s19 + $0x88] sm:$0xff] }
  0x7c   : > { %538 = vrot.lane.b32.xlu1 %v461_v13, %s2443_s27  ;;  %v660_v13 = vrot.slane %v647_v60, 2  ;;  %v2739_v21 = vsel %vm594_vm1, %v629_v5, %v631_v20  ;;  %4599 = vst [vmem:[#allocation28_spill] sm:$0xff] %v2807_v16  ;;  %v211_v60 = vstv %s210_s4  ;;  %v231_v20 = vstv %s2132_s6  ;;  %s3024_s4 = sld [smem:[#allocation2 + $0x5]]  ;;  %s3036_s6 = sld [smem:[#allocation2 + $0x3b]] }
  0x7d   : > { %536 = vrot.lane.b32.xlu0 %v457_v14, %s2443_s27  ;;  %v2733_v25 = vsel %vm594_vm1, %v600_v54, %v602_v62  ;;  %v2736_v14 = vsel %vm594_vm1, %v627_v35, %v629_v5  ;;  %4591 = vst [vmem:[#allocation20_spill] sm:$0xff] %v2739_v21  ;;  %v677_v35 = vrot.slane %v579_v31, 2  ;;  %v2810_v54 = vld [vmem:[%s2555_s19 + $0x78] sm:$0xff]  ;;  %v2828_v62 = vand.u32 127, %v256_v55 }
  0x7e   : > { %4589 = vst [vmem:[#allocation18_spill] sm:$0xff] %v2733_v25  ;;  %4590 = vst [vmem:[#allocation19_spill] sm:$0xff] %v2736_v14  ;;  %v2748_v27 = vsel %vm594_vm1, %v658_v24, %v660_v13  ;;  %v221_v5 = vstv %s2131_s5  ;;  %v213_v24 = vmul.f32 %v211_v60, %v2571_v3  ;;  %v2174_v13 = vld [vmem:[%s2555_s19 + $0x50] sm:$0xfe]  ;;  %v233_v31 = vmul.f32 %v231_v20, %v2571_v3  ;;  %s3030_s5 = sld [smem:[#allocation2 + $0x20]] }
  0x7f   : > { %4593 = vst [vmem:[#allocation22_spill] sm:$0xff] %v2748_v27  ;;  %4600 = vst [vmem:[#allocation29_spill] sm:$0xff] %v2810_v54  ;;  %vm258_vm2 = vcmp.lt.s32.totalorder %v2828_v62, 127  ;;  %v225_v55 = vmul.f32 %v221_v5, %v2568_v2  ;;  %v284_v14 = vstv %s2832_s17  ;;  %v224_v27 = vmul.f32 %v221_v5, %v2558_v0  ;;  %s2153_s17 = sld [smem:[#allocation2 + $0x3d]] }
  0x80   : > { %542 = vrot.lane.b32.xlu1 %v469_v18, %s2443_s27  ;;  %v689_v18 = vsel %vm594_vm1, %v684_v23, %v688_v30  ;;  %v197_v23 = vstv %s196_s7  ;;  %v201_v30 = vstv %s2130_s9  ;;  %vm309_vm3 = vcmp.lt.s32.totalorder %v2828_v62, 126  ;;  %s2151_s7 = sld [smem:[#allocation2 + $0x7]]  ;;  %s2165_s9 = sld [smem:[#allocation2 + $0x9]] }
  0x81   : > { %540 = vrot.lane.b32.xlu0 %v465_v19, %s2443_s27  ;;  %v678_v19 = vrot.slane %v2578_v4, 2  ;;  %v691_v4 = vsel %vm594_vm1, %v686_v41, %v690_v22  ;;  %v2850_v41 = vld [vmem:[%s2555_s19 + $0x90] sm:$0x1]  ;;  %v2852_v22 = vadd.f32 %v213_v24, %v197_v23  ;;  %v214_v24 = vmul.f32 %v211_v60, %v2558_v0 }
  0x82   : > { %4601 = vst [vmem:[#allocation30_spill] sm:$0xff] %v2850_v41  ;;  %v1060_v26 = vrot.slane %v2850_v41, 1 }
  0x83   : > { %v683_v37 = vsel %vm594_vm1, %v678_v19, %v682_v34  ;;  %v679_v38 = vsel %vm594_vm1, %v677_v35, %v678_v19  ;;  %v2844_v19 = vstv %s2133_s10  ;;  %v2846_v34 = vstv %s2134_s11  ;;  %s2166_s10 = sld [smem:[#allocation2 + $0x24]]  ;;  %s2167_s11 = sld [smem:[#allocation2 + $0x3f]] }
  0x84   : > { %702 = vrot.lane.b32.xlu1 %v681_v28, %s2442_s20  ;;  %v218_v47 = vadd.f32 %v214_v24, %v197_v23 }
  0x85   : > { %700 = vrot.lane.b32.xlu0 %v676_v29, %s2442_s20 }
  0x88   : > { %706 = vrot.lane.b32.xlu1 %v689_v18, %s2442_s20 }
  0x89   : > { %704 = vrot.lane.b32.xlu0 %v685_v32, %s2442_s20 }
  0x8c   : > { %710 = vrot.lane.b32.xlu1 %v683_v37, %s2442_s20 }
  0x8d   : > { %708 = vrot.lane.b32.xlu0 %v679_v38, %s2442_s20 }
  0x90   : > { %714 = vrot.lane.b32.xlu1 %v691_v4, %s2442_s20 }
  0x91   : > { %712 = vrot.lane.b32.xlu0 %v687_v7, %s2442_s20 }
  0x94   : > { %752 = vrot.lane.b32.xlu1 %v681_v28, %s2443_s27  ;;  %v199_v28 = vstv %s2129_s8  ;;  %s2152_s8 = sld [smem:[#allocation2 + $0x22]] }
  0x95   : > { %750 = vrot.lane.b32.xlu0 %v676_v29, %s2443_s27  ;;  %v223_v29 = vmul.f32 %v221_v5, %v2571_v3  ;;  %v222_v3 = vmul.f32 %v221_v5, %v2561_v1  ;;  %v229_v41 = vadd.f32 %v225_v55, %v199_v28 }
  0x97   : > { %v226_v61 = vadd.f32 %v222_v3, %v199_v28  ;;  %v228_v3 = vadd.f32 %v224_v27, %v199_v28 }
  0x98   : > { %756 = vrot.lane.b32.xlu1 %v689_v18, %s2443_s27  ;;  %v1052_v18 = vrot.slane %v2793_v45, 1 }
  0x99   : > { %754 = vrot.lane.b32.xlu0 %v685_v32, %s2443_s27  ;;  %v1047_v32 = vrot.slane %v2780_v6, 1 }
  0x9c   : > { %760 = vrot.lane.b32.xlu1 %v683_v37, %s2443_s27  ;;  %v212_v37 = vmul.f32 %v211_v60, %v2561_v1 }
  0x9d   : > { %758 = vrot.lane.b32.xlu0 %v679_v38, %s2443_s27  ;;  %v1046_v38 = vrot.slane %v2174_v13, 1  ;;  %v235_v13 = vmul.f32 %v231_v20, %v2568_v2 }
  0x9e   : > { %v216_v25 = vadd.f32 %v212_v37, %v197_v23 }
  0x9f   : > { %v239_v56 = vadd.f32 %v235_v13, %v201_v30  ;;  %v1058_v13 = vrot.slane %v2807_v16, 1 }
  0xa0   : > { %764 = vrot.lane.b32.xlu1 %v691_v4, %s2443_s27  ;;  %v232_v4 = vmul.f32 %v231_v20, %v2561_v1  ;;  %v2871_v1 = vsel %vm366_vm0, %v1047_v32, %v1052_v18 }
  0xa1   : > { %762 = vrot.lane.b32.xlu0 %v687_v7, %s2443_s27  ;;  %v215_v7 = vmul.f32 %v211_v60, %v2568_v2  ;;  %v234_v2 = vmul.f32 %v231_v20, %v2558_v0  ;;  %v2879_v60 = vsel %vm366_vm0, %v1046_v38, %v1047_v32  ;;  %v1050_v0 = vrot.slane %v2800_v48, 1  ;;  %v2183_v38 = vld [vmem:[%s2555_s19 + $0x98] sm:$0x1] }
  0xa2   : > { %v236_v52 = vadd.f32 %v232_v4, %v201_v30  ;;  %v1054_v32 = vrot.slane %v2810_v54, 1 }
  0xa3   : > { %v219_v49 = vadd.f32 %v215_v7, %v197_v23  ;;  %v238_v4 = vadd.f32 %v234_v2, %v201_v30 }
  0xa4   : > { %841 = vrot.lane.b32.xlu1 %v2780_v6, %s2442_s20 }
  0xa5   : > { %839 = vrot.lane.b32.xlu0 %v2783_v43, %s2442_s20 }
  0xa8   : > { %845 = vrot.lane.b32.xlu1 %v2790_v44, %s2442_s20 }
  0xa9   : > { %843 = vrot.lane.b32.xlu0 %v2793_v45, %s2442_s20 }
  0xac   : > { %849 = vrot.lane.b32.xlu1 %v2800_v48, %s2442_s20 }
  0xad   : > { %847 = vrot.lane.b32.xlu0 %v2158_v53, %s2442_s20 }
  0xb0   : > { %853 = vrot.lane.b32.xlu1 %v2807_v16, %s2442_s20 }
  0xb1   : > { %851 = vrot.lane.b32.xlu0 %v2810_v54, %s2442_s20 }
  0xb4   : > { %891 = vrot.lane.b32.xlu1 %v2780_v6, %s2443_s27 }
  0xb5   : > { %889 = vrot.lane.b32.xlu0 %v2783_v43, %s2443_s27  ;;  %v2866_v43 = vadd.f32 %v233_v31, %v201_v30  ;;  %v2175_v31 = vld [vmem:[%s2555_s19 + $0x58] sm:$0xfe]  ;;  %v2923_v30 = vsel %vm366_vm0, %v1050_v0, %v1054_v32 }
  0xb6   : > { %v2820_v58 = vpop.permute.xlu1 %244  ;;  %v1049_v37 = vrot.slane %v2175_v31, 1  ;;  %4602 = vst [vmem:[#allocation31_spill] sm:$0xff] %v2923_v30 }
  0xb7   : > { %v2822_v59 = vpop.permute.xlu0 %240 }
  0xb8   : > { %895 = vrot.lane.b32.xlu1 %v2790_v44, %s2443_s27 }
  0xb9   : > { %893 = vrot.lane.b32.xlu0 %v2793_v45, %s2443_s27 }
  0xba   : > { %v2830_v17 = vpop.permute.xlu1 %246 }
  0xbb   : > { %v243_v12 = vpop.permute.xlu0 %242 }
  0xbc   : > { %899 = vrot.lane.b32.xlu1 %v2800_v48, %s2443_s27 }
  0xbd   : > { %897 = vrot.lane.b32.xlu0 %v2158_v53, %s2443_s27  ;;  %v2859_v53 = vadd.f32 %v223_v29, %v199_v28  ;;  %v1056_v29 = vrot.slane %v2790_v44, 1 }
  0xbe   : > { %v251_v35 = vpop.permute.xlu1 %250 }
  0xbf   : > { %v249_v36 = vpop.permute.xlu0 %248  ;;  %v260_v5 = vsel %vm258_vm2, %v243_v12, %v251_v35  ;;  %v2894_v20 = vsel %vm366_vm0, %v1056_v29, %v1060_v26  ;;  %v2902_v12 = vsel %vm366_vm0, %v1052_v18, %v1056_v29  ;;  %v2909_v35 = vstv %s2857_s24  ;;  %s2154_s24 = sld [smem:[#allocation2 + $0x8]] }
  0xc0   : > { %903 = vrot.lane.b32.xlu1 %v2807_v16, %s2443_s27  ;;  %v259_v23 = vsel %vm258_vm2, %v2822_v59, %v249_v36  ;;  %v266_v24 = vmul.f32 %v2844_v19, %v260_v5  ;;  %v276_v27 = vmul.f32 %v2846_v34, %v260_v5  ;;  %v2926_v18 = vsel %vm366_vm0, %v1049_v37, %v1050_v0 }
  0xc1   : > { %901 = vrot.lane.b32.xlu0 %v2810_v54, %s2443_s27  ;;  %v265_v28 = vmul.f32 %v2844_v19, %v259_v23  ;;  %v335_v16 = vstv %s2884_s26  ;;  %v2942_v37 = vsel %vm366_vm0, %v1054_v32, %v1058_v13  ;;  %s2156_s26 = sld [smem:[#allocation2 + $0x3e]] }
  0xc2   : > { %v255_v15 = vpop.permute.xlu1 %254  ;;  %v270_v54 = vadd.f32 %v266_v24, %v2852_v22  ;;  %v280_v48 = vadd.f32 %v276_v27, %v2859_v53 }
  0xc3   : > { %v253_v21 = vpop.permute.xlu0 %252  ;;  %v262_v26 = vsel %vm258_vm2, %v2830_v17, %v255_v15  ;;  %v1062_v15 = vrot.slane %v2183_v38, 1  ;;  %v286_v17 = vmul.f32 %v284_v14, %v260_v5 }
  0xc4   : > { %1074 = vrot.lane.b32.xlu1 %v2871_v1, %s2442_s20  ;;  %v261_v59 = vsel %vm258_vm2, %v2820_v58, %v253_v21  ;;  %v275_v21 = vmul.f32 %v2846_v34, %v259_v23  ;;  %v285_v58 = vmul.f32 %v284_v14, %v259_v23  ;;  %v268_v36 = vmul.f32 %v2844_v19, %v262_v26 }
  0xc5   : > { %1072 = vrot.lane.b32.xlu0 %v2879_v60, %s2442_s20  ;;  %v278_v29 = vmul.f32 %v2846_v34, %v262_v26  ;;  %v288_v5 = vmul.f32 %v284_v14, %v262_v26  ;;  %v267_v38 = vmul.f32 %v2844_v19, %v261_v59  ;;  %v2939_v0 = vsel %vm366_vm0, %v1058_v13, %v1062_v15 }
  0xc6   : > { %v296_v7 = vpop.permute.xlu1 %295  ;;  %v290_v23 = vadd.f32 %v286_v17, %v2866_v43  ;;  %v269_v26 = vadd.f32 %v265_v28, %v216_v25  ;;  %v277_v19 = vmul.f32 %v2846_v34, %v261_v59  ;;  %v287_v44 = vmul.f32 %v284_v14, %v261_v59 }
  0xc7   : > { %v294_v55 = vpop.permute.xlu0 %293  ;;  %v279_v22 = vadd.f32 %v275_v21, %v226_v61  ;;  %v289_v53 = vadd.f32 %v285_v58, %v236_v52  ;;  %v272_v24 = vadd.f32 %v268_v36, %v219_v49  ;;  %v282_v27 = vadd.f32 %v278_v29, %v229_v41 }
  0xc8   : > { %1078 = vrot.lane.b32.xlu1 %v2894_v20, %s2442_s20  ;;  %v292_v15 = vadd.f32 %v288_v5, %v239_v56  ;;  %v281_v49 = vadd.f32 %v277_v19, %v228_v3  ;;  %v291_v52 = vadd.f32 %v287_v44, %v238_v4  ;;  %v4603_v19 = vld [vmem:[#allocation31_spill] sm:$0xff] }
  0xc9   : > { %1076 = vrot.lane.b32.xlu0 %v2902_v12, %s2442_s20 }
  0xca   : > { %v300_v2 = vpop.permute.xlu1 %299 }
  0xcb   : > { %v298_v31 = vpop.permute.xlu0 %297 }
  0xcc   : > { %1082 = vrot.lane.b32.xlu1 %v2923_v30, %s2442_s20  ;;  %v271_v30 = vadd.f32 %v267_v38, %v218_v47 }
  0xcd   : > { %1080 = vrot.lane.b32.xlu0 %v2926_v18, %s2442_s20 }
  0xce   : > { %v304_v45 = vpop.permute.xlu1 %303 }
  0xcf   : > { %v302_v6 = vpop.permute.xlu0 %301  ;;  %v311_v32 = vsel %vm309_vm3, %v296_v7, %v304_v45 }
  0xd0   : > { %v310_v25 = vsel %vm309_vm3, %v294_v55, %v302_v6  ;;  %v317_v43 = vmul.f32 %v2909_v35, %v311_v32  ;;  %v327_v14 = vmul.f32 %v325_v40, %v311_v32  ;;  %v337_v34 = vmul.f32 %v335_v16, %v311_v32  ;;  %1086 = vrot.lane.b32.xlu1 %v2939_v0, %s2442_s20 }
  0xd1   : > { %v316_v13 = vmul.f32 %v2909_v35, %v310_v25  ;;  %v326_v61 = vmul.f32 %v325_v40, %v310_v25  ;;  %v336_v56 = vmul.f32 %v335_v16, %v310_v25  ;;  %1084 = vrot.lane.b32.xlu0 %v2942_v37, %s2442_s20 }
  0xd2   : > { %v321_v47 = vadd.f32 %v317_v43, %v270_v54  ;;  %v331_v45 = vadd.f32 %v327_v14, %v280_v48  ;;  %v341_v41 = vadd.f32 %v337_v34, %v290_v23  ;;  %v308_v7 = vpop.permute.xlu1 %307  ;;  %v2194_v34 = vld [vmem:[%s2555_s19 + $0x58] sm:$0xfc] }
  0xd3   : > { %v320_v6 = vadd.f32 %v316_v13, %v269_v26  ;;  %v306_v55 = vpop.permute.xlu0 %305  ;;  %v330_v59 = vadd.f32 %v326_v61, %v279_v22  ;;  %v340_v17 = vadd.f32 %v336_v56, %v289_v53  ;;  %v313_v28 = vsel %vm309_vm3, %v300_v2, %v308_v7  ;;  %v2196_v61 = vld [vmem:[%s2555_s19 + $0x98] sm:$0x3] }
  0xd4   : > { %v312_v3 = vsel %vm309_vm3, %v298_v31, %v306_v55  ;;  %v319_v44 = vmul.f32 %v2909_v35, %v313_v28  ;;  %v329_v4 = vmul.f32 %v325_v40, %v313_v28  ;;  %v339_v21 = vmul.f32 %v335_v16, %v313_v28  ;;  %1124 = vrot.lane.b32.xlu1 %v2871_v1, %s2443_s27 }
  0xd5   : > { %v318_v58 = vmul.f32 %v2909_v35, %v312_v3  ;;  %v328_v48 = vmul.f32 %v325_v40, %v312_v3  ;;  %v338_v54 = vmul.f32 %v335_v16, %v312_v3  ;;  %1122 = vrot.lane.b32.xlu0 %v2879_v60, %s2443_s27  ;;  %v2969_v36 = vadd.f32 %v2622_v33, %v321_v47  ;;  %v4609_v3 = vld [vmem:[#allocation28_spill] sm:$0xff] }
  0xd6   : > { %v2972_v29 = vadd.f32 %v2631_v39, %v331_v45  ;;  %v323_v2 = vadd.f32 %v319_v44, %v272_v24  ;;  %v333_v31 = vadd.f32 %v329_v4, %v282_v27  ;;  %v343_v5 = vadd.f32 %v339_v21, %v292_v15  ;;  %v481_v23 = vpop.permute.xlu1 %480  ;;  %v2195_v24 = vld [vmem:[%s2555_s19 + $0x90] sm:$0x3] }
  0xd7   : > { %v322_v38 = vadd.f32 %v318_v58, %v271_v30  ;;  %v479_v35 = vpop.permute.xlu0 %478  ;;  %v332_v26 = vadd.f32 %v328_v48, %v281_v49  ;;  %v342_v1 = vadd.f32 %v338_v54, %v291_v52  ;;  %v2975_v40 = vadd.f32 %v2635_v42, %v341_v41  ;;  %v4606_v27 = vld [vmem:[#allocation25_spill] sm:$0xff] }
  0xd8   : > { %v2978_v16 = vadd.f32 %v2639_v46, %v320_v6  ;;  %1128 = vrot.lane.b32.xlu1 %v2894_v20, %s2443_s27  ;;  %v2983_v33 = vadd.f32 %v2643_v50, %v330_v59  ;;  %v2986_v39 = vadd.f32 %v2646_v51, %v340_v17  ;;  %v2989_v60 = vadd.f32 %v2657_v63, %v323_v2  ;;  %v4608_v49 = vld [vmem:[#allocation29_spill] sm:$0xff] }
  0xd9   : > { %v2992_v30 = vadd.f32 %v2663_v10, %v333_v31  ;;  %1126 = vrot.lane.b32.xlu0 %v2902_v12, %s2443_s27  ;;  %v2997_v42 = vadd.f32 %v2672_v8, %v343_v5  ;;  %v3000_v46 = vadd.f32 %v2652_v57, %v322_v38  ;;  %v3003_v50 = vadd.f32 %v2660_v9, %v332_v26  ;;  %v2193_v10 = vld [vmem:[%s2555_s19 + $0x50] sm:$0xfc]  ;;  %v4604_v57 = vld [vmem:[#allocation23_spill] sm:$0xff]  ;;  %v4605_v12 = vld [vmem:[#allocation26_spill] sm:$0xff] }
  0xda   : > { %v3006_v51 = vadd.f32 %v2666_v11, %v342_v1  ;;  %v485_v63 = vpop.permute.xlu1 %484  ;;  %v1268_v8 = vrot.slane %v4604_v57, 2  ;;  %v1273_v9 = vrot.slane %v4605_v12, 2  ;;  %v1267_v53 = vrot.slane %v2193_v10, 2 }
  0xdb   : > { %v483_v20 = vpop.permute.xlu0 %482  ;;  %v1277_v15 = vrot.slane %v4606_v27, 2  ;;  %v1281_v32 = vrot.slane %v2195_v24, 2  ;;  %v1275_v52 = vrot.slane %v4608_v49, 2  ;;  %v509_v56 = vstv %s2143_s29  ;;  %s3164_s29 = sld [smem:[#allocation2 + $0x25]] }
  0xdc   : > { %1132 = vrot.lane.b32.xlu1 %v4603_v19, %s2443_s27  ;;  %v3027_v14 = vsel %vm594_vm1, %v1267_v53, %v1268_v8  ;;  %v1270_v41 = vrot.slane %v2194_v34, 2  ;;  %v519_v6 = vstv %s2144_s30  ;;  %v1279_v44 = vrot.slane %v4609_v3, 2  ;;  %s3296_s30 = sld [smem:[#allocation2 + $0x40]] }
  0xdd   : > { %1130 = vrot.lane.b32.xlu0 %v2926_v18, %s2443_s27  ;;  %v3021_v18 = vsel %vm594_vm1, %v1268_v8, %v1273_v9  ;;  %v3044_v45 = vsel %vm594_vm1, %v1277_v15, %v1281_v32  ;;  %v3049_v17 = vsel %vm594_vm1, %v1273_v9, %v1277_v15  ;;  %v1283_v4 = vrot.slane %v2196_v61, 2 }
  0xde   : > { %v489_v22 = vpop.permute.xlu1 %488  ;;  %v549_v38 = vstv %s3024_s4  ;;  %v559_v8 = vstv %s3030_s5  ;;  %v569_v53 = vstv %s3036_s6  ;;  %v3077_v24 = vsel %vm594_vm1, %v1275_v52, %v1279_v44  ;;  %s3298_s4 = sld [smem:[#allocation2 + $0xc]]  ;;  %s3303_s5 = sld [smem:[#allocation2 + $0x27]] }
  0xdf   : > { %v487_v11 = vpop.permute.xlu0 %486  ;;  %v495_v47 = vsel %vm258_vm2, %v481_v23, %v489_v22  ;;  %v3069_v9 = vsel %vm594_vm1, %v1279_v44, %v1283_v4  ;;  %s3321_s6 = sld [smem:[#allocation2 + $0x42]] }
  0xe0   : > { %1136 = vrot.lane.b32.xlu1 %v2939_v0, %s2443_s27  ;;  %v499_v0 = vstv %s2142_s28  ;;  %v494_v7 = vsel %vm258_vm2, %v479_v35, %v487_v11  ;;  %v511_v58 = vmul.f32 %v509_v56, %v495_v47  ;;  %v521_v2 = vmul.f32 %v519_v6, %v495_v47  ;;  %s3157_s28 = sld [smem:[#allocation2 + $0xa]] }
  0xe1   : > { %1134 = vrot.lane.b32.xlu0 %v2942_v37, %s2443_s27  ;;  %v4607_v37 = vld [vmem:[#allocation27_spill] sm:$0xff]  ;;  %v501_v21 = vmul.f32 %v499_v0, %v495_v47  ;;  %v500_v31 = vmul.f32 %v499_v0, %v494_v7  ;;  %v510_v23 = vmul.f32 %v509_v56, %v494_v7  ;;  %v520_v35 = vmul.f32 %v519_v6, %v494_v7 }
  0xe2   : > { %v493_v25 = vpop.permute.xlu1 %492  ;;  %v1271_v13 = vrot.slane %v4607_v37, 2  ;;  %v515_v11 = vadd.f32 %v511_v58, %v2972_v29  ;;  %v525_v15 = vadd.f32 %v521_v2, %v2975_v40 }
  0xe3   : > { %v491_v43 = vpop.permute.xlu0 %490  ;;  %v497_v28 = vsel %vm258_vm2, %v485_v63, %v493_v25  ;;  %v505_v22 = vadd.f32 %v501_v21, %v2969_v36  ;;  %v504_v32 = vadd.f32 %v500_v31, %v2978_v16  ;;  %v514_v36 = vadd.f32 %v510_v23, %v2983_v33  ;;  %v4610_v31 = vld [vmem:[#allocation11_spill] sm:$0xff] }
  0xe4   : > { %1295 = vrot.lane.b32.xlu1 %v3021_v18, %s2442_s20  ;;  %v496_v48 = vsel %vm258_vm2, %v483_v20, %v491_v43  ;;  %v3059_v54 = vsel %vm594_vm1, %v1271_v13, %v1275_v52  ;;  %v3064_v5 = vsel %vm594_vm1, %v1270_v41, %v1271_v13  ;;  %v503_v26 = vmul.f32 %v499_v0, %v497_v28 }
  0xe5   : > { %1293 = vrot.lane.b32.xlu0 %v3027_v14, %s2442_s20  ;;  %v513_v1 = vmul.f32 %v509_v56, %v497_v28  ;;  %v523_v10 = vmul.f32 %v519_v6, %v497_v28  ;;  %v502_v19 = vmul.f32 %v499_v0, %v496_v48  ;;  %v512_v25 = vmul.f32 %v509_v56, %v496_v48 }
  0xe6   : > { %v531_v55 = vpop.permute.xlu1 %530  ;;  %v522_v43 = vmul.f32 %v519_v6, %v496_v48  ;;  %v524_v29 = vadd.f32 %v520_v35, %v2986_v39  ;;  %v507_v34 = vadd.f32 %v503_v26, %v2989_v60  ;;  %v4611_v35 = vld [vmem:[#allocation12_spill] sm:$0xff] }
  0xe7   : > { %v529_v59 = vpop.permute.xlu0 %528  ;;  %v517_v0 = vadd.f32 %v513_v1, %v2992_v30  ;;  %v527_v49 = vadd.f32 %v523_v10, %v2997_v42  ;;  %v506_v40 = vadd.f32 %v502_v19, %v3000_v46  ;;  %v516_v60 = vadd.f32 %v512_v25, %v3003_v50  ;;  %v4615_v25 = vld [vmem:[#allocation16_spill] sm:$0xff] }
  0xe8   : > { %1299 = vrot.lane.b32.xlu1 %v3044_v45, %s2442_s20  ;;  %v526_v30 = vadd.f32 %v522_v43, %v3006_v51 }
  0xe9   : > { %1297 = vrot.lane.b32.xlu0 %v3049_v17, %s2442_s20 }
  0xea   : > { %v535_v63 = vpop.permute.xlu1 %534 }
  0xeb   : > { %v533_v20 = vpop.permute.xlu0 %532 }
  0xec   : > { %1303 = vrot.lane.b32.xlu1 %v3059_v54, %s2442_s20 }
  0xed   : > { %1301 = vrot.lane.b32.xlu0 %v3064_v5, %s2442_s20 }
  0xee   : > { %v539_v37 = vpop.permute.xlu1 %538 }
  0xef   : > { %v537_v13 = vpop.permute.xlu0 %536  ;;  %v545_v16 = vsel %vm309_vm3, %v531_v55, %v539_v37  ;;  %v4618_v37 = vld [vmem:[#allocation22_spill] sm:$0xff] }
  0xf0   : > { %v544_v52 = vsel %vm309_vm3, %v529_v59, %v537_v13  ;;  %v551_v61 = vmul.f32 %v549_v38, %v545_v16  ;;  %v561_v33 = vmul.f32 %v559_v8, %v545_v16  ;;  %v571_v56 = vmul.f32 %v569_v53, %v545_v16  ;;  %1307 = vrot.lane.b32.xlu1 %v3069_v9, %s2442_s20 }
  0xf1   : > { %v550_v39 = vmul.f32 %v549_v38, %v544_v52  ;;  %v560_v42 = vmul.f32 %v559_v8, %v544_v52  ;;  %v570_v47 = vmul.f32 %v569_v53, %v544_v52  ;;  %1305 = vrot.lane.b32.xlu0 %v3077_v24, %s2442_s20  ;;  %v4621_v52 = vld [vmem:[#allocation21_spill] sm:$0xff] }
  0xf2   : > { %v555_v46 = vadd.f32 %v551_v61, %v505_v22  ;;  %v565_v41 = vadd.f32 %v561_v33, %v515_v11  ;;  %v575_v6 = vadd.f32 %v571_v56, %v525_v15  ;;  %v543_v55 = vpop.permute.xlu1 %542  ;;  %v4612_v22 = vld [vmem:[#allocation15_spill] sm:$0xff]  ;;  %v4614_v15 = vld [vmem:[#allocation14_spill] sm:$0xff] }
  0xf3   : > { %v554_v7 = vadd.f32 %v550_v39, %v504_v32  ;;  %v541_v59 = vpop.permute.xlu0 %540  ;;  %v564_v28 = vadd.f32 %v560_v42, %v514_v36  ;;  %v574_v3 = vadd.f32 %v570_v47, %v524_v29  ;;  %v547_v44 = vsel %vm309_vm3, %v535_v63, %v543_v55  ;;  %v4616_v36 = vld [vmem:[#allocation18_spill] sm:$0xff] }
  0xf4   : > { %v546_v50 = vsel %vm309_vm3, %v533_v20, %v541_v59  ;;  %v553_v51 = vmul.f32 %v549_v38, %v547_v44  ;;  %v563_v4 = vmul.f32 %v559_v8, %v547_v44  ;;  %v573_v21 = vmul.f32 %v569_v53, %v547_v44  ;;  %1345 = vrot.lane.b32.xlu1 %v3021_v18, %s2443_s27  ;;  %v3187_v44 = vld [vmem:[%s2555_s19 + $0xc0] sm:$0xff] }
  0xf5   : > { %v552_v58 = vmul.f32 %v549_v38, %v546_v50  ;;  %v562_v48 = vmul.f32 %v559_v8, %v546_v50  ;;  %v572_v2 = vmul.f32 %v569_v53, %v546_v50  ;;  %1343 = vrot.lane.b32.xlu0 %v3027_v14, %s2443_s27  ;;  %v3108_v23 = vadd.f32 %v4610_v31, %v555_v46  ;;  %v4613_v14 = vld [vmem:[#allocation13_spill] sm:$0xff] }
  0xf6   : > { %v3111_v26 = vadd.f32 %v4611_v35, %v565_v41  ;;  %v557_v1 = vadd.f32 %v553_v51, %v507_v34  ;;  %v567_v63 = vadd.f32 %v563_v4, %v517_v0  ;;  %v577_v20 = vadd.f32 %v573_v21, %v527_v49  ;;  %v3113_v19 = vpop.permute.xlu1 %702  ;;  %v4617_v34 = vld [vmem:[#allocation20_spill] sm:$0xff] }
  0xf7   : > { %v556_v10 = vadd.f32 %v552_v58, %v506_v40  ;;  %v3115_v38 = vpop.permute.xlu0 %700  ;;  %v566_v18 = vadd.f32 %v562_v48, %v516_v60  ;;  %v576_v8 = vadd.f32 %v572_v2, %v526_v30  ;;  %v3118_v11 = vadd.f32 %v4612_v22, %v575_v6  ;;  %v4620_v40 = vld [vmem:[#allocation19_spill] sm:$0xff]  ;;  %v3162_v60 = vld [vmem:[%s2555_s19 + $0xb0] sm:$0xff]  ;;  %v4623_v21 = vld [vmem:[#allocation24_spill] sm:$0xff] }
  0xf8   : > { %v3121_v53 = vadd.f32 %v4613_v14, %v554_v7  ;;  %1349 = vrot.lane.b32.xlu1 %v3044_v45, %s2443_s27  ;;  %v3126_v32 = vadd.f32 %v4614_v15, %v564_v28  ;;  %v3129_v43 = vadd.f32 %v4615_v25, %v574_v3  ;;  %v3132_v29 = vadd.f32 %v4616_v36, %v557_v1  ;;  %v4619_v45 = vld [vmem:[#allocation17_spill] sm:$0xff]  ;;  %v3219_v1 = vld [vmem:[%s2555_s19 + $0xa0] sm:$0xfe] }
  0xf9   : > { %v3135_v0 = vadd.f32 %v4617_v34, %v567_v63  ;;  %1347 = vrot.lane.b32.xlu0 %v3049_v17, %s2443_s27  ;;  %v3140_v13 = vadd.f32 %v4618_v37, %v577_v20  ;;  %v3143_v49 = vadd.f32 %v4619_v45, %v556_v10  ;;  %v3146_v16 = vadd.f32 %v4620_v40, %v566_v18  ;;  %v3257_v45 = vld [vmem:[%s2555_s19 + $0xa8] sm:$0xff] }
  0xfa   : > { %v3149_v61 = vadd.f32 %v4621_v52, %v576_v8  ;;  %v707_v33 = vpop.permute.xlu1 %706  ;;  %v721_v42 = vstv %s2151_s7  ;;  %v810_v47 = vstv %s2165_s9  ;;  %v3169_v46 = vstv %s2166_s10  ;;  %v3237_v8 = vld [vmem:[%s2555_s19 + $0xe0] sm:$0x1]  ;;  %s3429_s7 = sld [smem:[#allocation2 + $0xb]]  ;;  %s3467_s9 = sld [smem:[#allocation2 + $0x41]] }
  0xfb   : > { %v705_v56 = vpop.permute.xlu0 %704  ;;  %v3171_v41 = vstv %s2167_s11  ;;  %v741_v6 = vstv %s2153_s17  ;;  %v3180_v7 = vstv %s2154_s24  ;;  %v3182_v55 = vstv %s2155_s25  ;;  %s3620_s10 = sld [smem:[#allocation2 + $0xd]]  ;;  %s3622_s11 = sld [smem:[#allocation2 + $0x28]] }
  0xfc   : > { %1353 = vrot.lane.b32.xlu1 %v3059_v54, %s2443_s27  ;;  %v3184_v59 = vstv %s2156_s26  ;;  %v3190_v50 = vmul.f32 %v4604_v57, %v810_v47  ;;  %v3194_v51 = vmul.f32 %v4604_v57, %v3169_v46  ;;  %v3198_v4 = vmul.f32 %v4604_v57, %v3171_v41  ;;  %s3635_s17 = sld [smem:[#allocation2 + $0x43]]  ;;  %s3652_s24 = sld [smem:[#allocation2 + $0xf]] }
  0xfd   : > { %1351 = vrot.lane.b32.xlu0 %v3064_v5, %s2443_s27  ;;  %v3167_v5 = vld [vmem:[%s2555_s19 + $0xa0] sm:$0xff]  ;;  %v3201_v58 = vmul.f32 %v4623_v21, %v810_v47  ;;  %v3205_v48 = vmul.f32 %v4623_v21, %v3169_v46  ;;  %v3209_v2 = vmul.f32 %v4623_v21, %v3171_v41  ;;  %v3212_v31 = vmul.f32 %v4606_v27, %v810_v47  ;;  %s3654_s25 = sld [smem:[#allocation2 + $0x2a]]  ;;  %s3747_s26 = sld [smem:[#allocation2 + $0x45]] }
  0xfe   : > { %v711_v17 = vpop.permute.xlu1 %710  ;;  %4622 = vst [vmem:[#allocation31_spill] sm:$0xff] %v3198_v4  ;;  %v3216_v35 = vmul.f32 %v4606_v27, %v3169_v46  ;;  %v3227_v20 = vstv %s3157_s28  ;;  %v3231_v10 = vmul.f32 %v4606_v27, %v3171_v41  ;;  %v3234_v18 = vmul.f32 %v4605_v12, %v810_v47  ;;  %v3265_v47 = vld [vmem:[%s2555_s19 + $0xc8] sm:$0xff]  ;;  %s3763_s28 = sld [smem:[#allocation2 + $0xe]] }
  0xff   : > { %v709_v39 = vpop.permute.xlu0 %708  ;;  %4624 = vst [vmem:[#allocation23_spill] sm:$0xff] %v3212_v31  ;;  %4626 = vst [vmem:[#allocation25_spill] sm:$0xff] %v3227_v20  ;;  %v3247_v14 = vstv %s3164_s29  ;;  %v717_v25 = vsel %vm258_vm2, %v3113_v19, %v711_v17  ;;  %s3773_s29 = sld [smem:[#allocation2 + $0x29]] }
 0x100   : > { %1357 = vrot.lane.b32.xlu1 %v3069_v9, %s2443_s27  ;;  %v731_v9 = vstv %s2152_s8  ;;  %4625 = vst [vmem:[#allocation26_spill] sm:$0xff] %v3216_v35  ;;  %v716_v63 = vsel %vm258_vm2, %v3115_v38, %v709_v39  ;;  %4627 = vst [vmem:[#allocation27_spill] sm:$0xff] %v3231_v10  ;;  %v3244_v38 = vld [vmem:[%s2555_s19 + $0xb8] sm:$0xff]  ;;  %v723_v52 = vmul.f32 %v721_v42, %v717_v25  ;;  %s3431_s8 = sld [smem:[#allocation2 + $0x26]] }
 0x101   : > { %1355 = vrot.lane.b32.xlu0 %v3077_v24, %s2443_s27  ;;  %v3176_v24 = vld [vmem:[%s2555_s19 + $0xd0] sm:$0xff]  ;;  %4628 = vst [vmem:[#allocation29_spill] sm:$0xff] %v3234_v18  ;;  %4629 = vst [vmem:[#allocation28_spill] sm:$0xff] %v3247_v14  ;;  %v722_v39 = vmul.f32 %v721_v42, %v716_v63  ;;  %v3275_v18 = vld [vmem:[%s2555_s19 + $0xd8] sm:$0xff]  ;;  %v733_v10 = vmul.f32 %v731_v9, %v717_v25  ;;  %v743_v17 = vmul.f32 %v741_v6, %v717_v25 }
 0x102   : > { %v715_v54 = vpop.permute.xlu1 %714 }
 0x103   : > { %v713_v30 = vpop.permute.xlu0 %712  ;;  %v719_v22 = vsel %vm258_vm2, %v707_v33, %v715_v54  ;;  %v3262_v33 = vld [vmem:[%s2555_s19 + $0xa8] sm:$0xfe]  ;;  %v732_v54 = vmul.f32 %v731_v9, %v716_v63  ;;  %v726_v31 = vadd.f32 %v722_v39, %v3121_v53 }
 0x104   : > { %1434 = vrot.lane.b32.xlu1 %v3162_v60, %s2442_s20  ;;  %v718_v36 = vsel %vm258_vm2, %v705_v56, %v713_v30  ;;  %v742_v56 = vmul.f32 %v741_v6, %v716_v63  ;;  %v725_v30 = vmul.f32 %v721_v42, %v719_v22  ;;  %v735_v21 = vmul.f32 %v731_v9, %v719_v22 }
 0x105   : > { %1432 = vrot.lane.b32.xlu0 %v3167_v5, %s2442_s20  ;;  %v745_v27 = vmul.f32 %v741_v6, %v719_v22  ;;  %v724_v15 = vmul.f32 %v721_v42, %v718_v36  ;;  %v734_v63 = vmul.f32 %v731_v9, %v718_v36  ;;  %v744_v14 = vmul.f32 %v741_v6, %v718_v36 }
 0x106   : > { %v753_v28 = vpop.permute.xlu1 %752  ;;  %v736_v40 = vadd.f32 %v732_v54, %v3126_v32  ;;  %v746_v4 = vadd.f32 %v742_v56, %v3129_v43  ;;  %v729_v19 = vadd.f32 %v725_v30, %v3132_v29  ;;  %v739_v25 = vadd.f32 %v735_v21, %v3135_v0 }
 0x107   : > { %v751_v3 = vpop.permute.xlu0 %750  ;;  %v749_v53 = vadd.f32 %v745_v27, %v3140_v13  ;;  %v728_v32 = vadd.f32 %v724_v15, %v3143_v49  ;;  %v738_v43 = vadd.f32 %v734_v63, %v3146_v16  ;;  %v748_v29 = vadd.f32 %v744_v14, %v3149_v61 }
 0x108   : > { %1438 = vrot.lane.b32.xlu1 %v3176_v24, %s2442_s20  ;;  %v727_v21 = vadd.f32 %v723_v52, %v3108_v23  ;;  %v3338_v23 = vstv %s3296_s30  ;;  %s3775_s30 = sld [smem:[#allocation2 + $0x44]] }
 0x109   : > { %1436 = vrot.lane.b32.xlu0 %v3187_v44, %s2442_s20 }
 0x10a   : > { %v757_v34 = vpop.permute.xlu1 %756 }
 0x10b   : > { %v755_v37 = vpop.permute.xlu0 %754 }
 0x10c   : > { %1442 = vrot.lane.b32.xlu1 %v3244_v38, %s2442_s20 }
 0x10d   : > { %1440 = vrot.lane.b32.xlu0 %v3257_v45, %s2442_s20 }
 0x10e   : > { %v761_v20 = vpop.permute.xlu1 %760 }
 0x10f   : > { %v759_v35 = vpop.permute.xlu0 %758  ;;  %v767_v42 = vsel %vm309_vm3, %v753_v28, %v761_v20 }
 0x110   : > { %v766_v22 = vsel %vm309_vm3, %v751_v3, %v759_v35  ;;  %1446 = vrot.lane.b32.xlu1 %v3275_v18, %s2442_s20  ;;  %v773_v0 = vmul.f32 %v3180_v7, %v767_v42  ;;  %v783_v14 = vmul.f32 %v3182_v55, %v767_v42 }
 0x111   : > { %v772_v9 = vmul.f32 %v3180_v7, %v766_v22  ;;  %v782_v6 = vmul.f32 %v3182_v55, %v766_v22  ;;  %v792_v28 = vmul.f32 %v3184_v59, %v766_v22  ;;  %1444 = vrot.lane.b32.xlu0 %v3265_v47, %s2442_s20 }
 0x112   : > { %v765_v3 = vpop.permute.xlu1 %764  ;;  %v777_v52 = vadd.f32 %v773_v0, %v727_v21 }
 0x113   : > { %v776_v13 = vadd.f32 %v772_v9, %v726_v31  ;;  %v763_v49 = vpop.permute.xlu0 %762  ;;  %v786_v35 = vadd.f32 %v782_v6, %v736_v40  ;;  %v796_v20 = vadd.f32 %v792_v28, %v746_v4  ;;  %v769_v27 = vsel %vm309_vm3, %v757_v34, %v765_v3 }
 0x114   : > { %v768_v15 = vsel %vm309_vm3, %v755_v37, %v763_v49  ;;  %v775_v36 = vmul.f32 %v3180_v7, %v769_v27  ;;  %v785_v16 = vmul.f32 %v3182_v55, %v769_v27  ;;  %v795_v61 = vmul.f32 %v3184_v59, %v769_v27  ;;  %1484 = vrot.lane.b32.xlu1 %v3162_v60, %s2443_s27 }
 0x115   : > { %v774_v31 = vmul.f32 %v3180_v7, %v768_v15  ;;  %v793_v4 = vmul.f32 %v3184_v59, %v767_v42  ;;  %v784_v34 = vmul.f32 %v3182_v55, %v768_v15  ;;  %v794_v40 = vmul.f32 %v3184_v59, %v768_v15  ;;  %1482 = vrot.lane.b32.xlu0 %v3167_v5, %s2443_s27 }
 0x116   : > { %v779_v37 = vadd.f32 %v775_v36, %v729_v19  ;;  %v789_v39 = vadd.f32 %v785_v16, %v739_v25  ;;  %v799_v54 = vadd.f32 %v795_v61, %v749_v53  ;;  %v842_v7 = vpop.permute.xlu1 %841  ;;  %v815_v59 = vadd.f32 %v3201_v58, %v776_v13 }
 0x117   : > { %v778_v56 = vadd.f32 %v774_v31, %v728_v32  ;;  %v840_v30 = vpop.permute.xlu0 %839  ;;  %v3324_v63 = vadd.f32 %v784_v34, %v738_v43  ;;  %v3326_v55 = vadd.f32 %v794_v40, %v748_v29  ;;  %v737_v5 = vadd.f32 %v733_v10, %v3111_v26  ;;  %v3345_v10 = vld [vmem:[%s2555_s19 + $0xe8] sm:$0x1]  ;;  %v4642_v40 = vld [vmem:[#allocation31_spill] sm:$0xff] }
 0x118   : > { %v747_v19 = vadd.f32 %v743_v17, %v3118_v11  ;;  %1488 = vrot.lane.b32.xlu1 %v3176_v24, %s2443_s27  ;;  %v825_v42 = vadd.f32 %v3205_v48, %v786_v35  ;;  %v835_v22 = vadd.f32 %v3209_v2, %v796_v20  ;;  %v823_v58 = vmul.f32 %v4605_v12, %v3169_v46 }
 0x119   : > { %1486 = vrot.lane.b32.xlu0 %v3187_v44, %s2443_s27  ;;  %v833_v26 = vmul.f32 %v4605_v12, %v3171_v41  ;;  %v3348_v11 = vstv %s3298_s4  ;;  %v787_v17 = vadd.f32 %v783_v14, %v737_v5  ;;  %v3351_v9 = vstv %s3303_s5  ;;  %s3898_s4 = sld [smem:[#allocation2 + $0x10]]  ;;  %s3900_s5 = sld [smem:[#allocation2 + $0x2b]] }
 0x11a   : > { %v797_v48 = vadd.f32 %v793_v4, %v747_v19  ;;  %v846_v25 = vpop.permute.xlu1 %845  ;;  %v4630_v53 = vrot.slane %v3187_v44, 1  ;;  %v4631_v32 = vrot.slane %v3162_v60, 1  ;;  %v4633_v6 = vrot.slane %v3219_v1, 1 }
 0x11b   : > { %v844_v2 = vpop.permute.xlu0 %843  ;;  %v4634_v43 = vrot.slane %v3237_v8, 1  ;;  %v4635_v29 = vrot.slane %v3176_v24, 1  ;;  %v4638_v1 = vrot.slane %v3265_v47, 1  ;;  %v4639_v8 = vrot.slane %v3244_v38, 1 }
 0x11c   : > { %v3358_v46 = vsel %vm366_vm0, %v4631_v32, %v4630_v53  ;;  %v4632_v41 = vmov %v4631_v32  ;;  %v4637_v3 = vmov %v4630_v53  ;;  %1492 = vrot.lane.b32.xlu1 %v3244_v38, %s2443_s27  ;;  %v4641_v27 = vrot.slane %v3262_v33, 1  ;;  %v4643_v32 = vld [vmem:[#allocation23_spill] sm:$0xff] }
 0x11d   : > { %v3365_v28 = vsel %vm366_vm0, %v4633_v6, %v4632_v41  ;;  %v3372_v0 = vsel %vm366_vm0, %v4635_v29, %v4634_v43  ;;  %v4636_v13 = vmov %v4635_v29  ;;  %v3388_v35 = vsel %vm366_vm0, %v4639_v8, %v4638_v1  ;;  %1490 = vrot.lane.b32.xlu0 %v3257_v45, %s2443_s27  ;;  %v4648_v29 = vld [vmem:[#allocation29_spill] sm:$0xff] }
 0x11e   : > { %v3379_v49 = vsel %vm366_vm0, %v4637_v3, %v4636_v13  ;;  %v4640_v20 = vmov %v4639_v8  ;;  %v1651_v36 = vrot.slane %v3275_v18, 1  ;;  %v1655_v16 = vrot.slane %v3345_v10, 1  ;;  %v850_v4 = vpop.permute.xlu1 %849 }
 0x11f   : > { %v3395_v15 = vsel %vm366_vm0, %v4641_v27, %v4640_v20  ;;  %v3403_v61 = vmul.f32 %v4604_v57, %v3348_v11  ;;  %v3407_v31 = vmul.f32 %v4605_v12, %v3348_v11  ;;  %v3411_v33 = vmul.f32 %v4604_v57, %v3351_v9  ;;  %v848_v5 = vpop.permute.xlu0 %847 }
 0x120   : > { %v3415_v14 = vmul.f32 %v4605_v12, %v3351_v9  ;;  %v816_v34 = vadd.f32 %v3190_v50, %v777_v52  ;;  %v826_v45 = vadd.f32 %v3194_v51, %v787_v17  ;;  %v836_v21 = vadd.f32 %v4642_v40, %v797_v48  ;;  %v4644_v12 = vld [vmem:[#allocation26_spill] sm:$0xff]  ;;  %v4645_v50 = vld [vmem:[#allocation25_spill] sm:$0xff]  ;;  %v4646_v52 = vld [vmem:[#allocation28_spill] sm:$0xff]  ;;  %1496 = vrot.lane.b32.xlu1 %v3275_v18, %s2443_s27 }
 0x121   : > { %v3421_v19 = vstv %s3321_s6  ;;  %v856_v53 = vsel %vm258_vm2, %v842_v7, %v850_v4  ;;  %v855_v57 = vsel %vm258_vm2, %v840_v30, %v848_v5  ;;  %v818_v41 = vadd.f32 %v4643_v32, %v779_v37  ;;  %1494 = vrot.lane.b32.xlu0 %v3265_v47, %s2443_s27  ;;  %s2214_s6 = sld [smem:[#allocation2 + $0x12]] }
 0x122   : > { %v828_v6 = vadd.f32 %v4644_v12, %v789_v39  ;;  %v862_v51 = vmul.f32 %v4645_v50, %v856_v53  ;;  %v872_v17 = vmul.f32 %v4646_v52, %v856_v53  ;;  %v882_v48 = vmul.f32 %v3338_v23, %v856_v53  ;;  %v4647_v39 = vld [vmem:[#allocation27_spill] sm:$0xff]  ;;  %v854_v27 = vpop.permute.xlu1 %853 }
 0x123   : > { %v861_v43 = vmul.f32 %v4645_v50, %v855_v57  ;;  %v871_v7 = vmul.f32 %v4646_v52, %v855_v57  ;;  %v881_v37 = vmul.f32 %v3338_v23, %v855_v57  ;;  %v838_v30 = vadd.f32 %v4647_v39, %v799_v54  ;;  %v852_v4 = vpop.permute.xlu0 %851  ;;  %v3516_v39 = vld [vmem:[%s2555_s19 + $0x70] sm:$0xff] }
 0x124   : > { %v817_v13 = vadd.f32 %v4648_v29, %v778_v56  ;;  %v3445_v3 = vadd.f32 %v862_v51, %v816_v34  ;;  %v3447_v1 = vadd.f32 %v872_v17, %v826_v45  ;;  %v3449_v8 = vadd.f32 %v882_v48, %v836_v21  ;;  %1667 = vrot.lane.b32.xlu1 %v3358_v46, %s2442_s20  ;;  %v2325_v51 = vld [vmem:[%s2555_s19 + $0x50] sm:$0xfe] }
 0x125   : > { %v3451_v20 = vadd.f32 %v861_v43, %v815_v59  ;;  %v3453_v40 = vadd.f32 %v871_v7, %v825_v42  ;;  %v3455_v5 = vadd.f32 %v881_v37, %v835_v22  ;;  %v858_v53 = vsel %vm258_vm2, %v846_v25, %v854_v27  ;;  %1665 = vrot.lane.b32.xlu0 %v3365_v28, %s2442_s20  ;;  %v3509_v7 = vld [vmem:[%s2555_s19 + $0x60] sm:$0xff] }
 0x126   : > { %v857_v54 = vsel %vm258_vm2, %v844_v2, %v852_v4  ;;  %v864_v56 = vmul.f32 %v4645_v50, %v858_v53  ;;  %v874_v34 = vmul.f32 %v4646_v52, %v858_v53  ;;  %v884_v45 = vmul.f32 %v3338_v23, %v858_v53  ;;  %4649 = vst [vmem:[#allocation11_spill] sm:$0xff] %v3516_v39  ;;  %v3526_v4 = vld [vmem:[%s2555_s19 + $0x80] sm:$0xff] }
 0x127   : > { %v863_v59 = vmul.f32 %v4645_v50, %v857_v54  ;;  %v827_v42 = vadd.f32 %v823_v58, %v3324_v63  ;;  %v837_v22 = vadd.f32 %v833_v26, %v3326_v55  ;;  %v873_v25 = vmul.f32 %v4646_v52, %v857_v54  ;;  %v892_v63 = vpop.permute.xlu1 %891  ;;  %v890_v58 = vpop.permute.xlu0 %889  ;;  %4650 = vst [vmem:[#allocation12_spill] sm:$0xff] %v3526_v4 }
 0x128   : > { %v883_v2 = vmul.f32 %v3338_v23, %v857_v54  ;;  %v3475_v21 = vadd.f32 %v864_v56, %v818_v41  ;;  %v3477_v57 = vadd.f32 %v874_v34, %v828_v6  ;;  %v3479_v32 = vadd.f32 %v884_v45, %v838_v30  ;;  %1671 = vrot.lane.b32.xlu1 %v3372_v0, %s2442_s20  ;;  %v4651_v54 = vld [vmem:[#allocation30_spill] sm:$0xff] }
 0x129   : > { %v3481_v12 = vadd.f32 %v863_v59, %v817_v13  ;;  %v3483_v55 = vadd.f32 %v873_v25, %v827_v42  ;;  %v3488_v23 = vstv %s3429_s7  ;;  %v3491_v50 = vstv %s3431_s8  ;;  %1669 = vrot.lane.b32.xlu0 %v3379_v49, %s2442_s20  ;;  %s2204_s7 = sld [smem:[#allocation2 + $0x2c]]  ;;  %s2205_s8 = sld [smem:[#allocation2 + $0x47]] }
 0x12a   : > { %v3485_v26 = vadd.f32 %v883_v2, %v837_v22  ;;  %v4559_v41 = vrot.slane %v3403_v61, 1  ;;  %v4558_v6 = vrot.slane %v3407_v31, 1  ;;  %v3499_v52 = vmul.f32 %v2325_v51, %v3348_v11 }
 0x12b   : > { %v3502_v17 = vmul.f32 %v2325_v51, %v3351_v9  ;;  %v4565_v48 = vrot.slane %v3411_v33, 1  ;;  %v4564_v43 = vrot.slane %v3415_v14, 1  ;;  %v3513_v37 = vmul.f32 %v3509_v7, %v3421_v19  ;;  %v896_v29 = vpop.permute.xlu1 %895  ;;  %v894_v13 = vpop.permute.xlu0 %893 }
 0x12c   : > { %v3520_v30 = vmul.f32 %v3516_v39, %v3421_v19  ;;  %v3523_v27 = vmul.f32 %v2325_v51, %v3421_v19  ;;  %v3530_v53 = vmul.f32 %v3526_v4, %v3348_v11  ;;  %v3534_v56 = vmul.f32 %v4651_v54, %v3348_v11  ;;  %v2329_v11 = vld [vmem:[%s2555_s19 + $0x90] sm:$0x1]  ;;  %1675 = vrot.lane.b32.xlu1 %v3388_v35, %s2442_s20 }
 0x12d   : > { %v3538_v34 = vmul.f32 %v3526_v4, %v3351_v9  ;;  %v3545_v45 = vsel %vm366_vm0, %v1651_v36, %v1655_v16  ;;  %v4652_v59 = vrot.slane %v3265_v47, 1  ;;  %v3556_v22 = vmul.f32 %v2329_v11, %v3351_v9  ;;  %1673 = vrot.lane.b32.xlu0 %v3395_v15, %s2442_s20 }
 0x12e   : > { %v3560_v25 = vmul.f32 %v3526_v4, %v3421_v19  ;;  %v930_v10 = vstv %s3467_s9  ;;  %v3570_v16 = vsel %vm366_vm0, %v4559_v41, %v4558_v6  ;;  %v3581_v2 = vsel %vm366_vm0, %v4565_v48, %v4564_v43  ;;  %s2215_s9 = sld [smem:[#allocation2 + $0x2d]] }
 0x12f   : > { %v3552_v42 = vsel %vm366_vm0, %v4652_v59, %v1651_v36  ;;  %v1022_v54 = vrot.slane %v3520_v30, 1  ;;  %v3586_v59 = vmul.f32 %v2329_v11, %v3421_v19  ;;  %v900_v6 = vpop.permute.xlu1 %899  ;;  %v898_v36 = vpop.permute.xlu0 %897  ;;  %v1019_v9 = vrot.slane %v3523_v27, 1 }
 0x130   : > { %v968_v4 = vrot.slane %v3534_v56, 1  ;;  %v995_v39 = vrot.slane %v3538_v34, 1  ;;  %v906_v43 = vsel %vm309_vm3, %v892_v63, %v900_v6  ;;  %v905_v48 = vsel %vm309_vm3, %v890_v58, %v898_v36  ;;  %1679 = vrot.lane.b32.xlu1 %v3545_v45, %s2442_s20 }
 0x131   : > { %v997_v51 = vrot.slane %v3556_v22, 1  ;;  %v912_v11 = vmul.f32 %v3488_v23, %v906_v43  ;;  %v922_v27 = vmul.f32 %v3491_v50, %v906_v43  ;;  %v932_v41 = vmul.f32 %v930_v10, %v906_v43  ;;  %1677 = vrot.lane.b32.xlu0 %v3552_v42, %s2442_s20 }
 0x132   : > { %v911_v56 = vmul.f32 %v3488_v23, %v905_v48  ;;  %v921_v63 = vmul.f32 %v3491_v50, %v905_v48  ;;  %v931_v6 = vmul.f32 %v930_v10, %v905_v48  ;;  %v1026_v58 = vrot.slane %v3586_v59, 1  ;;  %v3625_v59 = vld [vmem:[%s2555_s19 + $0xa0] sm:$0xfc] }
 0x133   : > { %v1861_v34 = vrot.slane %v3162_v60, 2  ;;  %v3609_v22 = vadd.f32 %v912_v11, %v3445_v3  ;;  %v3612_v43 = vadd.f32 %v922_v27, %v3447_v1  ;;  %v3615_v36 = vadd.f32 %v932_v41, %v3449_v8  ;;  %v904_v48 = vpop.permute.xlu1 %903  ;;  %v902_v8 = vpop.permute.xlu0 %901 }
 0x134   : > { %v3618_v19 = vadd.f32 %v911_v56, %v3451_v20  ;;  %v3628_v60 = vadd.f32 %v921_v63, %v3453_v40  ;;  %v3631_v3 = vadd.f32 %v931_v6, %v3455_v5  ;;  %v908_v1 = vsel %vm309_vm3, %v896_v29, %v904_v48  ;;  %1717 = vrot.lane.b32.xlu1 %v3358_v46, %s2443_s27  ;;  %v3645_v5 = vld [vmem:[%s2555_s19 + $0xe0] sm:$0x3] }
 0x135   : > { %v1866_v20 = vrot.slane %v3187_v44, 2  ;;  %v914_v41 = vmul.f32 %v3488_v23, %v908_v1  ;;  %v924_v11 = vmul.f32 %v3491_v50, %v908_v1  ;;  %v934_v27 = vmul.f32 %v930_v10, %v908_v1  ;;  %1715 = vrot.lane.b32.xlu0 %v3365_v28, %s2443_s27 }
 0x136   : > { %v907_v40 = vsel %vm309_vm3, %v894_v13, %v902_v8  ;;  %v1860_v44 = vrot.slane %v3625_v59, 2  ;;  %v4657_v8 = vrot.slane %v3502_v17, 1  ;;  %v1864_v30 = vrot.slane %v3244_v38, 2 }
 0x137   : > { %v913_v29 = vmul.f32 %v3488_v23, %v907_v40  ;;  %v923_v56 = vmul.f32 %v3491_v50, %v907_v40  ;;  %v933_v63 = vmul.f32 %v930_v10, %v907_v40  ;;  %v918_v13 = vadd.f32 %v914_v41, %v3475_v21  ;;  %v1075_v48 = vpop.permute.xlu1 %1074  ;;  %v1073_v1 = vpop.permute.xlu0 %1072 }
 0x138   : > { %v928_v46 = vadd.f32 %v924_v11, %v3477_v57  ;;  %v938_v6 = vadd.f32 %v934_v27, %v3479_v32  ;;  %v1870_v23 = vrot.slane %v3176_v24, 2  ;;  %v1874_v21 = vrot.slane %v3645_v5, 2  ;;  %1721 = vrot.lane.b32.xlu1 %v3372_v0, %s2443_s27 }
 0x139   : > { %v917_v50 = vadd.f32 %v913_v29, %v3481_v12  ;;  %v927_v28 = vadd.f32 %v923_v56, %v3483_v55  ;;  %v3663_v10 = vadd.f32 %v933_v63, %v3485_v26  ;;  %v4653_v24 = vrot.slane %v3513_v37, 1  ;;  %1719 = vrot.lane.b32.xlu0 %v3379_v49, %s2443_s27 }
 0x13a   : > { %v4654_v32 = vrot.slane %v3403_v61, 1  ;;  %v4655_v12 = vrot.slane %v3499_v52, 1  ;;  %v4656_v26 = vrot.slane %v3411_v33, 1  ;;  %v4659_v61 = vrot.slane %v3530_v53, 1 }
 0x13b   : > { %v1023_v57 = vsel %vm366_vm0, %v4653_v24, %v1022_v54  ;;  %v4658_v0 = vmov %v4653_v24  ;;  %v998_v27 = vsel %vm366_vm0, %v995_v39, %v997_v51  ;;  %v4661_v33 = vrot.slane %v3407_v31, 1  ;;  %v1079_v56 = vpop.permute.xlu1 %1078 }
 0x13c   : > { %v963_v55 = vsel %vm366_vm0, %v4655_v12, %v4654_v32  ;;  %v992_v41 = vsel %vm366_vm0, %v4657_v8, %v4656_v26  ;;  %v1021_v11 = vsel %vm366_vm0, %v1019_v9, %v4658_v0  ;;  %v969_v52 = vsel %vm366_vm0, %v4659_v61, %v968_v4  ;;  %v3701_v9 = vld [vmem:[%s2555_s19 + $0xa8] sm:$0xfc]  ;;  %1725 = vrot.lane.b32.xlu1 %v3388_v35, %s2443_s27 }
 0x13d   : > { %v4660_v40 = vmov %v4659_v61  ;;  %v4662_v29 = vrot.slane %v3415_v14, 1  ;;  %v1093_v49 = vstv %s3620_s10  ;;  %v1103_v63 = vstv %s3622_s11  ;;  %v1077_v14 = vpop.permute.xlu0 %1076  ;;  %1723 = vrot.lane.b32.xlu0 %v3395_v15, %s2443_s27  ;;  %s2216_s10 = sld [smem:[#allocation2 + $0x48]]  ;;  %s2217_s11 = sld [smem:[#allocation2 + $0x13]] }
 0x13e   : > { %v967_v17 = vsel %vm366_vm0, %v4661_v33, %v4660_v40  ;;  %v4663_v24 = vrot.slane %v3560_v25, 1  ;;  %v1113_v51 = vstv %s3635_s17  ;;  %v3718_v32 = vsel %vm594_vm1, %v1860_v44, %v1861_v34  ;;  %s2218_s17 = sld [smem:[#allocation2 + $0x2e]] }
 0x13f   : > { %v996_v37 = vsel %vm366_vm0, %v4662_v29, %v995_v39  ;;  %v3715_v39 = vsel %vm594_vm1, %v1861_v34, %v1866_v20  ;;  %v3721_v12 = vsel %vm594_vm1, %v1870_v23, %v1874_v21  ;;  %v3726_v25 = vsel %vm594_vm1, %v1866_v20, %v1870_v23  ;;  %v1083_v20 = vpop.permute.xlu1 %1082 }
 0x140   : > { %v1027_v4 = vsel %vm366_vm0, %v4663_v24, %v1026_v58  ;;  %v4664_v53 = vmov %v4663_v24  ;;  %v1863_v58 = vrot.slane %v3701_v9, 2  ;;  %v975_v34 = vadd.f32 %v3570_v16, %v3609_v22  ;;  %1729 = vrot.lane.b32.xlu1 %v3545_v45, %s2443_s27  ;;  %v2245_v24 = vld [vmem:[%s2555_s19 + $0xe8] sm:$0x3] }
 0x141   : > { %v1025_v31 = vsel %vm366_vm0, %v1022_v54, %v4664_v53  ;;  %v1868_v54 = vrot.slane %v3265_v47, 2  ;;  %v1004_v44 = vadd.f32 %v3581_v2, %v3612_v43  ;;  %v3738_v21 = vstv %s3652_s24  ;;  %v1081_v16 = vpop.permute.xlu0 %1080  ;;  %1727 = vrot.lane.b32.xlu0 %v3552_v42, %s2443_s27  ;;  %s2219_s24 = sld [smem:[#allocation2 + $0x49]] }
 0x142   : > { %v3741_v35 = vstv %s3654_s25  ;;  %v1033_v23 = vadd.f32 %v1023_v57, %v3615_v36  ;;  %v974_v26 = vadd.f32 %v963_v55, %v3618_v19  ;;  %v1003_v8 = vadd.f32 %v992_v41, %v3628_v60  ;;  %s2233_s25 = sld [smem:[#allocation2 + $0x15]] }
 0x143   : > { %v1032_v0 = vadd.f32 %v1021_v11, %v3631_v3  ;;  %v1089_v15 = vsel %vm258_vm2, %v1075_v48, %v1083_v20  ;;  %v977_v2 = vadd.f32 %v969_v52, %v918_v13  ;;  %v1006_v22 = vadd.f32 %v998_v27, %v928_v46 }
 0x144   : > { %v1035_v43 = vadd.f32 %v1027_v4, %v938_v6  ;;  %v1095_v61 = vmul.f32 %v1093_v49, %v1089_v15  ;;  %v1105_v40 = vmul.f32 %v1103_v63, %v1089_v15  ;;  %v1115_v33 = vmul.f32 %v1113_v51, %v1089_v15  ;;  %v1087_v6 = vpop.permute.xlu1 %1086  ;;  %1888 = vrot.lane.b32.xlu1 %v3715_v39, %s2442_s20 }
 0x145   : > { %v1088_v36 = vsel %vm258_vm2, %v1073_v1, %v1081_v16  ;;  %v976_v48 = vadd.f32 %v967_v17, %v917_v50  ;;  %v1005_v55 = vadd.f32 %v996_v37, %v927_v28  ;;  %v1091_v42 = vsel %vm258_vm2, %v1079_v56, %v1087_v6  ;;  %v1085_v50 = vpop.permute.xlu0 %1084  ;;  %1886 = vrot.lane.b32.xlu0 %v3718_v32, %s2442_s20 }
 0x146   : > { %v1094_v19 = vmul.f32 %v1093_v49, %v1088_v36  ;;  %v1104_v60 = vmul.f32 %v1103_v63, %v1088_v36  ;;  %v1114_v3 = vmul.f32 %v1113_v51, %v1088_v36  ;;  %v3757_v57 = vadd.f32 %v1095_v61, %v975_v34  ;;  %v2330_v61 = vld [vmem:[%s2555_s19 + $0x50] sm:$0xfc] }
 0x147   : > { %v3759_v13 = vadd.f32 %v1105_v40, %v1004_v44  ;;  %v3761_v46 = vadd.f32 %v1115_v33, %v1033_v23  ;;  %v1097_v11 = vmul.f32 %v1093_v49, %v1091_v42  ;;  %v1107_v28 = vmul.f32 %v1103_v63, %v1091_v42 }
 0x148   : > { %v3765_v1 = vadd.f32 %v1094_v19, %v974_v26  ;;  %v3767_v45 = vadd.f32 %v1104_v60, %v1003_v8  ;;  %v3769_v41 = vadd.f32 %v1114_v3, %v1032_v0  ;;  %v1117_v52 = vmul.f32 %v1113_v51, %v1091_v42  ;;  %v1125_v44 = vpop.permute.xlu1 %1124  ;;  %1892 = vrot.lane.b32.xlu1 %v3721_v12, %s2442_s20  ;;  %v4665_v8 = vld [vmem:[#allocation11_spill] sm:$0xff] }
 0x149   : > { %v1090_v27 = vsel %vm258_vm2, %v1077_v14, %v1085_v50  ;;  %v1034_v17 = vadd.f32 %v1025_v31, %v3663_v10  ;;  %v3785_v4 = vadd.f32 %v1097_v11, %v977_v2  ;;  %v3787_v53 = vadd.f32 %v1107_v28, %v1006_v22  ;;  %1890 = vrot.lane.b32.xlu0 %v3726_v25, %s2442_s20  ;;  %v4666_v11 = vld [vmem:[#allocation12_spill] sm:$0xff] }
 0x14a   : > { %v1096_v29 = vmul.f32 %v1093_v49, %v1090_v27  ;;  %v1106_v37 = vmul.f32 %v1103_v63, %v1090_v27  ;;  %v1116_v56 = vmul.f32 %v1113_v51, %v1090_v27  ;;  %v3789_v34 = vadd.f32 %v1117_v52, %v1035_v43  ;;  %v1123_v49 = vpop.permute.xlu0 %1122 }
 0x14b   : > { %v1235_v14 = vstv %s3747_s26  ;;  %v3803_v63 = vsel %vm594_vm1, %v1864_v30, %v1868_v54  ;;  %v1872_v31 = vrot.slane %v3275_v18, 2  ;;  %v1876_v51 = vrot.slane %v2245_v24, 2  ;;  %s2234_s26 = sld [smem:[#allocation2 + $0x30]] }
 0x14c   : > { %v3792_v20 = vadd.f32 %v1096_v29, %v976_v48  ;;  %v3794_v23 = vadd.f32 %v1106_v37, %v1005_v55  ;;  %v3796_v10 = vadd.f32 %v1116_v56, %v1034_v17  ;;  %v3810_v26 = vmul.f32 %v3509_v7, %v3738_v21  ;;  %v1129_v22 = vpop.permute.xlu1 %1128  ;;  %1896 = vrot.lane.b32.xlu1 %v3803_v63, %s2442_s20  ;;  %v2331_v17 = vld [vmem:[%s2555_s19 + $0x90] sm:$0x3] }
 0x14d   : > { %v3814_v0 = vmul.f32 %v4665_v8, %v3738_v21  ;;  %v3820_v15 = vmul.f32 %v3509_v7, %v3741_v35  ;;  %v3824_v18 = vmul.f32 %v4665_v8, %v3741_v35  ;;  %v3827_v16 = vmul.f32 %v3509_v7, %v1235_v14 }
 0x14e   : > { %v3830_v2 = vmul.f32 %v4665_v8, %v1235_v14  ;;  %v3837_v43 = vsel %vm594_vm1, %v1863_v58, %v1864_v30  ;;  %v3841_v40 = vmul.f32 %v2330_v61, %v3738_v21  ;;  %v3844_v33 = vmul.f32 %v2330_v61, %v3741_v35  ;;  %v1127_v7 = vpop.permute.xlu0 %1126 }
 0x14f   : > { %v1143_v36 = vstv %s3763_s28  ;;  %v1153_v19 = vstv %s3773_s29  ;;  %v1163_v60 = vstv %s3775_s30  ;;  %v3852_v38 = vsel %vm594_vm1, %v1872_v31, %v1876_v51  ;;  %1894 = vrot.lane.b32.xlu0 %v3837_v43, %s2442_s20  ;;  %s2235_s28 = sld [smem:[#allocation2 + $0x4b]]  ;;  %s2220_s29 = sld [smem:[#allocation2 + $0x14]] }
 0x150   : > { %v3857_v9 = vsel %vm594_vm1, %v1868_v54, %v1872_v31  ;;  %v1189_v30 = vrot.slane %v3810_v26, 2  ;;  %v1191_v58 = vrot.slane %v3814_v0, 2  ;;  %v1218_v3 = vrot.slane %v3820_v15, 2  ;;  %v1133_v47 = vpop.permute.xlu1 %1132  ;;  %1900 = vrot.lane.b32.xlu1 %v3852_v38, %s2442_s20  ;;  %s2221_s30 = sld [smem:[#allocation2 + $0x2f]] }
 0x151   : > { %v1220_v48 = vrot.slane %v3824_v18, 2  ;;  %v1249_v55 = vrot.slane %v3830_v2, 2  ;;  %v3869_v50 = vmul.f32 %v2330_v61, %v1235_v14  ;;  %v3873_v28 = vmul.f32 %v4666_v11, %v3738_v21 }
 0x152   : > { %v1139_v52 = vsel %vm309_vm3, %v1125_v44, %v1133_v47  ;;  %v1131_v27 = vpop.permute.xlu0 %1130  ;;  %v3879_v29 = vmul.f32 %v2331_v17, %v3738_v21  ;;  %v3883_v37 = vmul.f32 %v4666_v11, %v3741_v35  ;;  %v3886_v56 = vmul.f32 %v2331_v17, %v3741_v35 }
 0x153   : > { %v1145_v24 = vmul.f32 %v1143_v36, %v1139_v52  ;;  %v1155_v31 = vmul.f32 %v1153_v19, %v1139_v52  ;;  %v1165_v51 = vmul.f32 %v1163_v60, %v1139_v52  ;;  %v1138_v8 = vsel %vm309_vm3, %v1123_v49, %v1131_v27  ;;  %1898 = vrot.lane.b32.xlu0 %v3857_v9, %s2442_s20  ;;  %s3907_s20 = sld [smem:[#allocation2 + $0x46]] }
 0x154   : > { %v1144_v44 = vmul.f32 %v1143_v36, %v1138_v8  ;;  %v1154_v61 = vmul.f32 %v1153_v19, %v1138_v8  ;;  %v1164_v21 = vmul.f32 %v1163_v60, %v1138_v8  ;;  %v1239_v47 = vmul.f32 %v4666_v11, %v1235_v14  ;;  %v1137_v42 = vpop.permute.xlu1 %1136  ;;  %1938 = vrot.lane.b32.xlu1 %v3715_v39, %s2443_s27 }
 0x155   : > { %v1149_v35 = vadd.f32 %v1145_v24, %v3757_v57  ;;  %v1159_v54 = vadd.f32 %v1155_v31, %v3759_v13  ;;  %v1169_v52 = vadd.f32 %v1165_v51, %v3761_v46  ;;  %v1240_v49 = vmul.f32 %v2331_v17, %v1235_v14 }
 0x156   : > { %v1148_v27 = vadd.f32 %v1144_v44, %v3765_v1  ;;  %v1158_v8 = vadd.f32 %v1154_v61, %v3767_v45  ;;  %v1168_v6 = vadd.f32 %v1164_v21, %v3769_v41  ;;  %v1141_v11 = vsel %vm309_vm3, %v1129_v22, %v1137_v42  ;;  %v1135_v57 = vpop.permute.xlu0 %1134 }
 0x157   : > { %v1147_v13 = vmul.f32 %v1143_v36, %v1141_v11  ;;  %v1157_v46 = vmul.f32 %v1153_v19, %v1141_v11  ;;  %v1167_v24 = vmul.f32 %v1163_v60, %v1141_v11  ;;  %v1140_v31 = vsel %vm309_vm3, %v1127_v7, %v1135_v57  ;;  %1936 = vrot.lane.b32.xlu0 %v3718_v32, %s2443_s27 }
 0x158   : > { %v1146_v1 = vmul.f32 %v1143_v36, %v1140_v31  ;;  %v1156_v14 = vmul.f32 %v1153_v19, %v1140_v31  ;;  %v1166_v45 = vmul.f32 %v1163_v60, %v1140_v31  ;;  %v1246_v41 = vrot.slane %v3869_v50, 2  ;;  %v1296_v51 = vpop.permute.xlu1 %1295  ;;  %1942 = vrot.lane.b32.xlu1 %v3721_v12, %s2443_s27 }
 0x159   : > { %v1151_v22 = vadd.f32 %v1147_v13, %v3785_v4  ;;  %v1161_v42 = vadd.f32 %v1157_v46, %v3787_v53  ;;  %v1171_v17 = vadd.f32 %v1167_v24, %v3789_v34  ;;  %v1193_v7 = vrot.slane %v3873_v28, 2 }
 0x15a   : > { %v1150_v39 = vadd.f32 %v1146_v1, %v3792_v20  ;;  %v1160_v36 = vadd.f32 %v1156_v14, %v3794_v23  ;;  %v3923_v19 = vadd.f32 %v1166_v45, %v3796_v10  ;;  %v1294_v32 = vpop.permute.xlu0 %1293  ;;  %v1195_v4 = vrot.slane %v3879_v29, 2 }
 0x15b   : > { %v1222_v53 = vrot.slane %v3883_v37, 2  ;;  %v1224_v34 = vrot.slane %v3886_v56, 2  ;;  %v1251_v60 = vrot.slane %v1239_v47, 2  ;;  %v1253_v50 = vrot.slane %v1240_v49, 2  ;;  %1940 = vrot.lane.b32.xlu0 %v3726_v25, %s2443_s27 }
 0x15c   : > { %v1192_v20 = vsel %vm594_vm1, %v1189_v30, %v1191_v58  ;;  %v1300_v23 = vpop.permute.xlu1 %1299  ;;  %v1221_v12 = vsel %vm594_vm1, %v1218_v3, %v1220_v48  ;;  %v4667_v10 = vrot.slane %v3827_v16, 2  ;;  %v1314_v25 = vstv %s3898_s4  ;;  %1946 = vrot.lane.b32.xlu1 %v3803_v63, %s2443_s27  ;;  %s2222_s4 = sld [smem:[#allocation2 + $0x4a]] }
 0x15d   : > { %v1324_v29 = vstv %s3900_s5  ;;  %v1334_v56 = vstv %s3907_s20  ;;  %v4668_v44 = vrot.slane %v3841_v40, 2  ;;  %v4669_v21 = vrot.slane %v3844_v33, 2  ;;  %s4084_s5 = sld [smem:[#allocation2 + $0x16]]  ;;  %s4088_s20 = sld [smem:[#allocation2 + $0x18]] }
 0x15e   : > { %v1250_v28 = vsel %vm594_vm1, %v4667_v10, %v1249_v55  ;;  %v1298_v37 = vpop.permute.xlu0 %1297  ;;  %v4670_v49 = vmov %v4667_v10  ;;  %v1196_v57 = vsel %vm594_vm1, %v1193_v7, %v1195_v4  ;;  %v1225_v26 = vsel %vm594_vm1, %v1222_v53, %v1224_v34 }
 0x15f   : > { %v1190_v61 = vsel %vm594_vm1, %v4668_v44, %v1189_v30  ;;  %v1219_v47 = vsel %vm594_vm1, %v4669_v21, %v1218_v3  ;;  %v1248_v11 = vsel %vm594_vm1, %v1246_v41, %v4670_v49  ;;  %v1254_v40 = vsel %vm594_vm1, %v1251_v60, %v1253_v50  ;;  %1944 = vrot.lane.b32.xlu0 %v3837_v43, %s2443_s27 }
 0x160   : > { %v1194_v15 = vsel %vm594_vm1, %v1191_v58, %v1193_v7  ;;  %v1202_v33 = vadd.f32 %v1192_v20, %v1149_v35  ;;  %v1231_v16 = vadd.f32 %v1221_v12, %v1159_v54  ;;  %v1223_v30 = vsel %vm594_vm1, %v1220_v48, %v1222_v53  ;;  %v1304_v3 = vpop.permute.xlu1 %1303  ;;  %1950 = vrot.lane.b32.xlu1 %v3852_v38, %s2443_s27 }
 0x161   : > { %v1252_v63 = vsel %vm594_vm1, %v1249_v55, %v1251_v60  ;;  %v1260_v13 = vadd.f32 %v1250_v28, %v1169_v52  ;;  %v1201_v46 = vadd.f32 %v1190_v61, %v1148_v27  ;;  %v1230_v24 = vadd.f32 %v1219_v47, %v1158_v8 }
 0x162   : > { %v1259_v0 = vadd.f32 %v1248_v11, %v1168_v6  ;;  %v1310_v58 = vsel %vm258_vm2, %v1296_v51, %v1304_v3  ;;  %v1302_v31 = vpop.permute.xlu0 %1301  ;;  %v1204_v43 = vadd.f32 %v1196_v57, %v1151_v22  ;;  %v1233_v35 = vadd.f32 %v1225_v26, %v1161_v42 }
 0x163   : > { %v1262_v54 = vadd.f32 %v1254_v40, %v1171_v17  ;;  %v1316_v1 = vmul.f32 %v1314_v25, %v1310_v58  ;;  %v1326_v18 = vmul.f32 %v1324_v29, %v1310_v58  ;;  %v1336_v14 = vmul.f32 %v1334_v56, %v1310_v58  ;;  %1948 = vrot.lane.b32.xlu0 %v3857_v9, %s2443_s27  ;;  %s2203_s27 = sld [smem:[#allocation2 + $0x11]]  ;;  %v2332_v40 = vld [vmem:[%s2555_s19 + $0xa0] sm:$0xff] }
 0x164   : > { %v1309_v2 = vsel %vm258_vm2, %v1294_v32, %v1302_v31  ;;  %v1203_v6 = vadd.f32 %v1194_v15, %v1150_v39  ;;  %v1308_v41 = vpop.permute.xlu1 %1307  ;;  %v1232_v22 = vadd.f32 %v1223_v30, %v1160_v36  ;;  %v1261_v9 = vadd.f32 %v1252_v63, %v3923_v19 }
 0x165   : > { %v1315_v48 = vmul.f32 %v1314_v25, %v1309_v2  ;;  %v1325_v55 = vmul.f32 %v1324_v29, %v1309_v2  ;;  %v1335_v52 = vmul.f32 %v1334_v56, %v1309_v2  ;;  %v1320_v27 = vadd.f32 %v1316_v1, %v1202_v33 }
 0x166   : > { %v1330_v8 = vadd.f32 %v1326_v18, %v1231_v16  ;;  %v1340_v45 = vadd.f32 %v1336_v14, %v1260_v13  ;;  %v1312_v7 = vsel %vm258_vm2, %v1300_v23, %v1308_v41  ;;  %v1306_v32 = vpop.permute.xlu0 %1305  ;;  %v1403_v47 = vstv %s2214_s6  ;;  %s4100_s6 = sld [smem:[#allocation2 + $0x31]] }
 0x167   : > { %v1319_v42 = vadd.f32 %v1315_v48, %v1201_v46  ;;  %v1329_v17 = vadd.f32 %v1325_v55, %v1230_v24  ;;  %v1339_v51 = vadd.f32 %v1335_v52, %v1259_v0  ;;  %v1318_v38 = vmul.f32 %v1314_v25, %v1312_v7 }
 0x168   : > { %v1328_v4 = vmul.f32 %v1324_v29, %v1312_v7  ;;  %v1338_v53 = vmul.f32 %v1334_v56, %v1312_v7  ;;  %v1311_v34 = vsel %vm258_vm2, %v1298_v37, %v1306_v32  ;;  %v1346_v23 = vpop.permute.xlu1 %1345  ;;  %v1413_v49 = vstv %s2215_s9  ;;  %s4145_s9 = sld [smem:[#allocation2 + $0x32]] }
 0x169   : > { %v1317_v39 = vmul.f32 %v1314_v25, %v1311_v34  ;;  %v1327_v60 = vmul.f32 %v1324_v29, %v1311_v34  ;;  %v1337_v36 = vmul.f32 %v1334_v56, %v1311_v34  ;;  %v1322_v50 = vadd.f32 %v1318_v38, %v1204_v43 }
 0x16a   : > { %v1332_v20 = vadd.f32 %v1328_v4, %v1233_v35  ;;  %v1342_v12 = vadd.f32 %v1338_v53, %v1262_v54  ;;  %v1344_v61 = vpop.permute.xlu0 %1343  ;;  %v1364_v19 = vstv %s2203_s27  ;;  %v1374_v25 = vstv %s2204_s7  ;;  %s4090_s27 = sld [smem:[#allocation2 + $0x33]]  ;;  %s4103_s7 = sld [smem:[#allocation2 + $0x4e]] }
 0x16b   : > { %v1321_v10 = vadd.f32 %v1317_v39, %v1203_v6  ;;  %v1331_v28 = vadd.f32 %v1327_v60, %v1232_v22  ;;  %v1341_v44 = vadd.f32 %v1337_v36, %v1261_v9  ;;  %v1384_v29 = vstv %s2205_s8  ;;  %v4002_v39 = vld [vmem:[%s2555_s19 + $0xb0] sm:$0xff]  ;;  %s4106_s8 = sld [smem:[#allocation2 + $0x4c]] }
 0x16c   : > { %v1350_v37 = vpop.permute.xlu1 %1349  ;;  %v1423_v26 = vstv %s2216_s10  ;;  %v1404_v15 = vmul.f32 %v2332_v40, %v1403_v47  ;;  %v1414_v24 = vmul.f32 %v2332_v40, %v1413_v49  ;;  %v1405_v60 = vmul.f32 %v4002_v39, %v1403_v47  ;;  %s4147_s10 = sld [smem:[#allocation2 + $0x4d]] }
 0x16d   : > { %v1424_v35 = vmul.f32 %v2332_v40, %v1423_v26  ;;  %v1415_v36 = vmul.f32 %v4002_v39, %v1413_v49 }
 0x16e   : > { %v1348_v21 = vpop.permute.xlu0 %1347 }
 0x170   : > { %v1354_v56 = vpop.permute.xlu1 %1353 }
 0x171   : > { %v1360_v11 = vsel %vm309_vm3, %v1346_v23, %v1354_v56 }
 0x172   : > { %v1352_v57 = vpop.permute.xlu0 %1351  ;;  %v1366_v33 = vmul.f32 %v1364_v19, %v1360_v11  ;;  %v1376_v16 = vmul.f32 %v1374_v25, %v1360_v11  ;;  %v1386_v30 = vmul.f32 %v1384_v29, %v1360_v11 }
 0x173   : > { %v1359_v63 = vsel %vm309_vm3, %v1344_v61, %v1352_v57 }
 0x174   : > { %v1365_v3 = vmul.f32 %v1364_v19, %v1359_v63  ;;  %v1375_v13 = vmul.f32 %v1374_v25, %v1359_v63  ;;  %v1385_v46 = vmul.f32 %v1384_v29, %v1359_v63  ;;  %v1370_v0 = vadd.f32 %v1366_v33, %v1320_v27  ;;  %v1358_v43 = vpop.permute.xlu1 %1357 }
 0x175   : > { %v1380_v58 = vadd.f32 %v1376_v16, %v1330_v8  ;;  %v1390_v31 = vadd.f32 %v1386_v30, %v1340_v45  ;;  %v1362_v14 = vsel %vm309_vm3, %v1350_v37, %v1358_v43  ;;  %v1453_v37 = vstv %s2217_s11  ;;  %s4172_s11 = sld [smem:[#allocation2 + $0x19]] }
 0x176   : > { %v1369_v54 = vadd.f32 %v1365_v3, %v1319_v42  ;;  %v1379_v1 = vadd.f32 %v1375_v13, %v1329_v17  ;;  %v1389_v18 = vadd.f32 %v1385_v46, %v1339_v51  ;;  %v1356_v2 = vpop.permute.xlu0 %1355  ;;  %v1368_v48 = vmul.f32 %v1364_v19, %v1362_v14 }
 0x177   : > { %v1378_v55 = vmul.f32 %v1374_v25, %v1362_v14  ;;  %v1388_v52 = vmul.f32 %v1384_v29, %v1362_v14  ;;  %v1361_v6 = vsel %vm309_vm3, %v1348_v21, %v1356_v2  ;;  %v1463_v21 = vstv %s2218_s17  ;;  %s4174_s17 = sld [smem:[#allocation2 + $0x34]] }
 0x178   : > { %v1367_v41 = vmul.f32 %v1364_v19, %v1361_v6  ;;  %v1377_v27 = vmul.f32 %v1374_v25, %v1361_v6  ;;  %v1387_v8 = vmul.f32 %v1384_v29, %v1361_v6  ;;  %v1372_v45 = vadd.f32 %v1368_v48, %v1322_v50  ;;  %v1435_v17 = vpop.permute.xlu1 %1434 }
 0x179   : > { %v1382_v22 = vadd.f32 %v1378_v55, %v1332_v20  ;;  %v1392_v42 = vadd.f32 %v1388_v52, %v1342_v12  ;;  %v1408_v4 = vadd.f32 %v1404_v15, %v1369_v54  ;;  %v1418_v53 = vadd.f32 %v1414_v24, %v1379_v1  ;;  %v4008_v12 = vld [vmem:[%s2555_s19 + $0xd0] sm:$0xff] }
 0x17a   : > { %v1371_v51 = vadd.f32 %v1367_v41, %v1321_v10  ;;  %v1381_v7 = vadd.f32 %v1377_v27, %v1331_v28  ;;  %v1391_v32 = vadd.f32 %v1387_v8, %v1341_v44  ;;  %v1433_v38 = vpop.permute.xlu0 %1432  ;;  %v1428_v34 = vadd.f32 %v1424_v35, %v1389_v18  ;;  %v4014_v44 = vld [vmem:[%s2555_s19 + $0xc0] sm:$0xff] }
 0x17b   : > { %v1425_v50 = vmul.f32 %v4002_v39, %v1423_v26  ;;  %v1407_v23 = vmul.f32 %v4008_v12, %v1403_v47  ;;  %v1417_v10 = vmul.f32 %v4008_v12, %v1413_v49  ;;  %v1427_v28 = vmul.f32 %v4008_v12, %v1423_v26 }
 0x17c   : > { %v1439_v9 = vpop.permute.xlu1 %1438  ;;  %v1406_v61 = vmul.f32 %v4014_v44, %v1403_v47  ;;  %v1473_v19 = vstv %s2219_s24  ;;  %v1416_v25 = vmul.f32 %v4014_v44, %v1413_v49  ;;  %v1409_v56 = vadd.f32 %v1405_v60, %v1370_v0  ;;  %s4196_s24 = sld [smem:[#allocation2 + $0x4f]] }
 0x17d   : > { %v1419_v11 = vadd.f32 %v1415_v36, %v1380_v58  ;;  %v1429_v57 = vadd.f32 %v1425_v50, %v1390_v31  ;;  %v1426_v40 = vmul.f32 %v4014_v44, %v1423_v26  ;;  %v1411_v16 = vadd.f32 %v1407_v23, %v1372_v45 }
 0x17e   : > { %v1437_v20 = vpop.permute.xlu0 %1436  ;;  %v1421_v30 = vadd.f32 %v1417_v10, %v1382_v22  ;;  %v1431_v63 = vadd.f32 %v1427_v28, %v1392_v42  ;;  %v1410_v58 = vadd.f32 %v1406_v61, %v1371_v51  ;;  %v1420_v54 = vadd.f32 %v1416_v25, %v1381_v7 }
 0x17f   : > { %v1430_v27 = vadd.f32 %v1426_v40, %v1391_v32  ;;  %v1543_v50 = vstv %s2233_s25  ;;  %v1601_v23 = vstv %s2235_s28  ;;  %v4055_v10 = vstv %s2220_s29  ;;  %s4261_s25 = sld [smem:[#allocation2 + $0x1a]]  ;;  %s4278_s28 = sld [smem:[#allocation2 + $0x50]] }
 0x180   : > { %v1443_v29 = vpop.permute.xlu1 %1442  ;;  %v4059_v61 = vstv %s2221_s30  ;;  %v4065_v25 = vmul.f32 %v4014_v44, %v1543_v50  ;;  %s188_s29 = sand.u32 1, %s2430_s13  }
 0x181   : > { %v1449_v15 = vsel %vm258_vm2, %v1435_v17, %v1443_v29  ;;  %s4453_s30 = smul.u32 96, %s188_s29 }
 0x182   : > { %v1441_v33 = vpop.permute.xlu0 %1440  ;;  %v1455_v3 = vmul.f32 %v1453_v37, %v1449_v15  ;;  %v1465_v47 = vmul.f32 %v1463_v21, %v1449_v15  ;;  %v1475_v13 = vmul.f32 %v1473_v19, %v1449_v15 }
 0x183   : > { %v1448_v46 = vsel %vm258_vm2, %v1433_v38, %v1441_v33 }
 0x184   : > { %v1454_v49 = vmul.f32 %v1453_v37, %v1448_v46  ;;  %v1464_v24 = vmul.f32 %v1463_v21, %v1448_v46  ;;  %v1474_v0 = vmul.f32 %v1473_v19, %v1448_v46  ;;  %v4023_v31 = vadd.f32 %v1455_v3, %v1409_v56  ;;  %v1447_v35 = vpop.permute.xlu1 %1446  ;;  %v2336_v46 = vld [vmem:[%s2555_s19 + $0xa0] sm:$0xfe] }
 0x185   : > { %v4025_v26 = vadd.f32 %v1465_v47, %v1419_v11  ;;  %v4027_v43 = vadd.f32 %v1475_v13, %v1429_v57  ;;  %v1451_v2 = vsel %vm258_vm2, %v1439_v9, %v1447_v35  ;;  %v4076_v57 = vmul.f32 %v4002_v39, %v1601_v23 }
 0x186   : > { %v4029_v1 = vadd.f32 %v1454_v49, %v1408_v4  ;;  %v4031_v18 = vadd.f32 %v1464_v24, %v1418_v53  ;;  %v4033_v14 = vadd.f32 %v1474_v0, %v1428_v34  ;;  %v1445_v48 = vpop.permute.xlu0 %1444  ;;  %v1457_v55 = vmul.f32 %v1453_v37, %v1451_v2 }
 0x187   : > { %v1467_v52 = vmul.f32 %v1463_v21, %v1451_v2  ;;  %v1477_v6 = vmul.f32 %v1473_v19, %v1451_v2  ;;  %v1450_v41 = vsel %vm258_vm2, %v1437_v20, %v1445_v48  ;;  %v1572_v20 = vstv %s2234_s26  ;;  %s4276_s26 = sld [smem:[#allocation2 + $0x35]] }
 0x188   : > { %v1456_v8 = vmul.f32 %v1453_v37, %v1450_v41  ;;  %v1466_v45 = vmul.f32 %v1463_v21, %v1450_v41  ;;  %v1476_v22 = vmul.f32 %v1473_v19, %v1450_v41  ;;  %v4039_v42 = vadd.f32 %v1457_v55, %v1411_v16  ;;  %v4045_v7 = vpop.permute.xlu1 %1484 }
 0x189   : > { %v4041_v17 = vadd.f32 %v1467_v52, %v1421_v30  ;;  %v4043_v51 = vadd.f32 %v1477_v6, %v1431_v63  ;;  %v4061_v37 = vstv %s2222_s4  ;;  %v1545_v19 = vmul.f32 %v4002_v39, %v1543_v50  ;;  %s4463_s4 = scalar_lea.vmem [#allocation7], %s4453_s30 }
 0x18a   : > { %v1460_v38 = vadd.f32 %v1456_v8, %v1410_v58  ;;  %v1470_v4 = vadd.f32 %v1466_v45, %v1420_v54  ;;  %v1480_v53 = vadd.f32 %v1476_v22, %v1430_v27  ;;  %v4047_v34 = vpop.permute.xlu0 %1482  ;;  %v4070_v56 = vmul.f32 %v4002_v39, %v1572_v20  ;;  %v2337_v8 = vld [vmem:[%s2555_s19 + $0xe0] sm:$0x1]  ;;  %s4136_s19 = sld [smem:[#allocation2 + $0x17]] }
 0x18b   : > { %v4073_v11 = vmul.f32 %v4014_v44, %v1572_v20  ;;  %v4082_v16 = vmul.f32 %v4014_v44, %v1601_v23  ;;  %v1544_v49 = vmul.f32 %v2336_v46, %v1543_v50  ;;  %v1555_v24 = vrot.slane %v1545_v19, 1 }
 0x18c   : > { %v4049_v32 = vpop.permute.xlu1 %1488  ;;  %v1557_v0 = vrot.slane %v4065_v25, 1  ;;  %v1573_v58 = vmul.f32 %v2336_v46, %v1572_v20  ;;  %v1584_v35 = vrot.slane %v4070_v56, 1  ;;  %v1613_v2 = vrot.slane %v4076_v57, 1 }
 0x18d   : > { %v1586_v54 = vrot.slane %v4073_v11, 1  ;;  %v4566_v48 = vrot.slane %v4082_v16, 1  ;;  %v1602_v52 = vmul.f32 %v2336_v46, %v1601_v23  ;;  %v1554_v41 = vrot.slane %v1544_v49, 1 }
 0x18e   : > { %v1487_v9 = vpop.permute.xlu0 %1486  ;;  %v1547_v27 = vmul.f32 %v4008_v12, %v1543_v50  ;;  %v1548_v45 = vmul.f32 %v2337_v8, %v1543_v50  ;;  %v4119_v22 = vsel %vm366_vm0, %v1555_v24, %v1557_v0  ;;  %v4131_v19 = vstv %s4084_s5  ;;  %s2260_s5 = smul.u32 1536, %s2488_s16 }
 0x18f   : > { %v1605_v50 = vmul.f32 %v4008_v12, %v1601_v23  ;;  %v1606_v56 = vmul.f32 %v2337_v8, %v1601_v23  ;;  %v1799_v11 = vstv %s4090_s27  ;;  %v4141_v57 = vstv %s4100_s6 }
 0x190   : > { %v4051_v60 = vpop.permute.xlu1 %1492  ;;  %v1828_v46 = vstv %s4103_s7  ;;  %v4151_v49 = vstv %s4106_s8  ;;  %s4485_s6 = scalar_lea.hbm %s4539_s3, %s2260_s5  ;;  %s4495_s7 = scalar_lea.sflag [#allocation3], %s188_s29 }
 0x192   : > { %v4053_v36 = vpop.permute.xlu0 %1490 }
 0x194   : > { %v4057_v28 = vpop.permute.xlu1 %1496 }
 0x196   : > { %v1495_v21 = vpop.permute.xlu0 %1494 }
 0x197   : > { %v1500_v29 = vsel %vm309_vm3, %v1487_v9, %v1495_v21  ;;  %v4123_v9 = vsel %vm366_vm0, %v1584_v35, %v1586_v54  ;;  %v4128_v21 = vsel %vm366_vm0, %v1613_v2, %v4566_v48 }
 0x198   : > { %v1506_v40 = vmul.f32 %v4055_v10, %v1500_v29  ;;  %v1516_v15 = vmul.f32 %v4059_v61, %v1500_v29  ;;  %v1526_v33 = vmul.f32 %v4061_v37, %v1500_v29  ;;  %v4086_v30 = vpop.permute.xlu1 %1667  ;;  %v1612_v29 = vrot.slane %v1602_v52, 1 }
 0x19a   : > { %v4092_v63 = vadd.f32 %v1506_v40, %v1460_v38  ;;  %v4094_v3 = vadd.f32 %v1516_v15, %v1470_v4  ;;  %v4096_v47 = vadd.f32 %v1526_v33, %v1480_v53  ;;  %v4098_v13 = vpop.permute.xlu0 %1665  ;;  %v1583_v38 = vrot.slane %v1573_v58, 1 }
 0x19b   : > { %v1576_v4 = vmul.f32 %v4008_v12, %v1572_v20  ;;  %v1577_v53 = vmul.f32 %v2337_v8, %v1572_v20  ;;  %v1770_v20 = vstv %s4088_s20  ;;  %v1559_v15 = vrot.slane %v1547_v27, 1  ;;  %s2036_s20 = sshll.u32 %s4463_s4, 4  ;;  %s4487_s20 = int_to_ptr.vmem [resolvable:$true] %s2036_s20 }
 0x19c   : > { %4671 = vst [vmem:[#allocation15_spill] sm:$0xff] %v4092_v63  ;;  %4672 = vst [vmem:[#allocation13_spill] sm:$0xff] %v4094_v3  ;;  %v4112_v55 = vpop.permute.xlu1 %1671  ;;  %v1561_v33 = vrot.slane %v1548_v45, 1  ;;  %v4154_v58 = vsel %vm366_vm0, %v1554_v41, %v1555_v24  ;;  %v1772_v8 = vmul.f32 %v4002_v39, %v1770_v20  ;;  %v4158_v48 = vmul.f32 %v4014_v44, %v1770_v20  ;;  %s2368_s8 = scalar_lea.vmem %s4487_s20, 1536 }
 0x19d   : > { %4673 = vst [vmem:[#allocation14_spill] sm:$0xff] %v4096_v47  ;;  %v1588_v23 = vrot.slane %v1576_v4, 1  ;;  %v1590_v52 = vrot.slane %v1577_v53, 1  ;;  %v1801_v27 = vmul.f32 %v4002_v39, %v1799_v11  ;;  %v4162_v45 = vmul.f32 %v4014_v44, %v1799_v11  ;;  %p2369_p10 = scmp.ne.s32.totalorder %s4487_s20, %s2368_s8 }
 0x19e   : > { %v4114_v6 = vpop.permute.xlu0 %1669  ;;  %v1619_v47 = vrot.slane %v1606_v56, 1  ;;  %v4167_v63 = vmul.f32 %v4002_v39, %v1828_v46  ;;  %v4170_v24 = vmul.f32 %v4014_v44, %v1828_v46  ;;  %v4177_v41 = vsel %vm366_vm0, %v1583_v38, %v1584_v35 }
 0x19f   : > { %4674 = vst [vmem:[#allocation16_spill] sm:$0xff] %v4114_v6  ;;  %v1617_v6 = vrot.slane %v1605_v50, 1  ;;  %v4180_v4 = vsel %vm366_vm0, %v1612_v29, %v1613_v2  ;;  %v4183_v53 = vsel %vm366_vm0, %v1559_v15, %v1561_v33  ;;  %v4186_v50 = vsel %vm366_vm0, %v1557_v0, %v1559_v15  ;;  %p2370_p0 = pnand %p2369_p10, %p4712_p12 }
 0x1a0   : > { %v4134_v25 = vpop.permute.xlu1 %1675  ;;  %v4191_v44 = vsel %vm366_vm0, %v1588_v23, %v1590_v52  ;;  %v4194_v56 = vsel %vm366_vm0, %v1586_v54, %v1588_v23  ;;  %v1771_v35 = vmul.f32 %v3625_v59, %v1770_v20  ;;  %v1800_v2 = vmul.f32 %v3625_v59, %v1799_v11 }
 0x1a1   : > { %4676 = vst [vmem:[#allocation20_spill] sm:$0xff] %v4194_v56  ;;  %v1782_v38 = vrot.slane %v1772_v8, 2  ;;  %v1784_v0 = vrot.slane %v4158_v48, 2  ;;  %v1811_v29 = vrot.slane %v1801_v27, 2  ;;  %v1813_v15 = vrot.slane %v4162_v45, 2  ;;  %p2371_p7 = pneg %p2370_p0 }
 0x1a2   : > { %v4143_v40 = vpop.permute.xlu0 %1673  ;;  %v4203_v33 = vsel %vm366_vm0, %v1617_v6, %v1619_v47  ;;  %v1840_v54 = vrot.slane %v4167_v63, 2  ;;  %v4678_v56 = vrot.slane %v4082_v16, 1  ;;  %v4218_v27 = vstv %s4136_s19  ;;  %s2444_s19 = smov [#allocation7]  }
 0x1a3   : > { %4680 = vst [vmem:[#allocation19_spill] sm:$0xff] %v4218_v27  ;;  %v4221_v47 = vstv %s4145_s9  ;;  %v4224_v45 = vstv %s4147_s10  ;;  %v1781_v63 = vrot.slane %v1771_v35, 2  ;;  %v1774_v23 = vmul.f32 %v4008_v12, %v1770_v20  ;;  %s2372_s9 = sshll.u32 %s2444_s19, 4  ;;  %s2373_s9 = int_to_ptr.vmem [resolvable:$false] %s2372_s9 }
 0x1a4   : > { %v4164_v3 = vpop.permute.xlu1 %1679  ;;  %v4213_v8 = vsel %vm366_vm0, %v4678_v56, %v1617_v6  ;;  %4681 = vst [vmem:[#allocation21_spill] sm:$0xff] %v4221_v47  ;;  %4682 = vst [vmem:[#allocation24_spill] sm:$0xff] %v4224_v45  ;;  %v4229_v16 = vsel %vm594_vm1, %v1782_v38, %v1784_v0  ;;  %v4232_v6 = vsel %vm594_vm1, %v1811_v29, %v1813_v15  ;;  %v4685_v35 = vrot.slane %v4170_v24, 2  ;;  %s2374_s10 = scalar_lea.vmem %s2373_s9, 3072  ;;  %p2375_p8 = scmp.lt.s32.totalorder %s4487_s20, %s2373_s9 }
 0x1a5   : > { %4683 = vst [vmem:[#allocation31_spill] sm:$0xff] %v4229_v16  ;;  %4684 = vst [vmem:[#allocation23_spill] sm:$0xff] %v4232_v6  ;;  %v1803_v56 = vmul.f32 %v4008_v12, %v1799_v11  ;;  %v1804_v27 = vmul.f32 %v3645_v5, %v1799_v11  ;;  %v4244_v45 = vstv %s4172_s11  ;;  %v1499_v6 = vsel %vm309_vm3, %v4045_v7, %v4051_v60  ;;  %p2376_p11 = scmp.lt.s32.totalorder %s2374_s10, %s2368_s8 }
 0x1a6   : > { %v4188_v39 = vpop.permute.xlu0 %1677  ;;  %4687 = vst [vmem:[#allocation25_spill] sm:$0xff] %v4244_v45  ;;  %v1498_v11 = vsel %vm309_vm3, %v4047_v34, %v4053_v36  ;;  %v1786_v45 = vrot.slane %v1774_v23, 2  ;;  %v1501_v34 = vsel %vm309_vm3, %v4049_v32, %v4057_v28 }
 0x1a7   : > { %4675 = vst [vmem:[#allocation18_spill] sm:$0xff] %v4188_v39  ;;  %v1829_v39 = vmul.f32 %v3625_v59, %v1828_v46  ;;  %v1775_v59 = vmul.f32 %v3645_v5, %v1770_v20  ;;  %v4247_v20 = vstv %s4174_s17  ;;  %v1817_v36 = vrot.slane %v1804_v27, 2  ;;  %p2377_p13 = por %p2376_p11, %p2375_p8 }
 0x1a8   : > { %v4205_v52 = vpop.permute.xlu1 %1717  ;;  %4688 = vst [vmem:[#allocation28_spill] sm:$0xff] %v4247_v20  ;;  %v4264_v20 = vstv %s4196_s24  ;;  %v1504_v23 = vmul.f32 %v4055_v10, %v1498_v11  ;;  %v1514_v32 = vmul.f32 %v4059_v61, %v1498_v11 }
 0x1a9   : > { %4677 = vst [vmem:[#allocation22_spill] sm:$0xff] %v4205_v52  ;;  %v1810_v52 = vrot.slane %v1800_v2, 2  ;;  %v4241_v2 = vsel %vm594_vm1, %v1840_v54, %v4685_v35  ;;  %v1832_v35 = vmul.f32 %v4008_v12, %v1828_v46  ;;  %4689 = vst [vmem:[#allocation27_spill] sm:$0xff] %v4264_v20  ;;  %v1788_v7 = vrot.slane %v1775_v59, 2  ;;  %p2378_p1 = pnand %p2377_p13, %p2371_p7 }
 0x1aa   : > { %v4215_v48 = vpop.permute.xlu0 %1715  ;;  %4686 = vst [vmem:[#allocation26_spill] sm:$0xff] %v4241_v2  ;;  %v1833_v2 = vmul.f32 %v3645_v5, %v1828_v46  ;;  %v1815_v12 = vrot.slane %v1803_v56, 2  ;;  %v1505_v5 = vmul.f32 %v4055_v10, %v1499_v6  ;;  %v1515_v46 = vmul.f32 %v4059_v61, %v1499_v6 }
 0x1ab   : > { %4679 = vst [vmem:[#allocation17_spill] sm:$0xff] %v4215_v48  ;;  %v1839_v48 = vrot.slane %v1829_v39, 2  ;;  %v4267_v39 = vsel %vm594_vm1, %v1781_v63, %v1782_v38  ;;  %v4274_v60 = vsel %vm594_vm1, %v1810_v52, %v1811_v29  ;;  %v1525_v38 = vmul.f32 %v4061_v37, %v1499_v6 }
 0x1ac   : > { %v4236_v47 = vpop.permute.xlu1 %1721  ;;  %4690 = vst [vmem:[#allocation29_spill] sm:$0xff] %v4267_v39  ;;  %4691 = vst [vmem:[#allocation30_spill] sm:$0xff] %v4274_v60  ;;  %v1844_v52 = vrot.slane %v1832_v35, 2  ;;  %v1846_v27 = vrot.slane %v1833_v2, 2  ;;  %v1524_v59 = vmul.f32 %v4061_v37, %v1498_v11  ;;  %v1507_v56 = vmul.f32 %v4055_v10, %v1501_v34 }
 0x1ad   : > { %v4286_v29 = vsel %vm594_vm1, %v1839_v48, %v1840_v54  ;;  %v1517_v20 = vmul.f32 %v4059_v61, %v1501_v34  ;;  %v4292_v6 = vsel %vm594_vm1, %v1784_v0, %v1786_v45  ;;  %v1527_v60 = vmul.f32 %v4061_v37, %v1501_v34 }
 0x1ae   : > { %v4257_v16 = vpop.permute.xlu0 %1719  ;;  %v4296_v39 = vsel %vm594_vm1, %v1786_v45, %v1788_v7  ;;  %v4299_v54 = vsel %vm594_vm1, %v1815_v12, %v1817_v36  ;;  %v4302_v48 = vsel %vm594_vm1, %v1813_v15, %v1815_v12  ;;  %v1509_v2 = vadd.f32 %v1505_v5, %v4023_v31 }
 0x1af   : > { %v1519_v10 = vadd.f32 %v1515_v46, %v4025_v26  ;;  %v1529_v61 = vadd.f32 %v1525_v38, %v4027_v43  ;;  %v1508_v0 = vadd.f32 %v1504_v23, %v4029_v1  ;;  %v1518_v45 = vadd.f32 %v1514_v32, %v4031_v18  ;;  %v4693_v23 = vld [vmem:[#allocation15_spill] sm:$0xff]  ;;  %v4694_v32 = vld [vmem:[#allocation13_spill] sm:$0xff] }
 0x1b0   : > { %v1726_v63 = vpop.permute.xlu1 %1725  ;;  %v4310_v35 = vsel %vm594_vm1, %v1844_v52, %v1846_v27  ;;  %v4692_v15 = vrot.slane %v4170_v24, 2  ;;  %v4318_v31 = vstv %s4261_s25  ;;  %v1528_v26 = vadd.f32 %v1524_v59, %v4033_v14  ;;  %v4697_v59 = vld [vmem:[#allocation22_spill] sm:$0xff] }
 0x1b1   : > { %v1511_v43 = vadd.f32 %v1507_v56, %v4039_v42  ;;  %v1521_v1 = vadd.f32 %v1517_v20, %v4041_v17  ;;  %v1682_v18 = vsel %vm258_vm2, %v4086_v30, %v4134_v25  ;;  %v1531_v34 = vadd.f32 %v1527_v60, %v4043_v51 }
 0x1b2   : > { %v1724_v28 = vpop.permute.xlu0 %1723  ;;  %v4315_v7 = vsel %vm594_vm1, %v4692_v15, %v1844_v52  ;;  %v1681_v24 = vsel %vm258_vm2, %v4098_v13, %v4143_v40  ;;  %v4333_v12 = vstv %s4276_s26  ;;  %v4336_v36 = vstv %s4278_s28  ;;  %v4695_v52 = vld [vmem:[#allocation20_spill] sm:$0xff] }
 0x1b3   : > { %v1568_v14 = vadd.f32 %v4119_v22, %v1509_v2  ;;  %v1597_v42 = vadd.f32 %v4123_v9, %v1519_v10  ;;  %v1626_v17 = vadd.f32 %v4128_v21, %v1529_v61  ;;  %v1567_v20 = vadd.f32 %v4154_v58, %v1508_v0  ;;  %v4698_v0 = vld [vmem:[#allocation18_spill] sm:$0xff] }
 0x1b4   : > { %v1730_v37 = vpop.permute.xlu1 %1729  ;;  %v1688_v51 = vmul.f32 %v4131_v19, %v1682_v18  ;;  %v1698_v25 = vmul.f32 %v4141_v57, %v1682_v18  ;;  %v1708_v13 = vmul.f32 %v4151_v49, %v1682_v18  ;;  %v1596_v40 = vadd.f32 %v4177_v41, %v1518_v45 }
 0x1b5   : > { %v1625_v22 = vadd.f32 %v4180_v4, %v1528_v26  ;;  %v1687_v9 = vmul.f32 %v4131_v19, %v1681_v24  ;;  %v1570_v21 = vadd.f32 %v4183_v53, %v1511_v43  ;;  %v1599_v58 = vadd.f32 %v4191_v44, %v1521_v1  ;;  %v4696_v53 = vld [vmem:[#allocation14_spill] sm:$0xff]  ;;  %v4700_v26 = vld [vmem:[#allocation17_spill] sm:$0xff] }
 0x1b6   : > { %v1728_v11 = vpop.permute.xlu0 %1727  ;;  %v1697_v5 = vmul.f32 %v4141_v57, %v1681_v24  ;;  %v1707_v46 = vmul.f32 %v4151_v49, %v1681_v24  ;;  %v1628_v38 = vadd.f32 %v4203_v33, %v1531_v34  ;;  %v1684_v41 = vsel %vm258_vm2, %v4112_v55, %v4164_v3  ;;  %v4699_v3 = vld [vmem:[#allocation16_spill] sm:$0xff]  ;;  %v4701_v34 = vld [vmem:[#allocation19_spill] sm:$0xff] }
 0x1b7   : > { %v1569_v4 = vadd.f32 %v4186_v50, %v4693_v23  ;;  %v1598_v27 = vadd.f32 %v4695_v52, %v4694_v32  ;;  %v1627_v44 = vadd.f32 %v4213_v8, %v4696_v53  ;;  %v1732_v56 = vsel %vm309_vm3, %v4697_v59, %v1726_v63 }
 0x1b8   : > { %v4342_v30 = vpop.permute.xlu1 %1888  ;;  %v1692_v33 = vadd.f32 %v1688_v51, %v1568_v14  ;;  %v1702_v10 = vadd.f32 %v1698_v25, %v1597_v42  ;;  %v1712_v61 = vadd.f32 %v1708_v13, %v1626_v17  ;;  %v1683_v55 = vsel %vm258_vm2, %v4699_v3, %v4698_v0  ;;  %v4702_v17 = vld [vmem:[#allocation21_spill] sm:$0xff] }
 0x1b9   : > { %v1691_v45 = vadd.f32 %v1687_v9, %v1567_v20  ;;  %v1690_v15 = vmul.f32 %v4131_v19, %v1684_v41  ;;  %v1700_v8 = vmul.f32 %v4141_v57, %v1684_v41  ;;  %v1731_v63 = vsel %vm309_vm3, %v4700_v26, %v1724_v28  ;;  %v4703_v28 = vld [vmem:[#allocation24_spill] sm:$0xff] }
 0x1ba   : > { %v4348_v60 = vpop.permute.xlu0 %1886  ;;  %v1701_v43 = vadd.f32 %v1697_v5, %v1596_v40  ;;  %v1711_v1 = vadd.f32 %v1707_v46, %v1625_v22  ;;  %v1710_v18 = vmul.f32 %v4151_v49, %v1684_v41  ;;  %v1738_v24 = vmul.f32 %v4701_v34, %v1732_v56 }
 0x1bb   : > { %v1689_v14 = vmul.f32 %v4131_v19, %v1683_v55  ;;  %v1699_v42 = vmul.f32 %v4141_v57, %v1683_v55  ;;  %v1748_v20 = vmul.f32 %v4702_v17, %v1732_v56  ;;  %v1734_v51 = vsel %vm309_vm3, %v4236_v47, %v1730_v37 }
 0x1bc   : > { %v4370_v2 = vpop.permute.xlu1 %1892  ;;  %v1709_v13 = vmul.f32 %v4151_v49, %v1683_v55  ;;  %v1758_v40 = vmul.f32 %v4703_v28, %v1732_v56  ;;  %v1737_v22 = vmul.f32 %v4701_v34, %v1731_v63  ;;  %v1733_v9 = vsel %vm309_vm3, %v4257_v16, %v1728_v11 }
 0x1bd   : > { %v1694_v5 = vadd.f32 %v1690_v15, %v1570_v21  ;;  %v1704_v57 = vadd.f32 %v1700_v8, %v1599_v58  ;;  %v1747_v46 = vmul.f32 %v4702_v17, %v1731_v63  ;;  %v1757_v41 = vmul.f32 %v4703_v28, %v1731_v63 }
 0x1be   : > { %v4376_v50 = vpop.permute.xlu0 %1890  ;;  %v1714_v23 = vadd.f32 %v1710_v18, %v1628_v38  ;;  %v1742_v47 = vadd.f32 %v1738_v24, %v1692_v33  ;;  %v1740_v37 = vmul.f32 %v4701_v34, %v1734_v51  ;;  %v1750_v49 = vmul.f32 %v4702_v17, %v1734_v51 }
 0x1bf   : > { %v1693_v32 = vadd.f32 %v1689_v14, %v1569_v4  ;;  %v1752_v52 = vadd.f32 %v1748_v20, %v1702_v10  ;;  %v1760_v53 = vmul.f32 %v4703_v28, %v1734_v51  ;;  %v1739_v59 = vmul.f32 %v4701_v34, %v1733_v9  ;;  %v4704_v4 = vld [vmem:[#allocation31_spill] sm:$0xff]  ;;  %v4707_v14 = vld [vmem:[#allocation29_spill] sm:$0xff] }
 0x1c0   : > { %v1897_v25 = vpop.permute.xlu1 %1896  ;;  %v1762_v11 = vadd.f32 %v1758_v40, %v1712_v61  ;;  %v1741_v21 = vadd.f32 %v1737_v22, %v1691_v45  ;;  %v1749_v58 = vmul.f32 %v4702_v17, %v1733_v9  ;;  %v1759_v56 = vmul.f32 %v4703_v28, %v1733_v9  ;;  %v4705_v45 = vld [vmem:[#allocation23_spill] sm:$0xff]  ;;  %v4708_v20 = vld [vmem:[#allocation25_spill] sm:$0xff]  ;;  %v4710_v40 = vld [vmem:[#allocation28_spill] sm:$0xff] }
 0x1c1   : > { %v1703_v38 = vadd.f32 %v1699_v42, %v1598_v27  ;;  %v1713_v33 = vadd.f32 %v1709_v13, %v1627_v44  ;;  %v1751_v3 = vadd.f32 %v1747_v46, %v1701_v43  ;;  %v1761_v55 = vadd.f32 %v1757_v41, %v1711_v1  ;;  %v4706_v1 = vld [vmem:[#allocation26_spill] sm:$0xff]  ;;  %v4711_v22 = vld [vmem:[#allocation27_spill] sm:$0xff] }
 0x1c2   : > { %v1895_v19 = vpop.permute.xlu0 %1894  ;;  %v1744_v15 = vadd.f32 %v1740_v37, %v1694_v5  ;;  %v1754_v8 = vadd.f32 %v1750_v49, %v1704_v57  ;;  %v1795_v10 = vadd.f32 %v4704_v4, %v1742_v47  ;;  %v1903_v26 = vsel %vm258_vm2, %v4342_v30, %v1897_v25  ;;  %v4709_v13 = vld [vmem:[#allocation30_spill] sm:$0xff] }
 0x1c3   : > { %v1764_v63 = vadd.f32 %v1760_v53, %v1714_v23  ;;  %v1743_v61 = vadd.f32 %v1739_v59, %v1693_v32  ;;  %v1824_v18 = vadd.f32 %v4705_v45, %v1752_v52  ;;  %v1902_v34 = vsel %vm258_vm2, %v4348_v60, %v1895_v19 }
 0x1c4   : > { %v1901_v16 = vpop.permute.xlu1 %1900  ;;  %v1753_v44 = vadd.f32 %v1749_v58, %v1703_v38  ;;  %v1763_v43 = vadd.f32 %v1759_v56, %v1713_v33  ;;  %v1853_v24 = vadd.f32 %v4706_v1, %v1762_v11  ;;  %v1794_v42 = vadd.f32 %v4707_v14, %v1741_v21 }
 0x1c5   : > { %v1909_v51 = vmul.f32 %v4708_v20, %v1903_v26  ;;  %v1823_v30 = vadd.f32 %v4709_v13, %v1751_v3  ;;  %v1852_v25 = vadd.f32 %v4286_v29, %v1761_v55  ;;  %v1905_v28 = vsel %vm258_vm2, %v4370_v2, %v1901_v16 }
 0x1c6   : > { %v1899_v0 = vpop.permute.xlu0 %1898  ;;  %v1919_v60 = vmul.f32 %v4710_v40, %v1903_v26  ;;  %v1929_v9 = vmul.f32 %v4711_v22, %v1903_v26  ;;  %v1908_v19 = vmul.f32 %v4708_v20, %v1902_v34  ;;  %v1797_v5 = vadd.f32 %v4296_v39, %v1744_v15 }
 0x1c7   : > { %v1918_v57 = vmul.f32 %v4710_v40, %v1902_v34  ;;  %v1928_v46 = vmul.f32 %v4711_v22, %v1902_v34  ;;  %v1826_v41 = vadd.f32 %v4299_v54, %v1754_v8  ;;  %v1904_v29 = vsel %vm258_vm2, %v4376_v50, %v1899_v0 }
 0x1c8   : > { %v1939_v27 = vpop.permute.xlu1 %1938  ;;  %v1855_v2 = vadd.f32 %v4310_v35, %v1764_v63  ;;  %v1911_v47 = vmul.f32 %v4708_v20, %v1905_v28  ;;  %v1921_v37 = vmul.f32 %v4710_v40, %v1905_v28  ;;  %v1931_v39 = vmul.f32 %v4711_v22, %v1905_v28 }
 0x1c9   : > { %v1913_v32 = vadd.f32 %v1909_v51, %v1795_v10  ;;  %v1796_v52 = vadd.f32 %v4292_v6, %v1743_v61  ;;  %v1825_v54 = vadd.f32 %v4302_v48, %v1753_v44  ;;  %v1854_v53 = vadd.f32 %v4315_v7, %v1763_v43 }
 0x1ca   : > { %v1937_v17 = vpop.permute.xlu0 %1936  ;;  %v1923_v50 = vadd.f32 %v1919_v60, %v1824_v18  ;;  %v1933_v59 = vadd.f32 %v1929_v9, %v1853_v24  ;;  %v1912_v16 = vadd.f32 %v1908_v19, %v1794_v42  ;;  %v1910_v35 = vmul.f32 %v4708_v20, %v1904_v29 }
 0x1cb   : > { %v1922_v11 = vadd.f32 %v1918_v57, %v1823_v30  ;;  %v1932_v21 = vadd.f32 %v1928_v46, %v1852_v25  ;;  %v1920_v58 = vmul.f32 %v4710_v40, %v1904_v29  ;;  %v1930_v56 = vmul.f32 %v4711_v22, %v1904_v29 }
 0x1cc   : > { %v1943_v23 = vpop.permute.xlu1 %1942  ;;  %v1915_v38 = vadd.f32 %v1911_v47, %v1797_v5  ;;  %v1925_v6 = vadd.f32 %v1921_v37, %v1826_v41  ;;  %v1935_v33 = vadd.f32 %v1931_v39, %v1855_v2  ;;  %v1914_v4 = vadd.f32 %v1910_v35, %v1796_v52 }
 0x1cd   : > { %v1924_v61 = vadd.f32 %v1920_v58, %v1825_v54  ;;  %v1934_v41 = vadd.f32 %v1930_v56, %v1854_v53 }
 0x1ce   : > { %v4435_v49 = vpop.permute.xlu0 %1940 }
 0x1d0   : > { %v1947_v0 = vpop.permute.xlu1 %1946 }
 0x1d1   : > { %v1953_v48 = vsel %vm309_vm3, %v1939_v27, %v1947_v0 }
 0x1d2   : > { %v1945_v7 = vpop.permute.xlu0 %1944  ;;  %v1959_v3 = vmul.f32 %v4318_v31, %v1953_v48  ;;  %v1969_v55 = vmul.f32 %v4333_v12, %v1953_v48  ;;  %v1979_v15 = vmul.f32 %v4336_v36, %v1953_v48 }
 0x1d3   : > { %v1952_v8 = vsel %vm309_vm3, %v1937_v17, %v1945_v7 }
 0x1d4   : > { %v1958_v10 = vmul.f32 %v4318_v31, %v1952_v8  ;;  %v1968_v26 = vmul.f32 %v4333_v12, %v1952_v8  ;;  %v1978_v63 = vmul.f32 %v4336_v36, %v1952_v8  ;;  %v1963_v45 = vadd.f32 %v1959_v3, %v1913_v32  ;;  %v1951_v27 = vpop.permute.xlu1 %1950 }
 0x1d5   : > { %v1973_v18 = vadd.f32 %v1969_v55, %v1923_v50  ;;  %v1983_v34 = vadd.f32 %v1979_v15, %v1933_v59  ;;  %v1955_v24 = vsel %vm309_vm3, %v1943_v23, %v1951_v27 }
 0x1d6   : > { %v1962_v44 = vadd.f32 %v1958_v10, %v1912_v16  ;;  %v1972_v43 = vadd.f32 %v1968_v26, %v1922_v11  ;;  %v1982_v1 = vadd.f32 %v1978_v63, %v1932_v21  ;;  %v1987_v14 = vmax.f32 %v1963_v45, 0.0  ;;  %v1949_v28 = vpop.permute.xlu0 %1948 }
 0x1d7   : > { %v1995_v42 = vmax.f32 %v1973_v18, 0.0  ;;  %v2003_v17 = vmax.f32 %v1983_v34, 0.0  ;;  %v1961_v20 = vmul.f32 %v4318_v31, %v1955_v24  ;;  %v1971_v25 = vmul.f32 %v4333_v12, %v1955_v24 }
 0x1d8   : > { %v1986_v51 = vmax.f32 %v1962_v44, 0.0  ;;  %v1994_v13 = vmax.f32 %v1972_v43, 0.0  ;;  %v2002_v30 = vmax.f32 %v1982_v1, 0.0  ;;  %v1991_v40 = vmin.f32 %v1987_v14, 6.0 }
 0x1d9   : > { %v1999_v60 = vmin.f32 %v1995_v42, 6.0  ;;  %v2007_v22 = vmin.f32 %v2003_v17, 6.0  ;;  %v1965_v9 = vadd.f32 %v1961_v20, %v1915_v38  ;;  %v1975_v46 = vadd.f32 %v1971_v25, %v1925_v6 }
 0x1da   : > { %v1990_v19 = vmin.f32 %v1986_v51, 6.0  ;;  %v1998_v5 = vmin.f32 %v1994_v13, 6.0  ;;  %v2006_v57 = vmin.f32 %v2002_v30, 6.0  ;;  %2011 = vst [vmem:[%s4463_s4 + $0x8] sm:$0xff] %v1991_v40  ;;  %v1981_v29 = vmul.f32 %v4336_v36, %v1955_v24 }
 0x1db   : > { %2015 = vst [vmem:[%s4463_s4 + $0x28] sm:$0xff] %v1999_v60  ;;  %2019 = vst [vmem:[%s4463_s4 + $0x48] sm:$0xff] %v2007_v22  ;;  %v1989_v23 = vmax.f32 %v1965_v9, 0.0  ;;  %v1954_v2 = vsel %vm309_vm3, %v4435_v49, %v1949_v28  ;;  %v1997_v47 = vmax.f32 %v1975_v46, 0.0 }
 0x1dc   : > { %2010 = vst [vmem:[%s4463_s4] sm:$0xff] %v1990_v19  ;;  %2014 = vst [vmem:[%s4463_s4 + $0x20] sm:$0xff] %v1998_v5  ;;  %v1960_v37 = vmul.f32 %v4318_v31, %v1954_v2  ;;  %v1970_v39 = vmul.f32 %v4333_v12, %v1954_v2  ;;  %v1980_v32 = vmul.f32 %v4336_v36, %v1954_v2 }
 0x1dd   : > { %2018 = vst [vmem:[%s4463_s4 + $0x40] sm:$0xff] %v2006_v57  ;;  %v1985_v52 = vadd.f32 %v1981_v29, %v1935_v33  ;;  %v1993_v54 = vmin.f32 %v1989_v23, 6.0  ;;  %v2001_v53 = vmin.f32 %v1997_v47, 6.0 }
 0x1de   : > { %v1964_v50 = vadd.f32 %v1960_v37, %v1914_v4  ;;  %v1974_v62 = vadd.f32 %v1970_v39, %v1924_v61  ;;  %v1984_v49 = vadd.f32 %v1980_v32, %v1934_v41 }
 0x1df   : > { %v2005_v59 = vmax.f32 %v1985_v52, 0.0  ;;  %2013 = vst [vmem:[%s4463_s4 + $0x18] sm:$0xff] %v1993_v54  ;;  %2017 = vst [vmem:[%s4463_s4 + $0x38] sm:$0xff] %v2001_v53 }
 0x1e0   : > { %v1988_v31 = vmax.f32 %v1964_v50, 0.0  ;;  %v1996_v12 = vmax.f32 %v1974_v62, 0.0  ;;  %v2004_v36 = vmax.f32 %v1984_v49, 0.0 }
 0x1e1   : > { %v2009_v16 = vmin.f32 %v2005_v59, 6.0 }
 0x1e2   : > { %v1992_v35 = vmin.f32 %v1988_v31, 6.0  ;;  %v2000_v11 = vmin.f32 %v1996_v12, 6.0  ;;  %v2008_v21 = vmin.f32 %v2004_v36, 6.0 }
 0x1e3   : > { %2021 = vst [vmem:[%s4463_s4 + $0x58] sm:$0xff] %v2009_v16 }
 0x1e4   : > { %2012 = vst [vmem:[%s4463_s4 + $0x10] sm:$0xff] %v1992_v35  ;;  %2016 = vst [vmem:[%s4463_s4 + $0x30] sm:$0xff] %v2000_v11 }
 0x1e5   : > { %2020 = vst [vmem:[%s4463_s4 + $0x50] sm:$0xff] %v2008_v21 }
 0x1e6   : > { %2381 = shalt.err (!%p2378_p1)
}
 0x1e7   : > { %s2382_s11 = scalar_lea.hbm %s4485_s6, 1536  ;;  %s2386_s25 = scalar_lea.hbm %s4539_s3, 3072 }
 0x1e8   : > { %p2383_p2 = scmp.ne.s32.totalorder %s4485_s6, %s2382_s11  ;;  %p2387_p9 = scmp.lt.u32.totalorder %s4485_s6, %s4539_s3 }
 0x1e9   : > { %p2388_p5 = scmp.lt.u32.totalorder %s2386_s25, %s2382_s11  ;;  %p2390_p10 = scmp.lt.u32.totalorder %s2382_s11, %s4485_s6 }
 0x1ea   : > { %p2384_p3 = pnand %p2383_p2, %p4712_p12 }
 0x1eb   : > { %p2389_p6 = por %p2388_p5, %p2387_p9 }
 0x1ec   : > { %p2385_p4 = pneg %p2384_p3 }
 0x1ed   : > { %p2391_p0 = por %p2390_p10, %p2389_p6 }
 0x1ef   : > { %p2392_p7 = pnand %p2391_p0, %p2385_p4 }
 0x1f1   : > { %2395 = shalt.err (!%p2392_p7)
}
 0x1f2   : > { %s2445_s29 = smov 128   ;;  %s2446_s30 = smov 8  }
 0x1f3   : > { %2269 = dma.vmem_to_hbm [thread:$0]  (%p4712_p12), %s4487_s20, 1536, %s4485_s6, %s4495_s7, %s2445_s29, %s2445_s29, %s2446_s30  }
 0x1f4 PF: > { %p2286_p8 = scmp.ge.s32.totalorder %s2438_s15, 2  ;;  %s2051_s4 = sand.u32 1, %s2426_s12  }
 0x1f5   : > { %p4713_p11 = scmp.ne.s32.totalorder %s4574_s23, 0  ;;  %s2052_s5 = scalar_lea.sflag [#allocation3], %s2051_s4 }
 0x1f7   : > { %p2279_p13 = pnand %p2286_p8, %p4713_p11 }
 0x1f9   : > { %2421 = dma.done.wait (!%p2279_p13), %s2052_s5, 1536  }
 0x1fa   : > { %2423 = vsyncadd (!%p2279_p13), %s2052_s5, 4294965760  ;;  %p15_p1 = scmp.ge.s32.totalorder %s2492_s18, 4   ;;  %s4714_s12 = smov %s2430_s13 }
 0x1fb   : > { %s4715_s13 = smov %s2434_s14  ;;  %s4716_s14 = smov %s2503_s21 }
 0x1fc   : > { %s4717_s15 = smov %s2492_s18  ;;  %17 = sbr.rel (!%p15_p1) target bundleno = 5 (0x5), region = 78 }
 0x203   :  { %2057 = vsyncpa [#allocation3], 1 }
 0x204   :  { %2059 = vsyncpa [#allocation3 + $0x1], 1 }
 0x205   :  { %2060 = vsyncpa [#allocation4], 1 }
 0x206   :  { %2062 = vsyncpa [#allocation4 + $0x1], 1 }
 0x207   :  { %2063 = vsyncpa [#allocation6], 1 }

</bundles_post_ra>
